<compile_context>
chip_gen: v5e
topology: v5e:2x2
jax: 0.10.0
libtpu: 0.0.40
codegen_flags: <defaults>
</compile_context>

<pallas_src>
import functools

import jax
import jax.numpy as jnp
from jax.experimental import pallas as pl
from jax.experimental.pallas import tpu as pltpu


def _pick_cout_tile(cout_pad):
    # MXU-native M tile of the (padded) output-channel dim.  cout_pad is a
    # multiple of 8, so this always returns >= 8.  (Fixes the old off-by-one
    # where cout_pad == 64 returned 32.)
    for t in (256, 128, 64, 32, 16, 8):
        if cout_pad % t == 0:
            return t
    return cout_pad


def _pick_row_tile(oh, ow, *, target_n=384, max_n=4096):
    # The output block's minor dim is oh_t*OW; it must be a multiple of 128 or
    # equal the full OH*OW (BlockSpec (8,128) rule).  Prefer a lane-aligned
    # divisor of OH whose flat width lands near target_n; OH itself (block ==
    # full dim) is always legal and is the fallback.
    cands = [oh]
    for d in range(1, oh):
        if oh % d == 0 and (d * ow) % 128 == 0:
            cands.append(d)
    ok = [d for d in cands if d * ow <= max_n] or cands
    return min(ok, key=lambda d: abs(d * ow - target_n))


def _cconv_kernel(x_ref, w_ref, b_ref, o_ref, col_ref, *,
                  kh, kw, oh_t, ow, sh, sw, cin):
    # x_ref:   (1, Cin, Hp, Wp)       padded input (NCHW), one batch element
    # w_ref:   (cout_t, K)            im2col-ordered weight tile, K = KH*KW*Cin
    # b_ref:   (cout_t, 1)
    # o_ref:   (1, cout_t, oh_t*OW)   flat, lane-dense output tile
    # col_ref: (K, oh_t*OW)           VMEM scratch holding the im2col block
    m = pl.program_id(2)                                    # output-row tile index
    row0 = pl.multiple_of(m * (oh_t * sh), oh_t * sh)
    w_span = (ow - 1) * sw + 1

    for i in range(kh):
        for j in range(kw):
            if sh == 1:
                rows = pl.ds(row0 + i, oh_t)
            else:
                rows = pl.ds(row0 + i, oh_t, sh)            # row stride folded into the vld
            patch = x_ref[0, :, rows, pl.ds(j, w_span)]     # (Cin, oh_t, w_span)
            if sw > 1:
                # TODO(synk): fold the column stride into a strided lane pl.ds.
                patch = jax.lax.slice(patch, (0, 0, 0), (cin, oh_t, w_span),
                                      (1, 1, sw))           # (Cin, oh_t, OW)
            base_k = (i * kw + j) * cin
            # Row-by-row stores at static offsets: keeps the matmul RHS flat
            # without a minor-dims-merging reshape of the 3-D tap value.
            for r in range(oh_t):
                col_ref[pl.ds(base_k, cin), pl.ds(r * ow, ow)] = patch[:, r, :]

    # One fused MXU contraction per grid step, one bias add, one dense store.
    acc = jnp.dot(w_ref[...], col_ref[...],
                  preferred_element_type=jnp.float32)       # (cout_t, oh_t*OW)
    o_ref[0, :, :] = (acc + b_ref[...]).astype(o_ref.dtype)


def cconv_forward(x, centroids, idx, scales, cut, bias, stride, padding,
                  *, use_bf16=False):
    """Pallas implementation of CConv.forward.

    x:         (N, Cin, H, W)    float32 (NCHW, like PyTorch)
    centroids: (k, KH, KW)       float32
    idx:       (Cout*Cin,)       int32   codebook indices
    scales:    (Cout, 1, 1, 1)   float32
    cut:       (Cout, Cin, 1, 1) float32 binary mask (or None)
    bias:      (Cout,)           float32 (or None)
    returns    (N, Cout, OH, OW) float32
    """
    n, cin, h, w = x.shape
    _, kh, kw = centroids.shape
    cout = scales.shape[0]
    sh, sw = stride
    ph, pw = padding
    out_dtype = x.dtype

    # ---- parameter reconstruction (mirrors CConv.get_parameters, n_bits==16) ----
    weight = centroids[idx].reshape(cout, cin, kh, kw)
    weight = weight * scales.astype(jnp.float16).astype(jnp.float32)
    if cut is not None:
        weight = weight * cut
    if bias is None:
        bias = jnp.zeros((cout,), jnp.float32)

    oh = (h + 2 * ph - kh) // sh + 1
    ow = (w + 2 * pw - kw) // sw + 1
    hp, wp = h + 2 * ph, w + 2 * pw
    ktot = kh * kw * cin

    # NCHW throughout: only spatial zero-padding, no activation transposes.
    x_pad = jnp.pad(x, ((0, 0), (0, 0), (ph, ph), (pw, pw)))

    # Weight as (Cout, K) with (i, j, ci) minor ordering -- matches the kernel's
    # tap stacking order.  Pad Cout to a sublane multiple.
    w_lhs = jnp.transpose(weight, (0, 2, 3, 1)).reshape(cout, ktot)
    b2 = bias.astype(jnp.float32).reshape(cout, 1)
    cout_pad = -(-cout // 8) * 8
    if cout_pad != cout:
        w_lhs = jnp.pad(w_lhs, ((0, cout_pad - cout), (0, 0)))
        b2 = jnp.pad(b2, ((0, cout_pad - cout), (0, 0)))

    act_dtype = jnp.bfloat16 if use_bf16 else x.dtype
    if use_bf16:  # bf16 MXU inputs, f32 accumulate (changes numerics slightly)
        x_pad = x_pad.astype(jnp.bfloat16)
        w_lhs = w_lhs.astype(jnp.bfloat16)

    cout_t = _pick_cout_tile(cout_pad)
    oh_t = _pick_row_tile(oh, ow)
    n_flat = oh_t * ow

    kernel = functools.partial(_cconv_kernel, kh=kh, kw=kw, oh_t=oh_t, ow=ow,
                               sh=sh, sw=sw, cin=cin)

    act_bytes = jnp.dtype(act_dtype).itemsize
    in_block_bytes = cin * hp * wp * act_bytes
    # The input block index is constant over the inner grid axes: when it is
    # big, single-buffer it to halve the largest VMEM consumer.
    n_in_bufs = 1 if in_block_bytes > (8 << 20) else 2
    in_spec_kwargs = {}
    if n_in_bufs == 1:
        in_spec_kwargs["pipeline_mode"] = pl.Buffered(1)
    x_spec = pl.BlockSpec((1, cin, hp, wp), lambda b, c, m: (b, 0, 0, 0),
                          **in_spec_kwargs)

    # Explicit VMEM budget from the actual block/scratch sizes, with headroom,
    # capped at 75% of the physical per-core VMEM.
    est = (n_in_bufs * in_block_bytes          # input block
           + 2 * cout_t * ktot * act_bytes     # weight block (double-buffered)
           + 2 * cout_t * 4                    # bias block
           + 2 * cout_t * n_flat * 4           # output block
           + ktot * n_flat * act_bytes)        # im2col scratch
    try:
        vmem_cap = pltpu.get_tpu_info().vmem_capacity_bytes
    except Exception:
        vmem_cap = 128 << 20
    vmem_limit = int(min(vmem_cap * 3 // 4, max(32 << 20, 2 * est)))

    out = pl.pallas_call(
        kernel,
        out_shape=jax.ShapeDtypeStruct((n, cout_pad, oh * ow), out_dtype),
        grid_spec=pltpu.PrefetchScalarGridSpec(
            num_scalar_prefetch=0,
            grid=(n, cout_pad // cout_t, oh // oh_t),
            in_specs=[
                # Full padded image per batch element; block index constant over
                # the inner grid axes so it is only DMA'd once per image.
                x_spec,
                pl.BlockSpec((cout_t, ktot), lambda b, c, m: (c, 0)),
                pl.BlockSpec((cout_t, 1), lambda b, c, m: (c, 0)),
            ],
            # Lane-dense flat output: one unmasked wide store per grid step.
            out_specs=pl.BlockSpec((1, cout_t, n_flat),
                                   lambda b, c, m: (b, c, m)),
            scratch_shapes=[pltpu.VMEM((ktot, n_flat), act_dtype)],
        ),
        compiler_params=pltpu.CompilerParams(
            dimension_semantics=("parallel", "parallel", "parallel"),
            vmem_limit_bytes=vmem_limit,
        ),
    )(x_pad, w_lhs, b2)

    out = out.reshape(n, cout_pad, oh, ow)   # free metadata reshape
    if cout_pad != cout:
        out = out[:, :cout]
    return out


if __name__ == "__main__":
    # Small, deterministic configuration consistent with the module.
    N, CIN, COUT, H, W = 2, 4, 8, 16, 16
    K, KH, KW = 16, 3, 3
    STRIDE, PADDING = (1, 1), (1, 1)

    key = jax.random.PRNGKey(0)
    k_x, k_c, k_i, k_s, k_b, k_cut = jax.random.split(key, 6)

    x = jax.random.normal(k_x, (N, CIN, H, W), dtype=jnp.float32)
    centroids = jax.random.normal(k_c, (K, KH, KW), dtype=jnp.float32)
    idx = jax.random.randint(k_i, (COUT * CIN,), 0, K, dtype=jnp.int32)
    scales = jax.random.normal(k_s, (COUT, 1, 1, 1), dtype=jnp.float32)
    bias = jax.random.normal(k_b, (COUT,), dtype=jnp.float32)
    cut = (jax.random.uniform(k_cut, (COUT, CIN, 1, 1)) < 0.8).astype(jnp.float32)

    y = jax.block_until_ready(
        cconv_forward(x, centroids, idx, scales, cut, bias, STRIDE, PADDING)
    )

    # Pure-JAX reference (same weight reconstruction + lax conv) for sanity.
    w_ref = centroids[idx].reshape(COUT, CIN, KH, KW)
    w_ref = w_ref * scales.astype(jnp.float16).astype(jnp.float32) * cut
    y_ref = jax.lax.conv_general_dilated(
        x, w_ref, window_strides=STRIDE,
        padding=[(PADDING[0], PADDING[0]), (PADDING[1], PADDING[1])],
        dimension_numbers=("NCHW", "OIHW", "NCHW"),
    ) + bias.reshape(1, COUT, 1, 1)

    assert y.shape == (N, COUT, H, W), y.shape
    max_err = float(jnp.abs(y - y_ref).max())
    assert jnp.allclose(y, y_ref, atol=1e-3, rtol=1e-3), max_err

    print("KERNEL_OK")
</pallas_src>

<mosaic_0001>
module attributes {stable_mosaic.version = 11 : i64} {
  func.func @_cconv_kernel(%arg0: i32, %arg1: i32, %arg2: i32, %arg3: memref<1x4x18x18xf32, #tpu.memory_space<vmem>>, %arg4: memref<8x36xf32, #tpu.memory_space<vmem>>, %arg5: memref<8x1xf32, #tpu.memory_space<vmem>>, %arg6: memref<1x8x256xf32, #tpu.memory_space<vmem>>, %arg7: memref<36x256xf32, #tpu.memory_space<vmem>>) attributes {dimension_semantics = [#tpu.dimension_semantics<parallel>, #tpu.dimension_semantics<parallel>, #tpu.dimension_semantics<parallel>], iteration_bounds = array<i64: 2, 1, 1>, scalar_prefetch = 0 : i64, scratch_operands = 1 : i64, tpu.core_type = #tpu.core_type<tc>, window_params = [{transform_indices = @transform_0, window_bounds = array<i64: 1, 4, 18, 18>}, {transform_indices = @transform_1, window_bounds = array<i64: 8, 36>}, {transform_indices = @transform_2, window_bounds = array<i64: 8, 1>}, {transform_indices = @transform_3, window_bounds = array<i64: 1, 8, 256>}]} {
    %c16_i32 = arith.constant 16 : i32
    %0 = arith.muli %arg2, %c16_i32 : i32
    %1 = tpu.assume_multiple %0, 16 : i32
    %c0_i32 = arith.constant 0 : i32
    %2 = arith.addi %1, %c0_i32 : i32
    %c0 = arith.constant 0 : index
    %c0_0 = arith.constant 0 : index
    %3 = arith.index_cast %2 : i32 to index
    %c0_1 = arith.constant 0 : index
    %4 = vector.load %arg3[%c0, %c0_0, %3, %c0_1] : memref<1x4x18x18xf32, #tpu.memory_space<vmem>>, vector<1x4x16x16xf32>
    %5 = vector.shape_cast %4 : vector<1x4x16x16xf32> to vector<4x16x16xf32>
    %6 = vector.extract_strided_slice %5 {offsets = [0, 0, 0], sizes = [4, 1, 16], strides = [1, 1, 1]} : vector<4x16x16xf32> to vector<4x1x16xf32>
    %7 = vector.shape_cast %6 : vector<4x1x16xf32> to vector<4x16xf32>
    %c0_2 = arith.constant 0 : index
    %c0_3 = arith.constant 0 : index
    %8 = vector.load %arg7[%c0_2, %c0_3] : memref<36x256xf32, #tpu.memory_space<vmem>>, vector<4x16xf32>
    tpu.vector_store %arg7[%c0_2, %c0_3], %7 {strides = array<i32>} : memref<36x256xf32, #tpu.memory_space<vmem>>, vector<4x16xf32>,
    %9 = vector.extract_strided_slice %5 {offsets = [0, 1, 0], sizes = [4, 1, 16], strides = [1, 1, 1]} : vector<4x16x16xf32> to vector<4x1x16xf32>
    %10 = vector.shape_cast %9 : vector<4x1x16xf32> to vector<4x16xf32>
    %c0_4 = arith.constant 0 : index
    %c16 = arith.constant 16 : index
    %11 = vector.load %arg7[%c0_4, %c16] : memref<36x256xf32, #tpu.memory_space<vmem>>, vector<4x16xf32>
    tpu.vector_store %arg7[%c0_4, %c16], %10 {strides = array<i32>} : memref<36x256xf32, #tpu.memory_space<vmem>>, vector<4x16xf32>,
    %12 = vector.extract_strided_slice %5 {offsets = [0, 2, 0], sizes = [4, 1, 16], strides = [1, 1, 1]} : vector<4x16x16xf32> to vector<4x1x16xf32>
    %13 = vector.shape_cast %12 : vector<4x1x16xf32> to vector<4x16xf32>
    %c0_5 = arith.constant 0 : index
    %c32 = arith.constant 32 : index
    %14 = vector.load %arg7[%c0_5, %c32] : memref<36x256xf32, #tpu.memory_space<vmem>>, vector<4x16xf32>
    tpu.vector_store %arg7[%c0_5, %c32], %13 {strides = array<i32>} : memref<36x256xf32, #tpu.memory_space<vmem>>, vector<4x16xf32>,
    %15 = vector.extract_strided_slice %5 {offsets = [0, 3, 0], sizes = [4, 1, 16], strides = [1, 1, 1]} : vector<4x16x16xf32> to vector<4x1x16xf32>
    %16 = vector.shape_cast %15 : vector<4x1x16xf32> to vector<4x16xf32>
    %c0_6 = arith.constant 0 : index
    %c48 = arith.constant 48 : index
    %17 = vector.load %arg7[%c0_6, %c48] : memref<36x256xf32, #tpu.memory_space<vmem>>, vector<4x16xf32>
    tpu.vector_store %arg7[%c0_6, %c48], %16 {strides = array<i32>} : memref<36x256xf32, #tpu.memory_space<vmem>>, vector<4x16xf32>,
    %18 = vector.extract_strided_slice %5 {offsets = [0, 4, 0], sizes = [4, 1, 16], strides = [1, 1, 1]} : vector<4x16x16xf32> to vector<4x1x16xf32>
    %19 = vector.shape_cast %18 : vector<4x1x16xf32> to vector<4x16xf32>
    %c0_7 = arith.constant 0 : index
    %c64 = arith.constant 64 : index
    %20 = vector.load %arg7[%c0_7, %c64] : memref<36x256xf32, #tpu.memory_space<vmem>>, vector<4x16xf32>
    tpu.vector_store %arg7[%c0_7, %c64], %19 {strides = array<i32>} : memref<36x256xf32, #tpu.memory_space<vmem>>, vector<4x16xf32>,
    %21 = vector.extract_strided_slice %5 {offsets = [0, 5, 0], sizes = [4, 1, 16], strides = [1, 1, 1]} : vector<4x16x16xf32> to vector<4x1x16xf32>
    %22 = vector.shape_cast %21 : vector<4x1x16xf32> to vector<4x16xf32>
    %c0_8 = arith.constant 0 : index
    %c80 = arith.constant 80 : index
    %23 = vector.load %arg7[%c0_8, %c80] : memref<36x256xf32, #tpu.memory_space<vmem>>, vector<4x16xf32>
    tpu.vector_store %arg7[%c0_8, %c80], %22 {strides = array<i32>} : memref<36x256xf32, #tpu.memory_space<vmem>>, vector<4x16xf32>,
    %24 = vector.extract_strided_slice %5 {offsets = [0, 6, 0], sizes = [4, 1, 16], strides = [1, 1, 1]} : vector<4x16x16xf32> to vector<4x1x16xf32>
    %25 = vector.shape_cast %24 : vector<4x1x16xf32> to vector<4x16xf32>
    %c0_9 = arith.constant 0 : index
    %c96 = arith.constant 96 : index
    %26 = vector.load %arg7[%c0_9, %c96] : memref<36x256xf32, #tpu.memory_space<vmem>>, vector<4x16xf32>
    tpu.vector_store %arg7[%c0_9, %c96], %25 {strides = array<i32>} : memref<36x256xf32, #tpu.memory_space<vmem>>, vector<4x16xf32>,
    %27 = vector.extract_strided_slice %5 {offsets = [0, 7, 0], sizes = [4, 1, 16], strides = [1, 1, 1]} : vector<4x16x16xf32> to vector<4x1x16xf32>
    %28 = vector.shape_cast %27 : vector<4x1x16xf32> to vector<4x16xf32>
    %c0_10 = arith.constant 0 : index
    %c112 = arith.constant 112 : index
    %29 = vector.load %arg7[%c0_10, %c112] : memref<36x256xf32, #tpu.memory_space<vmem>>, vector<4x16xf32>
    tpu.vector_store %arg7[%c0_10, %c112], %28 {strides = array<i32>} : memref<36x256xf32, #tpu.memory_space<vmem>>, vector<4x16xf32>,
    %30 = vector.extract_strided_slice %5 {offsets = [0, 8, 0], sizes = [4, 1, 16], strides = [1, 1, 1]} : vector<4x16x16xf32> to vector<4x1x16xf32>
    %31 = vector.shape_cast %30 : vector<4x1x16xf32> to vector<4x16xf32>
    %c0_11 = arith.constant 0 : index
    %c128 = arith.constant 128 : index
    %32 = vector.load %arg7[%c0_11, %c128] : memref<36x256xf32, #tpu.memory_space<vmem>>, vector<4x16xf32>
    tpu.vector_store %arg7[%c0_11, %c128], %31 {strides = array<i32>} : memref<36x256xf32, #tpu.memory_space<vmem>>, vector<4x16xf32>,
    %33 = vector.extract_strided_slice %5 {offsets = [0, 9, 0], sizes = [4, 1, 16], strides = [1, 1, 1]} : vector<4x16x16xf32> to vector<4x1x16xf32>
    %34 = vector.shape_cast %33 : vector<4x1x16xf32> to vector<4x16xf32>
    %c0_12 = arith.constant 0 : index
    %c144 = arith.constant 144 : index
    %35 = vector.load %arg7[%c0_12, %c144] : memref<36x256xf32, #tpu.memory_space<vmem>>, vector<4x16xf32>
    tpu.vector_store %arg7[%c0_12, %c144], %34 {strides = array<i32>} : memref<36x256xf32, #tpu.memory_space<vmem>>, vector<4x16xf32>,
    %36 = vector.extract_strided_slice %5 {offsets = [0, 10, 0], sizes = [4, 1, 16], strides = [1, 1, 1]} : vector<4x16x16xf32> to vector<4x1x16xf32>
    %37 = vector.shape_cast %36 : vector<4x1x16xf32> to vector<4x16xf32>
    %c0_13 = arith.constant 0 : index
    %c160 = arith.constant 160 : index
    %38 = vector.load %arg7[%c0_13, %c160] : memref<36x256xf32, #tpu.memory_space<vmem>>, vector<4x16xf32>
    tpu.vector_store %arg7[%c0_13, %c160], %37 {strides = array<i32>} : memref<36x256xf32, #tpu.memory_space<vmem>>, vector<4x16xf32>,
    %39 = vector.extract_strided_slice %5 {offsets = [0, 11, 0], sizes = [4, 1, 16], strides = [1, 1, 1]} : vector<4x16x16xf32> to vector<4x1x16xf32>
    %40 = vector.shape_cast %39 : vector<4x1x16xf32> to vector<4x16xf32>
    %c0_14 = arith.constant 0 : index
    %c176 = arith.constant 176 : index
    %41 = vector.load %arg7[%c0_14, %c176] : memref<36x256xf32, #tpu.memory_space<vmem>>, vector<4x16xf32>
    tpu.vector_store %arg7[%c0_14, %c176], %40 {strides = array<i32>} : memref<36x256xf32, #tpu.memory_space<vmem>>, vector<4x16xf32>,
    %42 = vector.extract_strided_slice %5 {offsets = [0, 12, 0], sizes = [4, 1, 16], strides = [1, 1, 1]} : vector<4x16x16xf32> to vector<4x1x16xf32>
    %43 = vector.shape_cast %42 : vector<4x1x16xf32> to vector<4x16xf32>
    %c0_15 = arith.constant 0 : index
    %c192 = arith.constant 192 : index
    %44 = vector.load %arg7[%c0_15, %c192] : memref<36x256xf32, #tpu.memory_space<vmem>>, vector<4x16xf32>
    tpu.vector_store %arg7[%c0_15, %c192], %43 {strides = array<i32>} : memref<36x256xf32, #tpu.memory_space<vmem>>, vector<4x16xf32>,
    %45 = vector.extract_strided_slice %5 {offsets = [0, 13, 0], sizes = [4, 1, 16], strides = [1, 1, 1]} : vector<4x16x16xf32> to vector<4x1x16xf32>
    %46 = vector.shape_cast %45 : vector<4x1x16xf32> to vector<4x16xf32>
    %c0_16 = arith.constant 0 : index
    %c208 = arith.constant 208 : index
    %47 = vector.load %arg7[%c0_16, %c208] : memref<36x256xf32, #tpu.memory_space<vmem>>, vector<4x16xf32>
    tpu.vector_store %arg7[%c0_16, %c208], %46 {strides = array<i32>} : memref<36x256xf32, #tpu.memory_space<vmem>>, vector<4x16xf32>,
    %48 = vector.extract_strided_slice %5 {offsets = [0, 14, 0], sizes = [4, 1, 16], strides = [1, 1, 1]} : vector<4x16x16xf32> to vector<4x1x16xf32>
    %49 = vector.shape_cast %48 : vector<4x1x16xf32> to vector<4x16xf32>
    %c0_17 = arith.constant 0 : index
    %c224 = arith.constant 224 : index
    %50 = vector.load %arg7[%c0_17, %c224] : memref<36x256xf32, #tpu.memory_space<vmem>>, vector<4x16xf32>
    tpu.vector_store %arg7[%c0_17, %c224], %49 {strides = array<i32>} : memref<36x256xf32, #tpu.memory_space<vmem>>, vector<4x16xf32>,
    %51 = vector.extract_strided_slice %5 {offsets = [0, 15, 0], sizes = [4, 1, 16], strides = [1, 1, 1]} : vector<4x16x16xf32> to vector<4x1x16xf32>
    %52 = vector.shape_cast %51 : vector<4x1x16xf32> to vector<4x16xf32>
    %c0_18 = arith.constant 0 : index
    %c240 = arith.constant 240 : index
    %53 = vector.load %arg7[%c0_18, %c240] : memref<36x256xf32, #tpu.memory_space<vmem>>, vector<4x16xf32>
    tpu.vector_store %arg7[%c0_18, %c240], %52 {strides = array<i32>} : memref<36x256xf32, #tpu.memory_space<vmem>>, vector<4x16xf32>,
    %c0_i32_19 = arith.constant 0 : i32
    %54 = arith.addi %1, %c0_i32_19 : i32
    %c0_20 = arith.constant 0 : index
    %c0_21 = arith.constant 0 : index
    %55 = arith.index_cast %54 : i32 to index
    %c1 = arith.constant 1 : index
    %56 = vector.load %arg3[%c0_20, %c0_21, %55, %c1] : memref<1x4x18x18xf32, #tpu.memory_space<vmem>>, vector<1x4x16x16xf32>
    %57 = vector.shape_cast %56 : vector<1x4x16x16xf32> to vector<4x16x16xf32>
    %58 = vector.extract_strided_slice %57 {offsets = [0, 0, 0], sizes = [4, 1, 16], strides = [1, 1, 1]} : vector<4x16x16xf32> to vector<4x1x16xf32>
    %59 = vector.shape_cast %58 : vector<4x1x16xf32> to vector<4x16xf32>
    %c4 = arith.constant 4 : index
    %c0_22 = arith.constant 0 : index
    %60 = vector.load %arg7[%c4, %c0_22] : memref<36x256xf32, #tpu.memory_space<vmem>>, vector<4x16xf32>
    tpu.vector_store %arg7[%c4, %c0_22], %59 {strides = array<i32>} : memref<36x256xf32, #tpu.memory_space<vmem>>, vector<4x16xf32>,
    %61 = vector.extract_strided_slice %57 {offsets = [0, 1, 0], sizes = [4, 1, 16], strides = [1, 1, 1]} : vector<4x16x16xf32> to vector<4x1x16xf32>
    %62 = vector.shape_cast %61 : vector<4x1x16xf32> to vector<4x16xf32>
    %c4_23 = arith.constant 4 : index
    %c16_24 = arith.constant 16 : index
    %63 = vector.load %arg7[%c4_23, %c16_24] : memref<36x256xf32, #tpu.memory_space<vmem>>, vector<4x16xf32>
    tpu.vector_store %arg7[%c4_23, %c16_24], %62 {strides = array<i32>} : memref<36x256xf32, #tpu.memory_space<vmem>>, vector<4x16xf32>,
    %64 = vector.extract_strided_slice %57 {offsets = [0, 2, 0], sizes = [4, 1, 16], strides = [1, 1, 1]} : vector<4x16x16xf32> to vector<4x1x16xf32>
    %65 = vector.shape_cast %64 : vector<4x1x16xf32> to vector<4x16xf32>
    %c4_25 = arith.constant 4 : index
    %c32_26 = arith.constant 32 : index
    %66 = vector.load %arg7[%c4_25, %c32_26] : memref<36x256xf32, #tpu.memory_space<vmem>>, vector<4x16xf32>
    tpu.vector_store %arg7[%c4_25, %c32_26], %65 {strides = array<i32>} : memref<36x256xf32, #tpu.memory_space<vmem>>, vector<4x16xf32>,
    %67 = vector.extract_strided_slice %57 {offsets = [0, 3, 0], sizes = [4, 1, 16], strides = [1, 1, 1]} : vector<4x16x16xf32> to vector<4x1x16xf32>
    %68 = vector.shape_cast %67 : vector<4x1x16xf32> to vector<4x16xf32>
    %c4_27 = arith.constant 4 : index
    %c48_28 = arith.constant 48 : index
    %69 = vector.load %arg7[%c4_27, %c48_28] : memref<36x256xf32, #tpu.memory_space<vmem>>, vector<4x16xf32>
    tpu.vector_store %arg7[%c4_27, %c48_28], %68 {strides = array<i32>} : memref<36x256xf32, #tpu.memory_space<vmem>>, vector<4x16xf32>,
    %70 = vector.extract_strided_slice %57 {offsets = [0, 4, 0], sizes = [4, 1, 16], strides = [1, 1, 1]} : vector<4x16x16xf32> to vector<4x1x16xf32>
    %71 = vector.shape_cast %70 : vector<4x1x16xf32> to vector<4x16xf32>
    %c4_29 = arith.constant 4 : index
    %c64_30 = arith.constant 64 : index
    %72 = vector.load %arg7[%c4_29, %c64_30] : memref<36x256xf32, #tpu.memory_space<vmem>>, vector<4x16xf32>
    tpu.vector_store %arg7[%c4_29, %c64_30], %71 {strides = array<i32>} : memref<36x256xf32, #tpu.memory_space<vmem>>, vector<4x16xf32>,
    %73 = vector.extract_strided_slice %57 {offsets = [0, 5, 0], sizes = [4, 1, 16], strides = [1, 1, 1]} : vector<4x16x16xf32> to vector<4x1x16xf32>
    %74 = vector.shape_cast %73 : vector<4x1x16xf32> to vector<4x16xf32>
    %c4_31 = arith.constant 4 : index
    %c80_32 = arith.constant 80 : index
    %75 = vector.load %arg7[%c4_31, %c80_32] : memref<36x256xf32, #tpu.memory_space<vmem>>, vector<4x16xf32>
    tpu.vector_store %arg7[%c4_31, %c80_32], %74 {strides = array<i32>} : memref<36x256xf32, #tpu.memory_space<vmem>>, vector<4x16xf32>,
    %76 = vector.extract_strided_slice %57 {offsets = [0, 6, 0], sizes = [4, 1, 16], strides = [1, 1, 1]} : vector<4x16x16xf32> to vector<4x1x16xf32>
    %77 = vector.shape_cast %76 : vector<4x1x16xf32> to vector<4x16xf32>
    %c4_33 = arith.constant 4 : index
    %c96_34 = arith.constant 96 : index
    %78 = vector.load %arg7[%c4_33, %c96_34] : memref<36x256xf32, #tpu.memory_space<vmem>>, vector<4x16xf32>
    tpu.vector_store %arg7[%c4_33, %c96_34], %77 {strides = array<i32>} : memref<36x256xf32, #tpu.memory_space<vmem>>, vector<4x16xf32>,
    %79 = vector.extract_strided_slice %57 {offsets = [0, 7, 0], sizes = [4, 1, 16], strides = [1, 1, 1]} : vector<4x16x16xf32> to vector<4x1x16xf32>
    %80 = vector.shape_cast %79 : vector<4x1x16xf32> to vector<4x16xf32>
    %c4_35 = arith.constant 4 : index
    %c112_36 = arith.constant 112 : index
    %81 = vector.load %arg7[%c4_35, %c112_36] : memref<36x256xf32, #tpu.memory_space<vmem>>, vector<4x16xf32>
    tpu.vector_store %arg7[%c4_35, %c112_36], %80 {strides = array<i32>} : memref<36x256xf32, #tpu.memory_space<vmem>>, vector<4x16xf32>,
    %82 = vector.extract_strided_slice %57 {offsets = [0, 8, 0], sizes = [4, 1, 16], strides = [1, 1, 1]} : vector<4x16x16xf32> to vector<4x1x16xf32>
    %83 = vector.shape_cast %82 : vector<4x1x16xf32> to vector<4x16xf32>
    %c4_37 = arith.constant 4 : index
    %c128_38 = arith.constant 128 : index
    %84 = vector.load %arg7[%c4_37, %c128_38] : memref<36x256xf32, #tpu.memory_space<vmem>>, vector<4x16xf32>
    tpu.vector_store %arg7[%c4_37, %c128_38], %83 {strides = array<i32>} : memref<36x256xf32, #tpu.memory_space<vmem>>, vector<4x16xf32>,
    %85 = vector.extract_strided_slice %57 {offsets = [0, 9, 0], sizes = [4, 1, 16], strides = [1, 1, 1]} : vector<4x16x16xf32> to vector<4x1x16xf32>
    %86 = vector.shape_cast %85 : vector<4x1x16xf32> to vector<4x16xf32>
    %c4_39 = arith.constant 4 : index
    %c144_40 = arith.constant 144 : index
    %87 = vector.load %arg7[%c4_39, %c144_40] : memref<36x256xf32, #tpu.memory_space<vmem>>, vector<4x16xf32>
    tpu.vector_store %arg7[%c4_39, %c144_40], %86 {strides = array<i32>} : memref<36x256xf32, #tpu.memory_space<vmem>>, vector<4x16xf32>,
    %88 = vector.extract_strided_slice %57 {offsets = [0, 10, 0], sizes = [4, 1, 16], strides = [1, 1, 1]} : vector<4x16x16xf32> to vector<4x1x16xf32>
    %89 = vector.shape_cast %88 : vector<4x1x16xf32> to vector<4x16xf32>
    %c4_41 = arith.constant 4 : index
    %c160_42 = arith.constant 160 : index
    %90 = vector.load %arg7[%c4_41, %c160_42] : memref<36x256xf32, #tpu.memory_space<vmem>>, vector<4x16xf32>
    tpu.vector_store %arg7[%c4_41, %c160_42], %89 {strides = array<i32>} : memref<36x256xf32, #tpu.memory_space<vmem>>, vector<4x16xf32>,
    %91 = vector.extract_strided_slice %57 {offsets = [0, 11, 0], sizes = [4, 1, 16], strides = [1, 1, 1]} : vector<4x16x16xf32> to vector<4x1x16xf32>
    %92 = vector.shape_cast %91 : vector<4x1x16xf32> to vector<4x16xf32>
    %c4_43 = arith.constant 4 : index
    %c176_44 = arith.constant 176 : index
    %93 = vector.load %arg7[%c4_43, %c176_44] : memref<36x256xf32, #tpu.memory_space<vmem>>, vector<4x16xf32>
    tpu.vector_store %arg7[%c4_43, %c176_44], %92 {strides = array<i32>} : memref<36x256xf32, #tpu.memory_space<vmem>>, vector<4x16xf32>,
    %94 = vector.extract_strided_slice %57 {offsets = [0, 12, 0], sizes = [4, 1, 16], strides = [1, 1, 1]} : vector<4x16x16xf32> to vector<4x1x16xf32>
    %95 = vector.shape_cast %94 : vector<4x1x16xf32> to vector<4x16xf32>
    %c4_45 = arith.constant 4 : index
    %c192_46 = arith.constant 192 : index
    %96 = vector.load %arg7[%c4_45, %c192_46] : memref<36x256xf32, #tpu.memory_space<vmem>>, vector<4x16xf32>
    tpu.vector_store %arg7[%c4_45, %c192_46], %95 {strides = array<i32>} : memref<36x256xf32, #tpu.memory_space<vmem>>, vector<4x16xf32>,
    %97 = vector.extract_strided_slice %57 {offsets = [0, 13, 0], sizes = [4, 1, 16], strides = [1, 1, 1]} : vector<4x16x16xf32> to vector<4x1x16xf32>
    %98 = vector.shape_cast %97 : vector<4x1x16xf32> to vector<4x16xf32>
    %c4_47 = arith.constant 4 : index
    %c208_48 = arith.constant 208 : index
    %99 = vector.load %arg7[%c4_47, %c208_48] : memref<36x256xf32, #tpu.memory_space<vmem>>, vector<4x16xf32>
    tpu.vector_store %arg7[%c4_47, %c208_48], %98 {strides = array<i32>} : memref<36x256xf32, #tpu.memory_space<vmem>>, vector<4x16xf32>,
    %100 = vector.extract_strided_slice %57 {offsets = [0, 14, 0], sizes = [4, 1, 16], strides = [1, 1, 1]} : vector<4x16x16xf32> to vector<4x1x16xf32>
    %101 = vector.shape_cast %100 : vector<4x1x16xf32> to vector<4x16xf32>
    %c4_49 = arith.constant 4 : index
    %c224_50 = arith.constant 224 : index
    %102 = vector.load %arg7[%c4_49, %c224_50] : memref<36x256xf32, #tpu.memory_space<vmem>>, vector<4x16xf32>
    tpu.vector_store %arg7[%c4_49, %c224_50], %101 {strides = array<i32>} : memref<36x256xf32, #tpu.memory_space<vmem>>, vector<4x16xf32>,
    %103 = vector.extract_strided_slice %57 {offsets = [0, 15, 0], sizes = [4, 1, 16], strides = [1, 1, 1]} : vector<4x16x16xf32> to vector<4x1x16xf32>
    %104 = vector.shape_cast %103 : vector<4x1x16xf32> to vector<4x16xf32>
    %c4_51 = arith.constant 4 : index
    %c240_52 = arith.constant 240 : index
    %105 = vector.load %arg7[%c4_51, %c240_52] : memref<36x256xf32, #tpu.memory_space<vmem>>, vector<4x16xf32>
    tpu.vector_store %arg7[%c4_51, %c240_52], %104 {strides = array<i32>} : memref<36x256xf32, #tpu.memory_space<vmem>>, vector<4x16xf32>,
    %c0_i32_53 = arith.constant 0 : i32
    %106 = arith.addi %1, %c0_i32_53 : i32
    %c0_54 = arith.constant 0 : index
    %c0_55 = arith.constant 0 : index
    %107 = arith.index_cast %106 : i32 to index
    %c2 = arith.constant 2 : index
    %108 = vector.load %arg3[%c0_54, %c0_55, %107, %c2] : memref<1x4x18x18xf32, #tpu.memory_space<vmem>>, vector<1x4x16x16xf32>
    %109 = vector.shape_cast %108 : vector<1x4x16x16xf32> to vector<4x16x16xf32>
    %110 = vector.extract_strided_slice %109 {offsets = [0, 0, 0], sizes = [4, 1, 16], strides = [1, 1, 1]} : vector<4x16x16xf32> to vector<4x1x16xf32>
    %111 = vector.shape_cast %110 : vector<4x1x16xf32> to vector<4x16xf32>
    %c8 = arith.constant 8 : index
    %c0_56 = arith.constant 0 : index
    %112 = vector.load %arg7[%c8, %c0_56] : memref<36x256xf32, #tpu.memory_space<vmem>>, vector<4x16xf32>
    tpu.vector_store %arg7[%c8, %c0_56], %111 {strides = array<i32>} : memref<36x256xf32, #tpu.memory_space<vmem>>, vector<4x16xf32>,
    %113 = vector.extract_strided_slice %109 {offsets = [0, 1, 0], sizes = [4, 1, 16], strides = [1, 1, 1]} : vector<4x16x16xf32> to vector<4x1x16xf32>
    %114 = vector.shape_cast %113 : vector<4x1x16xf32> to vector<4x16xf32>
    %c8_57 = arith.constant 8 : index
    %c16_58 = arith.constant 16 : index
    %115 = vector.load %arg7[%c8_57, %c16_58] : memref<36x256xf32, #tpu.memory_space<vmem>>, vector<4x16xf32>
    tpu.vector_store %arg7[%c8_57, %c16_58], %114 {strides = array<i32>} : memref<36x256xf32, #tpu.memory_space<vmem>>, vector<4x16xf32>,
    %116 = vector.extract_strided_slice %109 {offsets = [0, 2, 0], sizes = [4, 1, 16], strides = [1, 1, 1]} : vector<4x16x16xf32> to vector<4x1x16xf32>
    %117 = vector.shape_cast %116 : vector<4x1x16xf32> to vector<4x16xf32>
    %c8_59 = arith.constant 8 : index
    %c32_60 = arith.constant 32 : index
    %118 = vector.load %arg7[%c8_59, %c32_60] : memref<36x256xf32, #tpu.memory_space<vmem>>, vector<4x16xf32>
    tpu.vector_store %arg7[%c8_59, %c32_60], %117 {strides = array<i32>} : memref<36x256xf32, #tpu.memory_space<vmem>>, vector<4x16xf32>,
    %119 = vector.extract_strided_slice %109 {offsets = [0, 3, 0], sizes = [4, 1, 16], strides = [1, 1, 1]} : vector<4x16x16xf32> to vector<4x1x16xf32>
    %120 = vector.shape_cast %119 : vector<4x1x16xf32> to vector<4x16xf32>
    %c8_61 = arith.constant 8 : index
    %c48_62 = arith.constant 48 : index
    %121 = vector.load %arg7[%c8_61, %c48_62] : memref<36x256xf32, #tpu.memory_space<vmem>>, vector<4x16xf32>
    tpu.vector_store %arg7[%c8_61, %c48_62], %120 {strides = array<i32>} : memref<36x256xf32, #tpu.memory_space<vmem>>, vector<4x16xf32>,
    %122 = vector.extract_strided_slice %109 {offsets = [0, 4, 0], sizes = [4, 1, 16], strides = [1, 1, 1]} : vector<4x16x16xf32> to vector<4x1x16xf32>
    %123 = vector.shape_cast %122 : vector<4x1x16xf32> to vector<4x16xf32>
    %c8_63 = arith.constant 8 : index
    %c64_64 = arith.constant 64 : index
    %124 = vector.load %arg7[%c8_63, %c64_64] : memref<36x256xf32, #tpu.memory_space<vmem>>, vector<4x16xf32>
    tpu.vector_store %arg7[%c8_63, %c64_64], %123 {strides = array<i32>} : memref<36x256xf32, #tpu.memory_space<vmem>>, vector<4x16xf32>,
    %125 = vector.extract_strided_slice %109 {offsets = [0, 5, 0], sizes = [4, 1, 16], strides = [1, 1, 1]} : vector<4x16x16xf32> to vector<4x1x16xf32>
    %126 = vector.shape_cast %125 : vector<4x1x16xf32> to vector<4x16xf32>
    %c8_65 = arith.constant 8 : index
    %c80_66 = arith.constant 80 : index
    %127 = vector.load %arg7[%c8_65, %c80_66] : memref<36x256xf32, #tpu.memory_space<vmem>>, vector<4x16xf32>
    tpu.vector_store %arg7[%c8_65, %c80_66], %126 {strides = array<i32>} : memref<36x256xf32, #tpu.memory_space<vmem>>, vector<4x16xf32>,
    %128 = vector.extract_strided_slice %109 {offsets = [0, 6, 0], sizes = [4, 1, 16], strides = [1, 1, 1]} : vector<4x16x16xf32> to vector<4x1x16xf32>
    %129 = vector.shape_cast %128 : vector<4x1x16xf32> to vector<4x16xf32>
    %c8_67 = arith.constant 8 : index
    %c96_68 = arith.constant 96 : index
    %130 = vector.load %arg7[%c8_67, %c96_68] : memref<36x256xf32, #tpu.memory_space<vmem>>, vector<4x16xf32>
    tpu.vector_store %arg7[%c8_67, %c96_68], %129 {strides = array<i32>} : memref<36x256xf32, #tpu.memory_space<vmem>>, vector<4x16xf32>,
    %131 = vector.extract_strided_slice %109 {offsets = [0, 7, 0], sizes = [4, 1, 16], strides = [1, 1, 1]} : vector<4x16x16xf32> to vector<4x1x16xf32>
    %132 = vector.shape_cast %131 : vector<4x1x16xf32> to vector<4x16xf32>
    %c8_69 = arith.constant 8 : index
    %c112_70 = arith.constant 112 : index
    %133 = vector.load %arg7[%c8_69, %c112_70] : memref<36x256xf32, #tpu.memory_space<vmem>>, vector<4x16xf32>
    tpu.vector_store %arg7[%c8_69, %c112_70], %132 {strides = array<i32>} : memref<36x256xf32, #tpu.memory_space<vmem>>, vector<4x16xf32>,
    %134 = vector.extract_strided_slice %109 {offsets = [0, 8, 0], sizes = [4, 1, 16], strides = [1, 1, 1]} : vector<4x16x16xf32> to vector<4x1x16xf32>
    %135 = vector.shape_cast %134 : vector<4x1x16xf32> to vector<4x16xf32>
    %c8_71 = arith.constant 8 : index
    %c128_72 = arith.constant 128 : index
    %136 = vector.load %arg7[%c8_71, %c128_72] : memref<36x256xf32, #tpu.memory_space<vmem>>, vector<4x16xf32>
    tpu.vector_store %arg7[%c8_71, %c128_72], %135 {strides = array<i32>} : memref<36x256xf32, #tpu.memory_space<vmem>>, vector<4x16xf32>,
    %137 = vector.extract_strided_slice %109 {offsets = [0, 9, 0], sizes = [4, 1, 16], strides = [1, 1, 1]} : vector<4x16x16xf32> to vector<4x1x16xf32>
    %138 = vector.shape_cast %137 : vector<4x1x16xf32> to vector<4x16xf32>
    %c8_73 = arith.constant 8 : index
    %c144_74 = arith.constant 144 : index
    %139 = vector.load %arg7[%c8_73, %c144_74] : memref<36x256xf32, #tpu.memory_space<vmem>>, vector<4x16xf32>
    tpu.vector_store %arg7[%c8_73, %c144_74], %138 {strides = array<i32>} : memref<36x256xf32, #tpu.memory_space<vmem>>, vector<4x16xf32>,
    %140 = vector.extract_strided_slice %109 {offsets = [0, 10, 0], sizes = [4, 1, 16], strides = [1, 1, 1]} : vector<4x16x16xf32> to vector<4x1x16xf32>
    %141 = vector.shape_cast %140 : vector<4x1x16xf32> to vector<4x16xf32>
    %c8_75 = arith.constant 8 : index
    %c160_76 = arith.constant 160 : index
    %142 = vector.load %arg7[%c8_75, %c160_76] : memref<36x256xf32, #tpu.memory_space<vmem>>, vector<4x16xf32>
    tpu.vector_store %arg7[%c8_75, %c160_76], %141 {strides = array<i32>} : memref<36x256xf32, #tpu.memory_space<vmem>>, vector<4x16xf32>,
    %143 = vector.extract_strided_slice %109 {offsets = [0, 11, 0], sizes = [4, 1, 16], strides = [1, 1, 1]} : vector<4x16x16xf32> to vector<4x1x16xf32>
    %144 = vector.shape_cast %143 : vector<4x1x16xf32> to vector<4x16xf32>
    %c8_77 = arith.constant 8 : index
    %c176_78 = arith.constant 176 : index
    %145 = vector.load %arg7[%c8_77, %c176_78] : memref<36x256xf32, #tpu.memory_space<vmem>>, vector<4x16xf32>
    tpu.vector_store %arg7[%c8_77, %c176_78], %144 {strides = array<i32>} : memref<36x256xf32, #tpu.memory_space<vmem>>, vector<4x16xf32>,
    %146 = vector.extract_strided_slice %109 {offsets = [0, 12, 0], sizes = [4, 1, 16], strides = [1, 1, 1]} : vector<4x16x16xf32> to vector<4x1x16xf32>
    %147 = vector.shape_cast %146 : vector<4x1x16xf32> to vector<4x16xf32>
    %c8_79 = arith.constant 8 : index
    %c192_80 = arith.constant 192 : index
    %148 = vector.load %arg7[%c8_79, %c192_80] : memref<36x256xf32, #tpu.memory_space<vmem>>, vector<4x16xf32>
    tpu.vector_store %arg7[%c8_79, %c192_80], %147 {strides = array<i32>} : memref<36x256xf32, #tpu.memory_space<vmem>>, vector<4x16xf32>,
    %149 = vector.extract_strided_slice %109 {offsets = [0, 13, 0], sizes = [4, 1, 16], strides = [1, 1, 1]} : vector<4x16x16xf32> to vector<4x1x16xf32>
    %150 = vector.shape_cast %149 : vector<4x1x16xf32> to vector<4x16xf32>
    %c8_81 = arith.constant 8 : index
    %c208_82 = arith.constant 208 : index
    %151 = vector.load %arg7[%c8_81, %c208_82] : memref<36x256xf32, #tpu.memory_space<vmem>>, vector<4x16xf32>
    tpu.vector_store %arg7[%c8_81, %c208_82], %150 {strides = array<i32>} : memref<36x256xf32, #tpu.memory_space<vmem>>, vector<4x16xf32>,
    %152 = vector.extract_strided_slice %109 {offsets = [0, 14, 0], sizes = [4, 1, 16], strides = [1, 1, 1]} : vector<4x16x16xf32> to vector<4x1x16xf32>
    %153 = vector.shape_cast %152 : vector<4x1x16xf32> to vector<4x16xf32>
    %c8_83 = arith.constant 8 : index
    %c224_84 = arith.constant 224 : index
    %154 = vector.load %arg7[%c8_83, %c224_84] : memref<36x256xf32, #tpu.memory_space<vmem>>, vector<4x16xf32>
    tpu.vector_store %arg7[%c8_83, %c224_84], %153 {strides = array<i32>} : memref<36x256xf32, #tpu.memory_space<vmem>>, vector<4x16xf32>,
    %155 = vector.extract_strided_slice %109 {offsets = [0, 15, 0], sizes = [4, 1, 16], strides = [1, 1, 1]} : vector<4x16x16xf32> to vector<4x1x16xf32>
    %156 = vector.shape_cast %155 : vector<4x1x16xf32> to vector<4x16xf32>
    %c8_85 = arith.constant 8 : index
    %c240_86 = arith.constant 240 : index
    %157 = vector.load %arg7[%c8_85, %c240_86] : memref<36x256xf32, #tpu.memory_space<vmem>>, vector<4x16xf32>
    tpu.vector_store %arg7[%c8_85, %c240_86], %156 {strides = array<i32>} : memref<36x256xf32, #tpu.memory_space<vmem>>, vector<4x16xf32>,
    %c1_i32 = arith.constant 1 : i32
    %158 = arith.addi %1, %c1_i32 : i32
    %c0_87 = arith.constant 0 : index
    %c0_88 = arith.constant 0 : index
    %159 = arith.index_cast %158 : i32 to index
    %c0_89 = arith.constant 0 : index
    %160 = vector.load %arg3[%c0_87, %c0_88, %159, %c0_89] : memref<1x4x18x18xf32, #tpu.memory_space<vmem>>, vector<1x4x16x16xf32>
    %161 = vector.shape_cast %160 : vector<1x4x16x16xf32> to vector<4x16x16xf32>
    %162 = vector.extract_strided_slice %161 {offsets = [0, 0, 0], sizes = [4, 1, 16], strides = [1, 1, 1]} : vector<4x16x16xf32> to vector<4x1x16xf32>
    %163 = vector.shape_cast %162 : vector<4x1x16xf32> to vector<4x16xf32>
    %c12 = arith.constant 12 : index
    %c0_90 = arith.constant 0 : index
    %164 = vector.load %arg7[%c12, %c0_90] : memref<36x256xf32, #tpu.memory_space<vmem>>, vector<4x16xf32>
    tpu.vector_store %arg7[%c12, %c0_90], %163 {strides = array<i32>} : memref<36x256xf32, #tpu.memory_space<vmem>>, vector<4x16xf32>,
    %165 = vector.extract_strided_slice %161 {offsets = [0, 1, 0], sizes = [4, 1, 16], strides = [1, 1, 1]} : vector<4x16x16xf32> to vector<4x1x16xf32>
    %166 = vector.shape_cast %165 : vector<4x1x16xf32> to vector<4x16xf32>
    %c12_91 = arith.constant 12 : index
    %c16_92 = arith.constant 16 : index
    %167 = vector.load %arg7[%c12_91, %c16_92] : memref<36x256xf32, #tpu.memory_space<vmem>>, vector<4x16xf32>
    tpu.vector_store %arg7[%c12_91, %c16_92], %166 {strides = array<i32>} : memref<36x256xf32, #tpu.memory_space<vmem>>, vector<4x16xf32>,
    %168 = vector.extract_strided_slice %161 {offsets = [0, 2, 0], sizes = [4, 1, 16], strides = [1, 1, 1]} : vector<4x16x16xf32> to vector<4x1x16xf32>
    %169 = vector.shape_cast %168 : vector<4x1x16xf32> to vector<4x16xf32>
    %c12_93 = arith.constant 12 : index
    %c32_94 = arith.constant 32 : index
    %170 = vector.load %arg7[%c12_93, %c32_94] : memref<36x256xf32, #tpu.memory_space<vmem>>, vector<4x16xf32>
    tpu.vector_store %arg7[%c12_93, %c32_94], %169 {strides = array<i32>} : memref<36x256xf32, #tpu.memory_space<vmem>>, vector<4x16xf32>,
    %171 = vector.extract_strided_slice %161 {offsets = [0, 3, 0], sizes = [4, 1, 16], strides = [1, 1, 1]} : vector<4x16x16xf32> to vector<4x1x16xf32>
    %172 = vector.shape_cast %171 : vector<4x1x16xf32> to vector<4x16xf32>
    %c12_95 = arith.constant 12 : index
    %c48_96 = arith.constant 48 : index
    %173 = vector.load %arg7[%c12_95, %c48_96] : memref<36x256xf32, #tpu.memory_space<vmem>>, vector<4x16xf32>
    tpu.vector_store %arg7[%c12_95, %c48_96], %172 {strides = array<i32>} : memref<36x256xf32, #tpu.memory_space<vmem>>, vector<4x16xf32>,
    %174 = vector.extract_strided_slice %161 {offsets = [0, 4, 0], sizes = [4, 1, 16], strides = [1, 1, 1]} : vector<4x16x16xf32> to vector<4x1x16xf32>
    %175 = vector.shape_cast %174 : vector<4x1x16xf32> to vector<4x16xf32>
    %c12_97 = arith.constant 12 : index
    %c64_98 = arith.constant 64 : index
    %176 = vector.load %arg7[%c12_97, %c64_98] : memref<36x256xf32, #tpu.memory_space<vmem>>, vector<4x16xf32>
    tpu.vector_store %arg7[%c12_97, %c64_98], %175 {strides = array<i32>} : memref<36x256xf32, #tpu.memory_space<vmem>>, vector<4x16xf32>,
    %177 = vector.extract_strided_slice %161 {offsets = [0, 5, 0], sizes = [4, 1, 16], strides = [1, 1, 1]} : vector<4x16x16xf32> to vector<4x1x16xf32>
    %178 = vector.shape_cast %177 : vector<4x1x16xf32> to vector<4x16xf32>
    %c12_99 = arith.constant 12 : index
    %c80_100 = arith.constant 80 : index
    %179 = vector.load %arg7[%c12_99, %c80_100] : memref<36x256xf32, #tpu.memory_space<vmem>>, vector<4x16xf32>
    tpu.vector_store %arg7[%c12_99, %c80_100], %178 {strides = array<i32>} : memref<36x256xf32, #tpu.memory_space<vmem>>, vector<4x16xf32>,
    %180 = vector.extract_strided_slice %161 {offsets = [0, 6, 0], sizes = [4, 1, 16], strides = [1, 1, 1]} : vector<4x16x16xf32> to vector<4x1x16xf32>
    %181 = vector.shape_cast %180 : vector<4x1x16xf32> to vector<4x16xf32>
    %c12_101 = arith.constant 12 : index
    %c96_102 = arith.constant 96 : index
    %182 = vector.load %arg7[%c12_101, %c96_102] : memref<36x256xf32, #tpu.memory_space<vmem>>, vector<4x16xf32>
    tpu.vector_store %arg7[%c12_101, %c96_102], %181 {strides = array<i32>} : memref<36x256xf32, #tpu.memory_space<vmem>>, vector<4x16xf32>,
    %183 = vector.extract_strided_slice %161 {offsets = [0, 7, 0], sizes = [4, 1, 16], strides = [1, 1, 1]} : vector<4x16x16xf32> to vector<4x1x16xf32>
    %184 = vector.shape_cast %183 : vector<4x1x16xf32> to vector<4x16xf32>
    %c12_103 = arith.constant 12 : index
    %c112_104 = arith.constant 112 : index
    %185 = vector.load %arg7[%c12_103, %c112_104] : memref<36x256xf32, #tpu.memory_space<vmem>>, vector<4x16xf32>
    tpu.vector_store %arg7[%c12_103, %c112_104], %184 {strides = array<i32>} : memref<36x256xf32, #tpu.memory_space<vmem>>, vector<4x16xf32>,
    %186 = vector.extract_strided_slice %161 {offsets = [0, 8, 0], sizes = [4, 1, 16], strides = [1, 1, 1]} : vector<4x16x16xf32> to vector<4x1x16xf32>
    %187 = vector.shape_cast %186 : vector<4x1x16xf32> to vector<4x16xf32>
    %c12_105 = arith.constant 12 : index
    %c128_106 = arith.constant 128 : index
    %188 = vector.load %arg7[%c12_105, %c128_106] : memref<36x256xf32, #tpu.memory_space<vmem>>, vector<4x16xf32>
    tpu.vector_store %arg7[%c12_105, %c128_106], %187 {strides = array<i32>} : memref<36x256xf32, #tpu.memory_space<vmem>>, vector<4x16xf32>,
    %189 = vector.extract_strided_slice %161 {offsets = [0, 9, 0], sizes = [4, 1, 16], strides = [1, 1, 1]} : vector<4x16x16xf32> to vector<4x1x16xf32>
    %190 = vector.shape_cast %189 : vector<4x1x16xf32> to vector<4x16xf32>
    %c12_107 = arith.constant 12 : index
    %c144_108 = arith.constant 144 : index
    %191 = vector.load %arg7[%c12_107, %c144_108] : memref<36x256xf32, #tpu.memory_space<vmem>>, vector<4x16xf32>
    tpu.vector_store %arg7[%c12_107, %c144_108], %190 {strides = array<i32>} : memref<36x256xf32, #tpu.memory_space<vmem>>, vector<4x16xf32>,
    %192 = vector.extract_strided_slice %161 {offsets = [0, 10, 0], sizes = [4, 1, 16], strides = [1, 1, 1]} : vector<4x16x16xf32> to vector<4x1x16xf32>
    %193 = vector.shape_cast %192 : vector<4x1x16xf32> to vector<4x16xf32>
    %c12_109 = arith.constant 12 : index
    %c160_110 = arith.constant 160 : index
    %194 = vector.load %arg7[%c12_109, %c160_110] : memref<36x256xf32, #tpu.memory_space<vmem>>, vector<4x16xf32>
    tpu.vector_store %arg7[%c12_109, %c160_110], %193 {strides = array<i32>} : memref<36x256xf32, #tpu.memory_space<vmem>>, vector<4x16xf32>,
    %195 = vector.extract_strided_slice %161 {offsets = [0, 11, 0], sizes = [4, 1, 16], strides = [1, 1, 1]} : vector<4x16x16xf32> to vector<4x1x16xf32>
    %196 = vector.shape_cast %195 : vector<4x1x16xf32> to vector<4x16xf32>
    %c12_111 = arith.constant 12 : index
    %c176_112 = arith.constant 176 : index
    %197 = vector.load %arg7[%c12_111, %c176_112] : memref<36x256xf32, #tpu.memory_space<vmem>>, vector<4x16xf32>
    tpu.vector_store %arg7[%c12_111, %c176_112], %196 {strides = array<i32>} : memref<36x256xf32, #tpu.memory_space<vmem>>, vector<4x16xf32>,
    %198 = vector.extract_strided_slice %161 {offsets = [0, 12, 0], sizes = [4, 1, 16], strides = [1, 1, 1]} : vector<4x16x16xf32> to vector<4x1x16xf32>
    %199 = vector.shape_cast %198 : vector<4x1x16xf32> to vector<4x16xf32>
    %c12_113 = arith.constant 12 : index
    %c192_114 = arith.constant 192 : index
    %200 = vector.load %arg7[%c12_113, %c192_114] : memref<36x256xf32, #tpu.memory_space<vmem>>, vector<4x16xf32>
    tpu.vector_store %arg7[%c12_113, %c192_114], %199 {strides = array<i32>} : memref<36x256xf32, #tpu.memory_space<vmem>>, vector<4x16xf32>,
    %201 = vector.extract_strided_slice %161 {offsets = [0, 13, 0], sizes = [4, 1, 16], strides = [1, 1, 1]} : vector<4x16x16xf32> to vector<4x1x16xf32>
    %202 = vector.shape_cast %201 : vector<4x1x16xf32> to vector<4x16xf32>
    %c12_115 = arith.constant 12 : index
    %c208_116 = arith.constant 208 : index
    %203 = vector.load %arg7[%c12_115, %c208_116] : memref<36x256xf32, #tpu.memory_space<vmem>>, vector<4x16xf32>
    tpu.vector_store %arg7[%c12_115, %c208_116], %202 {strides = array<i32>} : memref<36x256xf32, #tpu.memory_space<vmem>>, vector<4x16xf32>,
    %204 = vector.extract_strided_slice %161 {offsets = [0, 14, 0], sizes = [4, 1, 16], strides = [1, 1, 1]} : vector<4x16x16xf32> to vector<4x1x16xf32>
    %205 = vector.shape_cast %204 : vector<4x1x16xf32> to vector<4x16xf32>
    %c12_117 = arith.constant 12 : index
    %c224_118 = arith.constant 224 : index
    %206 = vector.load %arg7[%c12_117, %c224_118] : memref<36x256xf32, #tpu.memory_space<vmem>>, vector<4x16xf32>
    tpu.vector_store %arg7[%c12_117, %c224_118], %205 {strides = array<i32>} : memref<36x256xf32, #tpu.memory_space<vmem>>, vector<4x16xf32>,
    %207 = vector.extract_strided_slice %161 {offsets = [0, 15, 0], sizes = [4, 1, 16], strides = [1, 1, 1]} : vector<4x16x16xf32> to vector<4x1x16xf32>
    %208 = vector.shape_cast %207 : vector<4x1x16xf32> to vector<4x16xf32>
    %c12_119 = arith.constant 12 : index
    %c240_120 = arith.constant 240 : index
    %209 = vector.load %arg7[%c12_119, %c240_120] : memref<36x256xf32, #tpu.memory_space<vmem>>, vector<4x16xf32>
    tpu.vector_store %arg7[%c12_119, %c240_120], %208 {strides = array<i32>} : memref<36x256xf32, #tpu.memory_space<vmem>>, vector<4x16xf32>,
    %c1_i32_121 = arith.constant 1 : i32
    %210 = arith.addi %1, %c1_i32_121 : i32
    %c0_122 = arith.constant 0 : index
    %c0_123 = arith.constant 0 : index
    %211 = arith.index_cast %210 : i32 to index
    %c1_124 = arith.constant 1 : index
    %212 = vector.load %arg3[%c0_122, %c0_123, %211, %c1_124] : memref<1x4x18x18xf32, #tpu.memory_space<vmem>>, vector<1x4x16x16xf32>
    %213 = vector.shape_cast %212 : vector<1x4x16x16xf32> to vector<4x16x16xf32>
    %214 = vector.extract_strided_slice %213 {offsets = [0, 0, 0], sizes = [4, 1, 16], strides = [1, 1, 1]} : vector<4x16x16xf32> to vector<4x1x16xf32>
    %215 = vector.shape_cast %214 : vector<4x1x16xf32> to vector<4x16xf32>
    %c16_125 = arith.constant 16 : index
    %c0_126 = arith.constant 0 : index
    %216 = vector.load %arg7[%c16_125, %c0_126] : memref<36x256xf32, #tpu.memory_space<vmem>>, vector<4x16xf32>
    tpu.vector_store %arg7[%c16_125, %c0_126], %215 {strides = array<i32>} : memref<36x256xf32, #tpu.memory_space<vmem>>, vector<4x16xf32>,
    %217 = vector.extract_strided_slice %213 {offsets = [0, 1, 0], sizes = [4, 1, 16], strides = [1, 1, 1]} : vector<4x16x16xf32> to vector<4x1x16xf32>
    %218 = vector.shape_cast %217 : vector<4x1x16xf32> to vector<4x16xf32>
    %c16_127 = arith.constant 16 : index
    %c16_128 = arith.constant 16 : index
    %219 = vector.load %arg7[%c16_127, %c16_128] : memref<36x256xf32, #tpu.memory_space<vmem>>, vector<4x16xf32>
    tpu.vector_store %arg7[%c16_127, %c16_128], %218 {strides = array<i32>} : memref<36x256xf32, #tpu.memory_space<vmem>>, vector<4x16xf32>,
    %220 = vector.extract_strided_slice %213 {offsets = [0, 2, 0], sizes = [4, 1, 16], strides = [1, 1, 1]} : vector<4x16x16xf32> to vector<4x1x16xf32>
    %221 = vector.shape_cast %220 : vector<4x1x16xf32> to vector<4x16xf32>
    %c16_129 = arith.constant 16 : index
    %c32_130 = arith.constant 32 : index
    %222 = vector.load %arg7[%c16_129, %c32_130] : memref<36x256xf32, #tpu.memory_space<vmem>>, vector<4x16xf32>
    tpu.vector_store %arg7[%c16_129, %c32_130], %221 {strides = array<i32>} : memref<36x256xf32, #tpu.memory_space<vmem>>, vector<4x16xf32>,
    %223 = vector.extract_strided_slice %213 {offsets = [0, 3, 0], sizes = [4, 1, 16], strides = [1, 1, 1]} : vector<4x16x16xf32> to vector<4x1x16xf32>
    %224 = vector.shape_cast %223 : vector<4x1x16xf32> to vector<4x16xf32>
    %c16_131 = arith.constant 16 : index
    %c48_132 = arith.constant 48 : index
    %225 = vector.load %arg7[%c16_131, %c48_132] : memref<36x256xf32, #tpu.memory_space<vmem>>, vector<4x16xf32>
    tpu.vector_store %arg7[%c16_131, %c48_132], %224 {strides = array<i32>} : memref<36x256xf32, #tpu.memory_space<vmem>>, vector<4x16xf32>,
    %226 = vector.extract_strided_slice %213 {offsets = [0, 4, 0], sizes = [4, 1, 16], strides = [1, 1, 1]} : vector<4x16x16xf32> to vector<4x1x16xf32>
    %227 = vector.shape_cast %226 : vector<4x1x16xf32> to vector<4x16xf32>
    %c16_133 = arith.constant 16 : index
    %c64_134 = arith.constant 64 : index
    %228 = vector.load %arg7[%c16_133, %c64_134] : memref<36x256xf32, #tpu.memory_space<vmem>>, vector<4x16xf32>
    tpu.vector_store %arg7[%c16_133, %c64_134], %227 {strides = array<i32>} : memref<36x256xf32, #tpu.memory_space<vmem>>, vector<4x16xf32>,
    %229 = vector.extract_strided_slice %213 {offsets = [0, 5, 0], sizes = [4, 1, 16], strides = [1, 1, 1]} : vector<4x16x16xf32> to vector<4x1x16xf32>
    %230 = vector.shape_cast %229 : vector<4x1x16xf32> to vector<4x16xf32>
    %c16_135 = arith.constant 16 : index
    %c80_136 = arith.constant 80 : index
    %231 = vector.load %arg7[%c16_135, %c80_136] : memref<36x256xf32, #tpu.memory_space<vmem>>, vector<4x16xf32>
    tpu.vector_store %arg7[%c16_135, %c80_136], %230 {strides = array<i32>} : memref<36x256xf32, #tpu.memory_space<vmem>>, vector<4x16xf32>,
    %232 = vector.extract_strided_slice %213 {offsets = [0, 6, 0], sizes = [4, 1, 16], strides = [1, 1, 1]} : vector<4x16x16xf32> to vector<4x1x16xf32>
    %233 = vector.shape_cast %232 : vector<4x1x16xf32> to vector<4x16xf32>
    %c16_137 = arith.constant 16 : index
    %c96_138 = arith.constant 96 : index
    %234 = vector.load %arg7[%c16_137, %c96_138] : memref<36x256xf32, #tpu.memory_space<vmem>>, vector<4x16xf32>
    tpu.vector_store %arg7[%c16_137, %c96_138], %233 {strides = array<i32>} : memref<36x256xf32, #tpu.memory_space<vmem>>, vector<4x16xf32>,
    %235 = vector.extract_strided_slice %213 {offsets = [0, 7, 0], sizes = [4, 1, 16], strides = [1, 1, 1]} : vector<4x16x16xf32> to vector<4x1x16xf32>
    %236 = vector.shape_cast %235 : vector<4x1x16xf32> to vector<4x16xf32>
    %c16_139 = arith.constant 16 : index
    %c112_140 = arith.constant 112 : index
    %237 = vector.load %arg7[%c16_139, %c112_140] : memref<36x256xf32, #tpu.memory_space<vmem>>, vector<4x16xf32>
    tpu.vector_store %arg7[%c16_139, %c112_140], %236 {strides = array<i32>} : memref<36x256xf32, #tpu.memory_space<vmem>>, vector<4x16xf32>,
    %238 = vector.extract_strided_slice %213 {offsets = [0, 8, 0], sizes = [4, 1, 16], strides = [1, 1, 1]} : vector<4x16x16xf32> to vector<4x1x16xf32>
    %239 = vector.shape_cast %238 : vector<4x1x16xf32> to vector<4x16xf32>
    %c16_141 = arith.constant 16 : index
    %c128_142 = arith.constant 128 : index
    %240 = vector.load %arg7[%c16_141, %c128_142] : memref<36x256xf32, #tpu.memory_space<vmem>>, vector<4x16xf32>
    tpu.vector_store %arg7[%c16_141, %c128_142], %239 {strides = array<i32>} : memref<36x256xf32, #tpu.memory_space<vmem>>, vector<4x16xf32>,
    %241 = vector.extract_strided_slice %213 {offsets = [0, 9, 0], sizes = [4, 1, 16], strides = [1, 1, 1]} : vector<4x16x16xf32> to vector<4x1x16xf32>
    %242 = vector.shape_cast %241 : vector<4x1x16xf32> to vector<4x16xf32>
    %c16_143 = arith.constant 16 : index
    %c144_144 = arith.constant 144 : index
    %243 = vector.load %arg7[%c16_143, %c144_144] : memref<36x256xf32, #tpu.memory_space<vmem>>, vector<4x16xf32>
    tpu.vector_store %arg7[%c16_143, %c144_144], %242 {strides = array<i32>} : memref<36x256xf32, #tpu.memory_space<vmem>>, vector<4x16xf32>,
    %244 = vector.extract_strided_slice %213 {offsets = [0, 10, 0], sizes = [4, 1, 16], strides = [1, 1, 1]} : vector<4x16x16xf32> to vector<4x1x16xf32>
    %245 = vector.shape_cast %244 : vector<4x1x16xf32> to vector<4x16xf32>
    %c16_145 = arith.constant 16 : index
    %c160_146 = arith.constant 160 : index
    %246 = vector.load %arg7[%c16_145, %c160_146] : memref<36x256xf32, #tpu.memory_space<vmem>>, vector<4x16xf32>
    tpu.vector_store %arg7[%c16_145, %c160_146], %245 {strides = array<i32>} : memref<36x256xf32, #tpu.memory_space<vmem>>, vector<4x16xf32>,
    %247 = vector.extract_strided_slice %213 {offsets = [0, 11, 0], sizes = [4, 1, 16], strides = [1, 1, 1]} : vector<4x16x16xf32> to vector<4x1x16xf32>
    %248 = vector.shape_cast %247 : vector<4x1x16xf32> to vector<4x16xf32>
    %c16_147 = arith.constant 16 : index
    %c176_148 = arith.constant 176 : index
    %249 = vector.load %arg7[%c16_147, %c176_148] : memref<36x256xf32, #tpu.memory_space<vmem>>, vector<4x16xf32>
    tpu.vector_store %arg7[%c16_147, %c176_148], %248 {strides = array<i32>} : memref<36x256xf32, #tpu.memory_space<vmem>>, vector<4x16xf32>,
    %250 = vector.extract_strided_slice %213 {offsets = [0, 12, 0], sizes = [4, 1, 16], strides = [1, 1, 1]} : vector<4x16x16xf32> to vector<4x1x16xf32>
    %251 = vector.shape_cast %250 : vector<4x1x16xf32> to vector<4x16xf32>
    %c16_149 = arith.constant 16 : index
    %c192_150 = arith.constant 192 : index
    %252 = vector.load %arg7[%c16_149, %c192_150] : memref<36x256xf32, #tpu.memory_space<vmem>>, vector<4x16xf32>
    tpu.vector_store %arg7[%c16_149, %c192_150], %251 {strides = array<i32>} : memref<36x256xf32, #tpu.memory_space<vmem>>, vector<4x16xf32>,
    %253 = vector.extract_strided_slice %213 {offsets = [0, 13, 0], sizes = [4, 1, 16], strides = [1, 1, 1]} : vector<4x16x16xf32> to vector<4x1x16xf32>
    %254 = vector.shape_cast %253 : vector<4x1x16xf32> to vector<4x16xf32>
    %c16_151 = arith.constant 16 : index
    %c208_152 = arith.constant 208 : index
    %255 = vector.load %arg7[%c16_151, %c208_152] : memref<36x256xf32, #tpu.memory_space<vmem>>, vector<4x16xf32>
    tpu.vector_store %arg7[%c16_151, %c208_152], %254 {strides = array<i32>} : memref<36x256xf32, #tpu.memory_space<vmem>>, vector<4x16xf32>,
    %256 = vector.extract_strided_slice %213 {offsets = [0, 14, 0], sizes = [4, 1, 16], strides = [1, 1, 1]} : vector<4x16x16xf32> to vector<4x1x16xf32>
    %257 = vector.shape_cast %256 : vector<4x1x16xf32> to vector<4x16xf32>
    %c16_153 = arith.constant 16 : index
    %c224_154 = arith.constant 224 : index
    %258 = vector.load %arg7[%c16_153, %c224_154] : memref<36x256xf32, #tpu.memory_space<vmem>>, vector<4x16xf32>
    tpu.vector_store %arg7[%c16_153, %c224_154], %257 {strides = array<i32>} : memref<36x256xf32, #tpu.memory_space<vmem>>, vector<4x16xf32>,
    %259 = vector.extract_strided_slice %213 {offsets = [0, 15, 0], sizes = [4, 1, 16], strides = [1, 1, 1]} : vector<4x16x16xf32> to vector<4x1x16xf32>
    %260 = vector.shape_cast %259 : vector<4x1x16xf32> to vector<4x16xf32>
    %c16_155 = arith.constant 16 : index
    %c240_156 = arith.constant 240 : index
    %261 = vector.load %arg7[%c16_155, %c240_156] : memref<36x256xf32, #tpu.memory_space<vmem>>, vector<4x16xf32>
    tpu.vector_store %arg7[%c16_155, %c240_156], %260 {strides = array<i32>} : memref<36x256xf32, #tpu.memory_space<vmem>>, vector<4x16xf32>,
    %c1_i32_157 = arith.constant 1 : i32
    %262 = arith.addi %1, %c1_i32_157 : i32
    %c0_158 = arith.constant 0 : index
    %c0_159 = arith.constant 0 : index
    %263 = arith.index_cast %262 : i32 to index
    %c2_160 = arith.constant 2 : index
    %264 = vector.load %arg3[%c0_158, %c0_159, %263, %c2_160] : memref<1x4x18x18xf32, #tpu.memory_space<vmem>>, vector<1x4x16x16xf32>
    %265 = vector.shape_cast %264 : vector<1x4x16x16xf32> to vector<4x16x16xf32>
    %266 = vector.extract_strided_slice %265 {offsets = [0, 0, 0], sizes = [4, 1, 16], strides = [1, 1, 1]} : vector<4x16x16xf32> to vector<4x1x16xf32>
    %267 = vector.shape_cast %266 : vector<4x1x16xf32> to vector<4x16xf32>
    %c20 = arith.constant 20 : index
    %c0_161 = arith.constant 0 : index
    %268 = vector.load %arg7[%c20, %c0_161] : memref<36x256xf32, #tpu.memory_space<vmem>>, vector<4x16xf32>
    tpu.vector_store %arg7[%c20, %c0_161], %267 {strides = array<i32>} : memref<36x256xf32, #tpu.memory_space<vmem>>, vector<4x16xf32>,
    %269 = vector.extract_strided_slice %265 {offsets = [0, 1, 0], sizes = [4, 1, 16], strides = [1, 1, 1]} : vector<4x16x16xf32> to vector<4x1x16xf32>
    %270 = vector.shape_cast %269 : vector<4x1x16xf32> to vector<4x16xf32>
    %c20_162 = arith.constant 20 : index
    %c16_163 = arith.constant 16 : index
    %271 = vector.load %arg7[%c20_162, %c16_163] : memref<36x256xf32, #tpu.memory_space<vmem>>, vector<4x16xf32>
    tpu.vector_store %arg7[%c20_162, %c16_163], %270 {strides = array<i32>} : memref<36x256xf32, #tpu.memory_space<vmem>>, vector<4x16xf32>,
    %272 = vector.extract_strided_slice %265 {offsets = [0, 2, 0], sizes = [4, 1, 16], strides = [1, 1, 1]} : vector<4x16x16xf32> to vector<4x1x16xf32>
    %273 = vector.shape_cast %272 : vector<4x1x16xf32> to vector<4x16xf32>
    %c20_164 = arith.constant 20 : index
    %c32_165 = arith.constant 32 : index
    %274 = vector.load %arg7[%c20_164, %c32_165] : memref<36x256xf32, #tpu.memory_space<vmem>>, vector<4x16xf32>
    tpu.vector_store %arg7[%c20_164, %c32_165], %273 {strides = array<i32>} : memref<36x256xf32, #tpu.memory_space<vmem>>, vector<4x16xf32>,
    %275 = vector.extract_strided_slice %265 {offsets = [0, 3, 0], sizes = [4, 1, 16], strides = [1, 1, 1]} : vector<4x16x16xf32> to vector<4x1x16xf32>
    %276 = vector.shape_cast %275 : vector<4x1x16xf32> to vector<4x16xf32>
    %c20_166 = arith.constant 20 : index
    %c48_167 = arith.constant 48 : index
    %277 = vector.load %arg7[%c20_166, %c48_167] : memref<36x256xf32, #tpu.memory_space<vmem>>, vector<4x16xf32>
    tpu.vector_store %arg7[%c20_166, %c48_167], %276 {strides = array<i32>} : memref<36x256xf32, #tpu.memory_space<vmem>>, vector<4x16xf32>,
    %278 = vector.extract_strided_slice %265 {offsets = [0, 4, 0], sizes = [4, 1, 16], strides = [1, 1, 1]} : vector<4x16x16xf32> to vector<4x1x16xf32>
    %279 = vector.shape_cast %278 : vector<4x1x16xf32> to vector<4x16xf32>
    %c20_168 = arith.constant 20 : index
    %c64_169 = arith.constant 64 : index
    %280 = vector.load %arg7[%c20_168, %c64_169] : memref<36x256xf32, #tpu.memory_space<vmem>>, vector<4x16xf32>
    tpu.vector_store %arg7[%c20_168, %c64_169], %279 {strides = array<i32>} : memref<36x256xf32, #tpu.memory_space<vmem>>, vector<4x16xf32>,
    %281 = vector.extract_strided_slice %265 {offsets = [0, 5, 0], sizes = [4, 1, 16], strides = [1, 1, 1]} : vector<4x16x16xf32> to vector<4x1x16xf32>
    %282 = vector.shape_cast %281 : vector<4x1x16xf32> to vector<4x16xf32>
    %c20_170 = arith.constant 20 : index
    %c80_171 = arith.constant 80 : index
    %283 = vector.load %arg7[%c20_170, %c80_171] : memref<36x256xf32, #tpu.memory_space<vmem>>, vector<4x16xf32>
    tpu.vector_store %arg7[%c20_170, %c80_171], %282 {strides = array<i32>} : memref<36x256xf32, #tpu.memory_space<vmem>>, vector<4x16xf32>,
    %284 = vector.extract_strided_slice %265 {offsets = [0, 6, 0], sizes = [4, 1, 16], strides = [1, 1, 1]} : vector<4x16x16xf32> to vector<4x1x16xf32>
    %285 = vector.shape_cast %284 : vector<4x1x16xf32> to vector<4x16xf32>
    %c20_172 = arith.constant 20 : index
    %c96_173 = arith.constant 96 : index
    %286 = vector.load %arg7[%c20_172, %c96_173] : memref<36x256xf32, #tpu.memory_space<vmem>>, vector<4x16xf32>
    tpu.vector_store %arg7[%c20_172, %c96_173], %285 {strides = array<i32>} : memref<36x256xf32, #tpu.memory_space<vmem>>, vector<4x16xf32>,
    %287 = vector.extract_strided_slice %265 {offsets = [0, 7, 0], sizes = [4, 1, 16], strides = [1, 1, 1]} : vector<4x16x16xf32> to vector<4x1x16xf32>
    %288 = vector.shape_cast %287 : vector<4x1x16xf32> to vector<4x16xf32>
    %c20_174 = arith.constant 20 : index
    %c112_175 = arith.constant 112 : index
    %289 = vector.load %arg7[%c20_174, %c112_175] : memref<36x256xf32, #tpu.memory_space<vmem>>, vector<4x16xf32>
    tpu.vector_store %arg7[%c20_174, %c112_175], %288 {strides = array<i32>} : memref<36x256xf32, #tpu.memory_space<vmem>>, vector<4x16xf32>,
    %290 = vector.extract_strided_slice %265 {offsets = [0, 8, 0], sizes = [4, 1, 16], strides = [1, 1, 1]} : vector<4x16x16xf32> to vector<4x1x16xf32>
    %291 = vector.shape_cast %290 : vector<4x1x16xf32> to vector<4x16xf32>
    %c20_176 = arith.constant 20 : index
    %c128_177 = arith.constant 128 : index
    %292 = vector.load %arg7[%c20_176, %c128_177] : memref<36x256xf32, #tpu.memory_space<vmem>>, vector<4x16xf32>
    tpu.vector_store %arg7[%c20_176, %c128_177], %291 {strides = array<i32>} : memref<36x256xf32, #tpu.memory_space<vmem>>, vector<4x16xf32>,
    %293 = vector.extract_strided_slice %265 {offsets = [0, 9, 0], sizes = [4, 1, 16], strides = [1, 1, 1]} : vector<4x16x16xf32> to vector<4x1x16xf32>
    %294 = vector.shape_cast %293 : vector<4x1x16xf32> to vector<4x16xf32>
    %c20_178 = arith.constant 20 : index
    %c144_179 = arith.constant 144 : index
    %295 = vector.load %arg7[%c20_178, %c144_179] : memref<36x256xf32, #tpu.memory_space<vmem>>, vector<4x16xf32>
    tpu.vector_store %arg7[%c20_178, %c144_179], %294 {strides = array<i32>} : memref<36x256xf32, #tpu.memory_space<vmem>>, vector<4x16xf32>,
    %296 = vector.extract_strided_slice %265 {offsets = [0, 10, 0], sizes = [4, 1, 16], strides = [1, 1, 1]} : vector<4x16x16xf32> to vector<4x1x16xf32>
    %297 = vector.shape_cast %296 : vector<4x1x16xf32> to vector<4x16xf32>
    %c20_180 = arith.constant 20 : index
    %c160_181 = arith.constant 160 : index
    %298 = vector.load %arg7[%c20_180, %c160_181] : memref<36x256xf32, #tpu.memory_space<vmem>>, vector<4x16xf32>
    tpu.vector_store %arg7[%c20_180, %c160_181], %297 {strides = array<i32>} : memref<36x256xf32, #tpu.memory_space<vmem>>, vector<4x16xf32>,
    %299 = vector.extract_strided_slice %265 {offsets = [0, 11, 0], sizes = [4, 1, 16], strides = [1, 1, 1]} : vector<4x16x16xf32> to vector<4x1x16xf32>
    %300 = vector.shape_cast %299 : vector<4x1x16xf32> to vector<4x16xf32>
    %c20_182 = arith.constant 20 : index
    %c176_183 = arith.constant 176 : index
    %301 = vector.load %arg7[%c20_182, %c176_183] : memref<36x256xf32, #tpu.memory_space<vmem>>, vector<4x16xf32>
    tpu.vector_store %arg7[%c20_182, %c176_183], %300 {strides = array<i32>} : memref<36x256xf32, #tpu.memory_space<vmem>>, vector<4x16xf32>,
    %302 = vector.extract_strided_slice %265 {offsets = [0, 12, 0], sizes = [4, 1, 16], strides = [1, 1, 1]} : vector<4x16x16xf32> to vector<4x1x16xf32>
    %303 = vector.shape_cast %302 : vector<4x1x16xf32> to vector<4x16xf32>
    %c20_184 = arith.constant 20 : index
    %c192_185 = arith.constant 192 : index
    %304 = vector.load %arg7[%c20_184, %c192_185] : memref<36x256xf32, #tpu.memory_space<vmem>>, vector<4x16xf32>
    tpu.vector_store %arg7[%c20_184, %c192_185], %303 {strides = array<i32>} : memref<36x256xf32, #tpu.memory_space<vmem>>, vector<4x16xf32>,
    %305 = vector.extract_strided_slice %265 {offsets = [0, 13, 0], sizes = [4, 1, 16], strides = [1, 1, 1]} : vector<4x16x16xf32> to vector<4x1x16xf32>
    %306 = vector.shape_cast %305 : vector<4x1x16xf32> to vector<4x16xf32>
    %c20_186 = arith.constant 20 : index
    %c208_187 = arith.constant 208 : index
    %307 = vector.load %arg7[%c20_186, %c208_187] : memref<36x256xf32, #tpu.memory_space<vmem>>, vector<4x16xf32>
    tpu.vector_store %arg7[%c20_186, %c208_187], %306 {strides = array<i32>} : memref<36x256xf32, #tpu.memory_space<vmem>>, vector<4x16xf32>,
    %308 = vector.extract_strided_slice %265 {offsets = [0, 14, 0], sizes = [4, 1, 16], strides = [1, 1, 1]} : vector<4x16x16xf32> to vector<4x1x16xf32>
    %309 = vector.shape_cast %308 : vector<4x1x16xf32> to vector<4x16xf32>
    %c20_188 = arith.constant 20 : index
    %c224_189 = arith.constant 224 : index
    %310 = vector.load %arg7[%c20_188, %c224_189] : memref<36x256xf32, #tpu.memory_space<vmem>>, vector<4x16xf32>
    tpu.vector_store %arg7[%c20_188, %c224_189], %309 {strides = array<i32>} : memref<36x256xf32, #tpu.memory_space<vmem>>, vector<4x16xf32>,
    %311 = vector.extract_strided_slice %265 {offsets = [0, 15, 0], sizes = [4, 1, 16], strides = [1, 1, 1]} : vector<4x16x16xf32> to vector<4x1x16xf32>
    %312 = vector.shape_cast %311 : vector<4x1x16xf32> to vector<4x16xf32>
    %c20_190 = arith.constant 20 : index
    %c240_191 = arith.constant 240 : index
    %313 = vector.load %arg7[%c20_190, %c240_191] : memref<36x256xf32, #tpu.memory_space<vmem>>, vector<4x16xf32>
    tpu.vector_store %arg7[%c20_190, %c240_191], %312 {strides = array<i32>} : memref<36x256xf32, #tpu.memory_space<vmem>>, vector<4x16xf32>,
    %c2_i32 = arith.constant 2 : i32
    %314 = arith.addi %1, %c2_i32 : i32
    %c0_192 = arith.constant 0 : index
    %c0_193 = arith.constant 0 : index
    %315 = arith.index_cast %314 : i32 to index
    %c0_194 = arith.constant 0 : index
    %316 = vector.load %arg3[%c0_192, %c0_193, %315, %c0_194] : memref<1x4x18x18xf32, #tpu.memory_space<vmem>>, vector<1x4x16x16xf32>
    %317 = vector.shape_cast %316 : vector<1x4x16x16xf32> to vector<4x16x16xf32>
    %318 = vector.extract_strided_slice %317 {offsets = [0, 0, 0], sizes = [4, 1, 16], strides = [1, 1, 1]} : vector<4x16x16xf32> to vector<4x1x16xf32>
    %319 = vector.shape_cast %318 : vector<4x1x16xf32> to vector<4x16xf32>
    %c24 = arith.constant 24 : index
    %c0_195 = arith.constant 0 : index
    %320 = vector.load %arg7[%c24, %c0_195] : memref<36x256xf32, #tpu.memory_space<vmem>>, vector<4x16xf32>
    tpu.vector_store %arg7[%c24, %c0_195], %319 {strides = array<i32>} : memref<36x256xf32, #tpu.memory_space<vmem>>, vector<4x16xf32>,
    %321 = vector.extract_strided_slice %317 {offsets = [0, 1, 0], sizes = [4, 1, 16], strides = [1, 1, 1]} : vector<4x16x16xf32> to vector<4x1x16xf32>
    %322 = vector.shape_cast %321 : vector<4x1x16xf32> to vector<4x16xf32>
    %c24_196 = arith.constant 24 : index
    %c16_197 = arith.constant 16 : index
    %323 = vector.load %arg7[%c24_196, %c16_197] : memref<36x256xf32, #tpu.memory_space<vmem>>, vector<4x16xf32>
    tpu.vector_store %arg7[%c24_196, %c16_197], %322 {strides = array<i32>} : memref<36x256xf32, #tpu.memory_space<vmem>>, vector<4x16xf32>,
    %324 = vector.extract_strided_slice %317 {offsets = [0, 2, 0], sizes = [4, 1, 16], strides = [1, 1, 1]} : vector<4x16x16xf32> to vector<4x1x16xf32>
    %325 = vector.shape_cast %324 : vector<4x1x16xf32> to vector<4x16xf32>
    %c24_198 = arith.constant 24 : index
    %c32_199 = arith.constant 32 : index
    %326 = vector.load %arg7[%c24_198, %c32_199] : memref<36x256xf32, #tpu.memory_space<vmem>>, vector<4x16xf32>
    tpu.vector_store %arg7[%c24_198, %c32_199], %325 {strides = array<i32>} : memref<36x256xf32, #tpu.memory_space<vmem>>, vector<4x16xf32>,
    %327 = vector.extract_strided_slice %317 {offsets = [0, 3, 0], sizes = [4, 1, 16], strides = [1, 1, 1]} : vector<4x16x16xf32> to vector<4x1x16xf32>
    %328 = vector.shape_cast %327 : vector<4x1x16xf32> to vector<4x16xf32>
    %c24_200 = arith.constant 24 : index
    %c48_201 = arith.constant 48 : index
    %329 = vector.load %arg7[%c24_200, %c48_201] : memref<36x256xf32, #tpu.memory_space<vmem>>, vector<4x16xf32>
    tpu.vector_store %arg7[%c24_200, %c48_201], %328 {strides = array<i32>} : memref<36x256xf32, #tpu.memory_space<vmem>>, vector<4x16xf32>,
    %330 = vector.extract_strided_slice %317 {offsets = [0, 4, 0], sizes = [4, 1, 16], strides = [1, 1, 1]} : vector<4x16x16xf32> to vector<4x1x16xf32>
    %331 = vector.shape_cast %330 : vector<4x1x16xf32> to vector<4x16xf32>
    %c24_202 = arith.constant 24 : index
    %c64_203 = arith.constant 64 : index
    %332 = vector.load %arg7[%c24_202, %c64_203] : memref<36x256xf32, #tpu.memory_space<vmem>>, vector<4x16xf32>
    tpu.vector_store %arg7[%c24_202, %c64_203], %331 {strides = array<i32>} : memref<36x256xf32, #tpu.memory_space<vmem>>, vector<4x16xf32>,
    %333 = vector.extract_strided_slice %317 {offsets = [0, 5, 0], sizes = [4, 1, 16], strides = [1, 1, 1]} : vector<4x16x16xf32> to vector<4x1x16xf32>
    %334 = vector.shape_cast %333 : vector<4x1x16xf32> to vector<4x16xf32>
    %c24_204 = arith.constant 24 : index
    %c80_205 = arith.constant 80 : index
    %335 = vector.load %arg7[%c24_204, %c80_205] : memref<36x256xf32, #tpu.memory_space<vmem>>, vector<4x16xf32>
    tpu.vector_store %arg7[%c24_204, %c80_205], %334 {strides = array<i32>} : memref<36x256xf32, #tpu.memory_space<vmem>>, vector<4x16xf32>,
    %336 = vector.extract_strided_slice %317 {offsets = [0, 6, 0], sizes = [4, 1, 16], strides = [1, 1, 1]} : vector<4x16x16xf32> to vector<4x1x16xf32>
    %337 = vector.shape_cast %336 : vector<4x1x16xf32> to vector<4x16xf32>
    %c24_206 = arith.constant 24 : index
    %c96_207 = arith.constant 96 : index
    %338 = vector.load %arg7[%c24_206, %c96_207] : memref<36x256xf32, #tpu.memory_space<vmem>>, vector<4x16xf32>
    tpu.vector_store %arg7[%c24_206, %c96_207], %337 {strides = array<i32>} : memref<36x256xf32, #tpu.memory_space<vmem>>, vector<4x16xf32>,
    %339 = vector.extract_strided_slice %317 {offsets = [0, 7, 0], sizes = [4, 1, 16], strides = [1, 1, 1]} : vector<4x16x16xf32> to vector<4x1x16xf32>
    %340 = vector.shape_cast %339 : vector<4x1x16xf32> to vector<4x16xf32>
    %c24_208 = arith.constant 24 : index
    %c112_209 = arith.constant 112 : index
    %341 = vector.load %arg7[%c24_208, %c112_209] : memref<36x256xf32, #tpu.memory_space<vmem>>, vector<4x16xf32>
    tpu.vector_store %arg7[%c24_208, %c112_209], %340 {strides = array<i32>} : memref<36x256xf32, #tpu.memory_space<vmem>>, vector<4x16xf32>,
    %342 = vector.extract_strided_slice %317 {offsets = [0, 8, 0], sizes = [4, 1, 16], strides = [1, 1, 1]} : vector<4x16x16xf32> to vector<4x1x16xf32>
    %343 = vector.shape_cast %342 : vector<4x1x16xf32> to vector<4x16xf32>
    %c24_210 = arith.constant 24 : index
    %c128_211 = arith.constant 128 : index
    %344 = vector.load %arg7[%c24_210, %c128_211] : memref<36x256xf32, #tpu.memory_space<vmem>>, vector<4x16xf32>
    tpu.vector_store %arg7[%c24_210, %c128_211], %343 {strides = array<i32>} : memref<36x256xf32, #tpu.memory_space<vmem>>, vector<4x16xf32>,
    %345 = vector.extract_strided_slice %317 {offsets = [0, 9, 0], sizes = [4, 1, 16], strides = [1, 1, 1]} : vector<4x16x16xf32> to vector<4x1x16xf32>
    %346 = vector.shape_cast %345 : vector<4x1x16xf32> to vector<4x16xf32>
    %c24_212 = arith.constant 24 : index
    %c144_213 = arith.constant 144 : index
    %347 = vector.load %arg7[%c24_212, %c144_213] : memref<36x256xf32, #tpu.memory_space<vmem>>, vector<4x16xf32>
    tpu.vector_store %arg7[%c24_212, %c144_213], %346 {strides = array<i32>} : memref<36x256xf32, #tpu.memory_space<vmem>>, vector<4x16xf32>,
    %348 = vector.extract_strided_slice %317 {offsets = [0, 10, 0], sizes = [4, 1, 16], strides = [1, 1, 1]} : vector<4x16x16xf32> to vector<4x1x16xf32>
    %349 = vector.shape_cast %348 : vector<4x1x16xf32> to vector<4x16xf32>
    %c24_214 = arith.constant 24 : index
    %c160_215 = arith.constant 160 : index
    %350 = vector.load %arg7[%c24_214, %c160_215] : memref<36x256xf32, #tpu.memory_space<vmem>>, vector<4x16xf32>
    tpu.vector_store %arg7[%c24_214, %c160_215], %349 {strides = array<i32>} : memref<36x256xf32, #tpu.memory_space<vmem>>, vector<4x16xf32>,
    %351 = vector.extract_strided_slice %317 {offsets = [0, 11, 0], sizes = [4, 1, 16], strides = [1, 1, 1]} : vector<4x16x16xf32> to vector<4x1x16xf32>
    %352 = vector.shape_cast %351 : vector<4x1x16xf32> to vector<4x16xf32>
    %c24_216 = arith.constant 24 : index
    %c176_217 = arith.constant 176 : index
    %353 = vector.load %arg7[%c24_216, %c176_217] : memref<36x256xf32, #tpu.memory_space<vmem>>, vector<4x16xf32>
    tpu.vector_store %arg7[%c24_216, %c176_217], %352 {strides = array<i32>} : memref<36x256xf32, #tpu.memory_space<vmem>>, vector<4x16xf32>,
    %354 = vector.extract_strided_slice %317 {offsets = [0, 12, 0], sizes = [4, 1, 16], strides = [1, 1, 1]} : vector<4x16x16xf32> to vector<4x1x16xf32>
    %355 = vector.shape_cast %354 : vector<4x1x16xf32> to vector<4x16xf32>
    %c24_218 = arith.constant 24 : index
    %c192_219 = arith.constant 192 : index
    %356 = vector.load %arg7[%c24_218, %c192_219] : memref<36x256xf32, #tpu.memory_space<vmem>>, vector<4x16xf32>
    tpu.vector_store %arg7[%c24_218, %c192_219], %355 {strides = array<i32>} : memref<36x256xf32, #tpu.memory_space<vmem>>, vector<4x16xf32>,
    %357 = vector.extract_strided_slice %317 {offsets = [0, 13, 0], sizes = [4, 1, 16], strides = [1, 1, 1]} : vector<4x16x16xf32> to vector<4x1x16xf32>
    %358 = vector.shape_cast %357 : vector<4x1x16xf32> to vector<4x16xf32>
    %c24_220 = arith.constant 24 : index
    %c208_221 = arith.constant 208 : index
    %359 = vector.load %arg7[%c24_220, %c208_221] : memref<36x256xf32, #tpu.memory_space<vmem>>, vector<4x16xf32>
    tpu.vector_store %arg7[%c24_220, %c208_221], %358 {strides = array<i32>} : memref<36x256xf32, #tpu.memory_space<vmem>>, vector<4x16xf32>,
    %360 = vector.extract_strided_slice %317 {offsets = [0, 14, 0], sizes = [4, 1, 16], strides = [1, 1, 1]} : vector<4x16x16xf32> to vector<4x1x16xf32>
    %361 = vector.shape_cast %360 : vector<4x1x16xf32> to vector<4x16xf32>
    %c24_222 = arith.constant 24 : index
    %c224_223 = arith.constant 224 : index
    %362 = vector.load %arg7[%c24_222, %c224_223] : memref<36x256xf32, #tpu.memory_space<vmem>>, vector<4x16xf32>
    tpu.vector_store %arg7[%c24_222, %c224_223], %361 {strides = array<i32>} : memref<36x256xf32, #tpu.memory_space<vmem>>, vector<4x16xf32>,
    %363 = vector.extract_strided_slice %317 {offsets = [0, 15, 0], sizes = [4, 1, 16], strides = [1, 1, 1]} : vector<4x16x16xf32> to vector<4x1x16xf32>
    %364 = vector.shape_cast %363 : vector<4x1x16xf32> to vector<4x16xf32>
    %c24_224 = arith.constant 24 : index
    %c240_225 = arith.constant 240 : index
    %365 = vector.load %arg7[%c24_224, %c240_225] : memref<36x256xf32, #tpu.memory_space<vmem>>, vector<4x16xf32>
    tpu.vector_store %arg7[%c24_224, %c240_225], %364 {strides = array<i32>} : memref<36x256xf32, #tpu.memory_space<vmem>>, vector<4x16xf32>,
    %c2_i32_226 = arith.constant 2 : i32
    %366 = arith.addi %1, %c2_i32_226 : i32
    %c0_227 = arith.constant 0 : index
    %c0_228 = arith.constant 0 : index
    %367 = arith.index_cast %366 : i32 to index
    %c1_229 = arith.constant 1 : index
    %368 = vector.load %arg3[%c0_227, %c0_228, %367, %c1_229] : memref<1x4x18x18xf32, #tpu.memory_space<vmem>>, vector<1x4x16x16xf32>
    %369 = vector.shape_cast %368 : vector<1x4x16x16xf32> to vector<4x16x16xf32>
    %370 = vector.extract_strided_slice %369 {offsets = [0, 0, 0], sizes = [4, 1, 16], strides = [1, 1, 1]} : vector<4x16x16xf32> to vector<4x1x16xf32>
    %371 = vector.shape_cast %370 : vector<4x1x16xf32> to vector<4x16xf32>
    %c28 = arith.constant 28 : index
    %c0_230 = arith.constant 0 : index
    %372 = vector.load %arg7[%c28, %c0_230] : memref<36x256xf32, #tpu.memory_space<vmem>>, vector<4x16xf32>
    tpu.vector_store %arg7[%c28, %c0_230], %371 {strides = array<i32>} : memref<36x256xf32, #tpu.memory_space<vmem>>, vector<4x16xf32>,
    %373 = vector.extract_strided_slice %369 {offsets = [0, 1, 0], sizes = [4, 1, 16], strides = [1, 1, 1]} : vector<4x16x16xf32> to vector<4x1x16xf32>
    %374 = vector.shape_cast %373 : vector<4x1x16xf32> to vector<4x16xf32>
    %c28_231 = arith.constant 28 : index
    %c16_232 = arith.constant 16 : index
    %375 = vector.load %arg7[%c28_231, %c16_232] : memref<36x256xf32, #tpu.memory_space<vmem>>, vector<4x16xf32>
    tpu.vector_store %arg7[%c28_231, %c16_232], %374 {strides = array<i32>} : memref<36x256xf32, #tpu.memory_space<vmem>>, vector<4x16xf32>,
    %376 = vector.extract_strided_slice %369 {offsets = [0, 2, 0], sizes = [4, 1, 16], strides = [1, 1, 1]} : vector<4x16x16xf32> to vector<4x1x16xf32>
    %377 = vector.shape_cast %376 : vector<4x1x16xf32> to vector<4x16xf32>
    %c28_233 = arith.constant 28 : index
    %c32_234 = arith.constant 32 : index
    %378 = vector.load %arg7[%c28_233, %c32_234] : memref<36x256xf32, #tpu.memory_space<vmem>>, vector<4x16xf32>
    tpu.vector_store %arg7[%c28_233, %c32_234], %377 {strides = array<i32>} : memref<36x256xf32, #tpu.memory_space<vmem>>, vector<4x16xf32>,
    %379 = vector.extract_strided_slice %369 {offsets = [0, 3, 0], sizes = [4, 1, 16], strides = [1, 1, 1]} : vector<4x16x16xf32> to vector<4x1x16xf32>
    %380 = vector.shape_cast %379 : vector<4x1x16xf32> to vector<4x16xf32>
    %c28_235 = arith.constant 28 : index
    %c48_236 = arith.constant 48 : index
    %381 = vector.load %arg7[%c28_235, %c48_236] : memref<36x256xf32, #tpu.memory_space<vmem>>, vector<4x16xf32>
    tpu.vector_store %arg7[%c28_235, %c48_236], %380 {strides = array<i32>} : memref<36x256xf32, #tpu.memory_space<vmem>>, vector<4x16xf32>,
    %382 = vector.extract_strided_slice %369 {offsets = [0, 4, 0], sizes = [4, 1, 16], strides = [1, 1, 1]} : vector<4x16x16xf32> to vector<4x1x16xf32>
    %383 = vector.shape_cast %382 : vector<4x1x16xf32> to vector<4x16xf32>
    %c28_237 = arith.constant 28 : index
    %c64_238 = arith.constant 64 : index
    %384 = vector.load %arg7[%c28_237, %c64_238] : memref<36x256xf32, #tpu.memory_space<vmem>>, vector<4x16xf32>
    tpu.vector_store %arg7[%c28_237, %c64_238], %383 {strides = array<i32>} : memref<36x256xf32, #tpu.memory_space<vmem>>, vector<4x16xf32>,
    %385 = vector.extract_strided_slice %369 {offsets = [0, 5, 0], sizes = [4, 1, 16], strides = [1, 1, 1]} : vector<4x16x16xf32> to vector<4x1x16xf32>
    %386 = vector.shape_cast %385 : vector<4x1x16xf32> to vector<4x16xf32>
    %c28_239 = arith.constant 28 : index
    %c80_240 = arith.constant 80 : index
    %387 = vector.load %arg7[%c28_239, %c80_240] : memref<36x256xf32, #tpu.memory_space<vmem>>, vector<4x16xf32>
    tpu.vector_store %arg7[%c28_239, %c80_240], %386 {strides = array<i32>} : memref<36x256xf32, #tpu.memory_space<vmem>>, vector<4x16xf32>,
    %388 = vector.extract_strided_slice %369 {offsets = [0, 6, 0], sizes = [4, 1, 16], strides = [1, 1, 1]} : vector<4x16x16xf32> to vector<4x1x16xf32>
    %389 = vector.shape_cast %388 : vector<4x1x16xf32> to vector<4x16xf32>
    %c28_241 = arith.constant 28 : index
    %c96_242 = arith.constant 96 : index
    %390 = vector.load %arg7[%c28_241, %c96_242] : memref<36x256xf32, #tpu.memory_space<vmem>>, vector<4x16xf32>
    tpu.vector_store %arg7[%c28_241, %c96_242], %389 {strides = array<i32>} : memref<36x256xf32, #tpu.memory_space<vmem>>, vector<4x16xf32>,
    %391 = vector.extract_strided_slice %369 {offsets = [0, 7, 0], sizes = [4, 1, 16], strides = [1, 1, 1]} : vector<4x16x16xf32> to vector<4x1x16xf32>
    %392 = vector.shape_cast %391 : vector<4x1x16xf32> to vector<4x16xf32>
    %c28_243 = arith.constant 28 : index
    %c112_244 = arith.constant 112 : index
    %393 = vector.load %arg7[%c28_243, %c112_244] : memref<36x256xf32, #tpu.memory_space<vmem>>, vector<4x16xf32>
    tpu.vector_store %arg7[%c28_243, %c112_244], %392 {strides = array<i32>} : memref<36x256xf32, #tpu.memory_space<vmem>>, vector<4x16xf32>,
    %394 = vector.extract_strided_slice %369 {offsets = [0, 8, 0], sizes = [4, 1, 16], strides = [1, 1, 1]} : vector<4x16x16xf32> to vector<4x1x16xf32>
    %395 = vector.shape_cast %394 : vector<4x1x16xf32> to vector<4x16xf32>
    %c28_245 = arith.constant 28 : index
    %c128_246 = arith.constant 128 : index
    %396 = vector.load %arg7[%c28_245, %c128_246] : memref<36x256xf32, #tpu.memory_space<vmem>>, vector<4x16xf32>
    tpu.vector_store %arg7[%c28_245, %c128_246], %395 {strides = array<i32>} : memref<36x256xf32, #tpu.memory_space<vmem>>, vector<4x16xf32>,
    %397 = vector.extract_strided_slice %369 {offsets = [0, 9, 0], sizes = [4, 1, 16], strides = [1, 1, 1]} : vector<4x16x16xf32> to vector<4x1x16xf32>
    %398 = vector.shape_cast %397 : vector<4x1x16xf32> to vector<4x16xf32>
    %c28_247 = arith.constant 28 : index
    %c144_248 = arith.constant 144 : index
    %399 = vector.load %arg7[%c28_247, %c144_248] : memref<36x256xf32, #tpu.memory_space<vmem>>, vector<4x16xf32>
    tpu.vector_store %arg7[%c28_247, %c144_248], %398 {strides = array<i32>} : memref<36x256xf32, #tpu.memory_space<vmem>>, vector<4x16xf32>,
    %400 = vector.extract_strided_slice %369 {offsets = [0, 10, 0], sizes = [4, 1, 16], strides = [1, 1, 1]} : vector<4x16x16xf32> to vector<4x1x16xf32>
    %401 = vector.shape_cast %400 : vector<4x1x16xf32> to vector<4x16xf32>
    %c28_249 = arith.constant 28 : index
    %c160_250 = arith.constant 160 : index
    %402 = vector.load %arg7[%c28_249, %c160_250] : memref<36x256xf32, #tpu.memory_space<vmem>>, vector<4x16xf32>
    tpu.vector_store %arg7[%c28_249, %c160_250], %401 {strides = array<i32>} : memref<36x256xf32, #tpu.memory_space<vmem>>, vector<4x16xf32>,
    %403 = vector.extract_strided_slice %369 {offsets = [0, 11, 0], sizes = [4, 1, 16], strides = [1, 1, 1]} : vector<4x16x16xf32> to vector<4x1x16xf32>
    %404 = vector.shape_cast %403 : vector<4x1x16xf32> to vector<4x16xf32>
    %c28_251 = arith.constant 28 : index
    %c176_252 = arith.constant 176 : index
    %405 = vector.load %arg7[%c28_251, %c176_252] : memref<36x256xf32, #tpu.memory_space<vmem>>, vector<4x16xf32>
    tpu.vector_store %arg7[%c28_251, %c176_252], %404 {strides = array<i32>} : memref<36x256xf32, #tpu.memory_space<vmem>>, vector<4x16xf32>,
    %406 = vector.extract_strided_slice %369 {offsets = [0, 12, 0], sizes = [4, 1, 16], strides = [1, 1, 1]} : vector<4x16x16xf32> to vector<4x1x16xf32>
    %407 = vector.shape_cast %406 : vector<4x1x16xf32> to vector<4x16xf32>
    %c28_253 = arith.constant 28 : index
    %c192_254 = arith.constant 192 : index
    %408 = vector.load %arg7[%c28_253, %c192_254] : memref<36x256xf32, #tpu.memory_space<vmem>>, vector<4x16xf32>
    tpu.vector_store %arg7[%c28_253, %c192_254], %407 {strides = array<i32>} : memref<36x256xf32, #tpu.memory_space<vmem>>, vector<4x16xf32>,
    %409 = vector.extract_strided_slice %369 {offsets = [0, 13, 0], sizes = [4, 1, 16], strides = [1, 1, 1]} : vector<4x16x16xf32> to vector<4x1x16xf32>
    %410 = vector.shape_cast %409 : vector<4x1x16xf32> to vector<4x16xf32>
    %c28_255 = arith.constant 28 : index
    %c208_256 = arith.constant 208 : index
    %411 = vector.load %arg7[%c28_255, %c208_256] : memref<36x256xf32, #tpu.memory_space<vmem>>, vector<4x16xf32>
    tpu.vector_store %arg7[%c28_255, %c208_256], %410 {strides = array<i32>} : memref<36x256xf32, #tpu.memory_space<vmem>>, vector<4x16xf32>,
    %412 = vector.extract_strided_slice %369 {offsets = [0, 14, 0], sizes = [4, 1, 16], strides = [1, 1, 1]} : vector<4x16x16xf32> to vector<4x1x16xf32>
    %413 = vector.shape_cast %412 : vector<4x1x16xf32> to vector<4x16xf32>
    %c28_257 = arith.constant 28 : index
    %c224_258 = arith.constant 224 : index
    %414 = vector.load %arg7[%c28_257, %c224_258] : memref<36x256xf32, #tpu.memory_space<vmem>>, vector<4x16xf32>
    tpu.vector_store %arg7[%c28_257, %c224_258], %413 {strides = array<i32>} : memref<36x256xf32, #tpu.memory_space<vmem>>, vector<4x16xf32>,
    %415 = vector.extract_strided_slice %369 {offsets = [0, 15, 0], sizes = [4, 1, 16], strides = [1, 1, 1]} : vector<4x16x16xf32> to vector<4x1x16xf32>
    %416 = vector.shape_cast %415 : vector<4x1x16xf32> to vector<4x16xf32>
    %c28_259 = arith.constant 28 : index
    %c240_260 = arith.constant 240 : index
    %417 = vector.load %arg7[%c28_259, %c240_260] : memref<36x256xf32, #tpu.memory_space<vmem>>, vector<4x16xf32>
    tpu.vector_store %arg7[%c28_259, %c240_260], %416 {strides = array<i32>} : memref<36x256xf32, #tpu.memory_space<vmem>>, vector<4x16xf32>,
    %c2_i32_261 = arith.constant 2 : i32
    %418 = arith.addi %1, %c2_i32_261 : i32
    %c0_262 = arith.constant 0 : index
    %c0_263 = arith.constant 0 : index
    %419 = arith.index_cast %418 : i32 to index
    %c2_264 = arith.constant 2 : index
    %420 = vector.load %arg3[%c0_262, %c0_263, %419, %c2_264] : memref<1x4x18x18xf32, #tpu.memory_space<vmem>>, vector<1x4x16x16xf32>
    %421 = vector.shape_cast %420 : vector<1x4x16x16xf32> to vector<4x16x16xf32>
    %422 = vector.extract_strided_slice %421 {offsets = [0, 0, 0], sizes = [4, 1, 16], strides = [1, 1, 1]} : vector<4x16x16xf32> to vector<4x1x16xf32>
    %423 = vector.shape_cast %422 : vector<4x1x16xf32> to vector<4x16xf32>
    %c32_265 = arith.constant 32 : index
    %c0_266 = arith.constant 0 : index
    %424 = vector.load %arg7[%c32_265, %c0_266] : memref<36x256xf32, #tpu.memory_space<vmem>>, vector<4x16xf32>
    tpu.vector_store %arg7[%c32_265, %c0_266], %423 {strides = array<i32>} : memref<36x256xf32, #tpu.memory_space<vmem>>, vector<4x16xf32>,
    %425 = vector.extract_strided_slice %421 {offsets = [0, 1, 0], sizes = [4, 1, 16], strides = [1, 1, 1]} : vector<4x16x16xf32> to vector<4x1x16xf32>
    %426 = vector.shape_cast %425 : vector<4x1x16xf32> to vector<4x16xf32>
    %c32_267 = arith.constant 32 : index
    %c16_268 = arith.constant 16 : index
    %427 = vector.load %arg7[%c32_267, %c16_268] : memref<36x256xf32, #tpu.memory_space<vmem>>, vector<4x16xf32>
    tpu.vector_store %arg7[%c32_267, %c16_268], %426 {strides = array<i32>} : memref<36x256xf32, #tpu.memory_space<vmem>>, vector<4x16xf32>,
    %428 = vector.extract_strided_slice %421 {offsets = [0, 2, 0], sizes = [4, 1, 16], strides = [1, 1, 1]} : vector<4x16x16xf32> to vector<4x1x16xf32>
    %429 = vector.shape_cast %428 : vector<4x1x16xf32> to vector<4x16xf32>
    %c32_269 = arith.constant 32 : index
    %c32_270 = arith.constant 32 : index
    %430 = vector.load %arg7[%c32_269, %c32_270] : memref<36x256xf32, #tpu.memory_space<vmem>>, vector<4x16xf32>
    tpu.vector_store %arg7[%c32_269, %c32_270], %429 {strides = array<i32>} : memref<36x256xf32, #tpu.memory_space<vmem>>, vector<4x16xf32>,
    %431 = vector.extract_strided_slice %421 {offsets = [0, 3, 0], sizes = [4, 1, 16], strides = [1, 1, 1]} : vector<4x16x16xf32> to vector<4x1x16xf32>
    %432 = vector.shape_cast %431 : vector<4x1x16xf32> to vector<4x16xf32>
    %c32_271 = arith.constant 32 : index
    %c48_272 = arith.constant 48 : index
    %433 = vector.load %arg7[%c32_271, %c48_272] : memref<36x256xf32, #tpu.memory_space<vmem>>, vector<4x16xf32>
    tpu.vector_store %arg7[%c32_271, %c48_272], %432 {strides = array<i32>} : memref<36x256xf32, #tpu.memory_space<vmem>>, vector<4x16xf32>,
    %434 = vector.extract_strided_slice %421 {offsets = [0, 4, 0], sizes = [4, 1, 16], strides = [1, 1, 1]} : vector<4x16x16xf32> to vector<4x1x16xf32>
    %435 = vector.shape_cast %434 : vector<4x1x16xf32> to vector<4x16xf32>
    %c32_273 = arith.constant 32 : index
    %c64_274 = arith.constant 64 : index
    %436 = vector.load %arg7[%c32_273, %c64_274] : memref<36x256xf32, #tpu.memory_space<vmem>>, vector<4x16xf32>
    tpu.vector_store %arg7[%c32_273, %c64_274], %435 {strides = array<i32>} : memref<36x256xf32, #tpu.memory_space<vmem>>, vector<4x16xf32>,
    %437 = vector.extract_strided_slice %421 {offsets = [0, 5, 0], sizes = [4, 1, 16], strides = [1, 1, 1]} : vector<4x16x16xf32> to vector<4x1x16xf32>
    %438 = vector.shape_cast %437 : vector<4x1x16xf32> to vector<4x16xf32>
    %c32_275 = arith.constant 32 : index
    %c80_276 = arith.constant 80 : index
    %439 = vector.load %arg7[%c32_275, %c80_276] : memref<36x256xf32, #tpu.memory_space<vmem>>, vector<4x16xf32>
    tpu.vector_store %arg7[%c32_275, %c80_276], %438 {strides = array<i32>} : memref<36x256xf32, #tpu.memory_space<vmem>>, vector<4x16xf32>,
    %440 = vector.extract_strided_slice %421 {offsets = [0, 6, 0], sizes = [4, 1, 16], strides = [1, 1, 1]} : vector<4x16x16xf32> to vector<4x1x16xf32>
    %441 = vector.shape_cast %440 : vector<4x1x16xf32> to vector<4x16xf32>
    %c32_277 = arith.constant 32 : index
    %c96_278 = arith.constant 96 : index
    %442 = vector.load %arg7[%c32_277, %c96_278] : memref<36x256xf32, #tpu.memory_space<vmem>>, vector<4x16xf32>
    tpu.vector_store %arg7[%c32_277, %c96_278], %441 {strides = array<i32>} : memref<36x256xf32, #tpu.memory_space<vmem>>, vector<4x16xf32>,
    %443 = vector.extract_strided_slice %421 {offsets = [0, 7, 0], sizes = [4, 1, 16], strides = [1, 1, 1]} : vector<4x16x16xf32> to vector<4x1x16xf32>
    %444 = vector.shape_cast %443 : vector<4x1x16xf32> to vector<4x16xf32>
    %c32_279 = arith.constant 32 : index
    %c112_280 = arith.constant 112 : index
    %445 = vector.load %arg7[%c32_279, %c112_280] : memref<36x256xf32, #tpu.memory_space<vmem>>, vector<4x16xf32>
    tpu.vector_store %arg7[%c32_279, %c112_280], %444 {strides = array<i32>} : memref<36x256xf32, #tpu.memory_space<vmem>>, vector<4x16xf32>,
    %446 = vector.extract_strided_slice %421 {offsets = [0, 8, 0], sizes = [4, 1, 16], strides = [1, 1, 1]} : vector<4x16x16xf32> to vector<4x1x16xf32>
    %447 = vector.shape_cast %446 : vector<4x1x16xf32> to vector<4x16xf32>
    %c32_281 = arith.constant 32 : index
    %c128_282 = arith.constant 128 : index
    %448 = vector.load %arg7[%c32_281, %c128_282] : memref<36x256xf32, #tpu.memory_space<vmem>>, vector<4x16xf32>
    tpu.vector_store %arg7[%c32_281, %c128_282], %447 {strides = array<i32>} : memref<36x256xf32, #tpu.memory_space<vmem>>, vector<4x16xf32>,
    %449 = vector.extract_strided_slice %421 {offsets = [0, 9, 0], sizes = [4, 1, 16], strides = [1, 1, 1]} : vector<4x16x16xf32> to vector<4x1x16xf32>
    %450 = vector.shape_cast %449 : vector<4x1x16xf32> to vector<4x16xf32>
    %c32_283 = arith.constant 32 : index
    %c144_284 = arith.constant 144 : index
    %451 = vector.load %arg7[%c32_283, %c144_284] : memref<36x256xf32, #tpu.memory_space<vmem>>, vector<4x16xf32>
    tpu.vector_store %arg7[%c32_283, %c144_284], %450 {strides = array<i32>} : memref<36x256xf32, #tpu.memory_space<vmem>>, vector<4x16xf32>,
    %452 = vector.extract_strided_slice %421 {offsets = [0, 10, 0], sizes = [4, 1, 16], strides = [1, 1, 1]} : vector<4x16x16xf32> to vector<4x1x16xf32>
    %453 = vector.shape_cast %452 : vector<4x1x16xf32> to vector<4x16xf32>
    %c32_285 = arith.constant 32 : index
    %c160_286 = arith.constant 160 : index
    %454 = vector.load %arg7[%c32_285, %c160_286] : memref<36x256xf32, #tpu.memory_space<vmem>>, vector<4x16xf32>
    tpu.vector_store %arg7[%c32_285, %c160_286], %453 {strides = array<i32>} : memref<36x256xf32, #tpu.memory_space<vmem>>, vector<4x16xf32>,
    %455 = vector.extract_strided_slice %421 {offsets = [0, 11, 0], sizes = [4, 1, 16], strides = [1, 1, 1]} : vector<4x16x16xf32> to vector<4x1x16xf32>
    %456 = vector.shape_cast %455 : vector<4x1x16xf32> to vector<4x16xf32>
    %c32_287 = arith.constant 32 : index
    %c176_288 = arith.constant 176 : index
    %457 = vector.load %arg7[%c32_287, %c176_288] : memref<36x256xf32, #tpu.memory_space<vmem>>, vector<4x16xf32>
    tpu.vector_store %arg7[%c32_287, %c176_288], %456 {strides = array<i32>} : memref<36x256xf32, #tpu.memory_space<vmem>>, vector<4x16xf32>,
    %458 = vector.extract_strided_slice %421 {offsets = [0, 12, 0], sizes = [4, 1, 16], strides = [1, 1, 1]} : vector<4x16x16xf32> to vector<4x1x16xf32>
    %459 = vector.shape_cast %458 : vector<4x1x16xf32> to vector<4x16xf32>
    %c32_289 = arith.constant 32 : index
    %c192_290 = arith.constant 192 : index
    %460 = vector.load %arg7[%c32_289, %c192_290] : memref<36x256xf32, #tpu.memory_space<vmem>>, vector<4x16xf32>
    tpu.vector_store %arg7[%c32_289, %c192_290], %459 {strides = array<i32>} : memref<36x256xf32, #tpu.memory_space<vmem>>, vector<4x16xf32>,
    %461 = vector.extract_strided_slice %421 {offsets = [0, 13, 0], sizes = [4, 1, 16], strides = [1, 1, 1]} : vector<4x16x16xf32> to vector<4x1x16xf32>
    %462 = vector.shape_cast %461 : vector<4x1x16xf32> to vector<4x16xf32>
    %c32_291 = arith.constant 32 : index
    %c208_292 = arith.constant 208 : index
    %463 = vector.load %arg7[%c32_291, %c208_292] : memref<36x256xf32, #tpu.memory_space<vmem>>, vector<4x16xf32>
    tpu.vector_store %arg7[%c32_291, %c208_292], %462 {strides = array<i32>} : memref<36x256xf32, #tpu.memory_space<vmem>>, vector<4x16xf32>,
    %464 = vector.extract_strided_slice %421 {offsets = [0, 14, 0], sizes = [4, 1, 16], strides = [1, 1, 1]} : vector<4x16x16xf32> to vector<4x1x16xf32>
    %465 = vector.shape_cast %464 : vector<4x1x16xf32> to vector<4x16xf32>
    %c32_293 = arith.constant 32 : index
    %c224_294 = arith.constant 224 : index
    %466 = vector.load %arg7[%c32_293, %c224_294] : memref<36x256xf32, #tpu.memory_space<vmem>>, vector<4x16xf32>
    tpu.vector_store %arg7[%c32_293, %c224_294], %465 {strides = array<i32>} : memref<36x256xf32, #tpu.memory_space<vmem>>, vector<4x16xf32>,
    %467 = vector.extract_strided_slice %421 {offsets = [0, 15, 0], sizes = [4, 1, 16], strides = [1, 1, 1]} : vector<4x16x16xf32> to vector<4x1x16xf32>
    %468 = vector.shape_cast %467 : vector<4x1x16xf32> to vector<4x16xf32>
    %c32_295 = arith.constant 32 : index
    %c240_296 = arith.constant 240 : index
    %469 = vector.load %arg7[%c32_295, %c240_296] : memref<36x256xf32, #tpu.memory_space<vmem>>, vector<4x16xf32>
    tpu.vector_store %arg7[%c32_295, %c240_296], %468 {strides = array<i32>} : memref<36x256xf32, #tpu.memory_space<vmem>>, vector<4x16xf32>,
    %c0_297 = arith.constant 0 : index
    %c0_298 = arith.constant 0 : index
    %470 = vector.load %arg4[%c0_297, %c0_298] : memref<8x36xf32, #tpu.memory_space<vmem>>, vector<8x36xf32>
    %c0_299 = arith.constant 0 : index
    %c0_300 = arith.constant 0 : index
    %471 = vector.load %arg7[%c0_299, %c0_300] : memref<36x256xf32, #tpu.memory_space<vmem>>, vector<36x256xf32>
    %cst = arith.constant dense<0.000000e+00> : vector<8x256xf32>
    %472 = tpu.matmul %470, %471, %cst {dimension_numbers = #tpu.dot_dimension_numbers<[1], [0], [0], [1], [0, 0, 1, 1], [], []>} : vector<8x36xf32>, vector<36x256xf32>, vector<8x256xf32> -> vector<8x256xf32>
    %c0_301 = arith.constant 0 : index
    %c0_302 = arith.constant 0 : index
    %473 = vector.load %arg5[%c0_301, %c0_302] : memref<8x1xf32, #tpu.memory_space<vmem>>, vector<8x1xf32>
    %474 = vector.broadcast %473 : vector<8x1xf32> to vector<8x256xf32>
    %475 = arith.addf %472, %474 : vector<8x256xf32>
    %c0_303 = arith.constant 0 : index
    %c0_304 = arith.constant 0 : index
    %c0_305 = arith.constant 0 : index
    %476 = vector.load %arg6[%c0_303, %c0_304, %c0_305] : memref<1x8x256xf32, #tpu.memory_space<vmem>>, vector<1x8x256xf32>
    %477 = vector.shape_cast %476 : vector<1x8x256xf32> to vector<8x256xf32>
    %478 = vector.shape_cast %475 : vector<8x256xf32> to vector<1x8x256xf32>
    tpu.vector_store %arg6[%c0_303, %c0_304, %c0_305], %478 {strides = array<i32>} : memref<1x8x256xf32, #tpu.memory_space<vmem>>, vector<1x8x256xf32>,
    return
  }
  func.func @transform_0(%arg0: i32, %arg1: i32, %arg2: i32) -> (i32, i32, i32, i32) {
    %c0_i32 = arith.constant 0 : i32
    %c0_i32_0 = arith.constant 0 : i32
    %c0_i32_1 = arith.constant 0 : i32
    %c0_i32_2 = arith.constant 0 : i32
    return %arg0, %c0_i32, %c0_i32_0, %c0_i32_1 : i32, i32, i32, i32
  }
  func.func @transform_1(%arg0: i32, %arg1: i32, %arg2: i32) -> (i32, i32) {
    %c0_i32 = arith.constant 0 : i32
    %c0_i32_0 = arith.constant 0 : i32
    return %arg1, %c0_i32 : i32, i32
  }
  func.func @transform_2(%arg0: i32, %arg1: i32, %arg2: i32) -> (i32, i32) {
    %c0_i32 = arith.constant 0 : i32
    %c0_i32_0 = arith.constant 0 : i32
    return %arg1, %c0_i32 : i32, i32
  }
  func.func @transform_3(%arg0: i32, %arg1: i32, %arg2: i32) -> (i32, i32, i32) {
    %c0_i32 = arith.constant 0 : i32
    return %arg0, %arg1, %arg2 : i32, i32, i32
  }
}

</mosaic_0001>

<bundles_post_ra>
// kernel: tpu_custom_call.1
= control target key start
LH: loop header
LB: loop body
LE: loop exit
PB: predicated region body
PF: predicated region fallthrough
CT: control target
= control target key end

     0   :  { %8 = vsyncpa [#allocation4], 0  ;;  %s4204_s0 = inlined_call_operand.vmem [shape: f32[2,4,18,18], index: 0, kind: input, shape index: {}]   ;;  %s4205_s1 = inlined_call_operand.vmem [shape: f32[8,36], index: 1, kind: input, shape index: {}]   ;;  %s4206_s2 = inlined_call_operand.vmem [shape: f32[8,1], index: 2, kind: input, shape index: {}]   ;;  %s4207_s3 = inlined_call_operand.hbm [shape: f32[2,8,256], index: 3, kind: output, shape index: {}]  }
   0x1   :  { %10 = vsyncpa [#allocation4 + $0x1], 0  ;;  %s2383_s12 = smov 0   ;;  %s2385_s13 = smov 0  }
   0x2   :  { %s2387_s14 = smov 0   ;;  %s2389_s15 = smov 0  }
   0x3   :  { %s2391_s16 = smov 0   ;;  %s2393_s17 = smov 0  }
   0x4 LB: > { %s2103_s18 = sadd.s32 4294967295, %s2337_s17   ;;  %s2104_s19 = sadd.s32 4294967294, %s2337_s17   ;;  %s2337_s17 = sphi %s2393_s17, %s16_s17   ;;  %s2333_s16 = sphi %s2391_s16, %s4415_s16   ;;  %s2329_s15 = sphi %s2389_s15, %s4414_s15   ;;  %s2325_s14 = sphi %s2387_s14, %s4413_s14   ;;  %s2321_s13 = sphi %s2385_s13, %s4412_s13   ;;  %s2317_s12 = sphi %s2383_s12, %s4411_s12  }
   0x5   : > { %s35_s20 = sadd.s32 1, %s2333_s16  ;;  %s124_s21 = sadd.s32 1, %s2325_s14 }
   0x6   : > { %p37_p0 = scmp.ge.s32.totalorder %s35_s20, 2  ;;  %p134_p1 = scmp.ne.s32.totalorder %s2325_s14, %s2321_s13 }
   0x7   : > { %p135_p2 = scmp.eq.s32.totalorder %s2103_s18, 1  ;;  %p140_p3 = scmp.ne.s32.totalorder %s2321_s13, %s2317_s12 }
   0x8   : > { %s4417_s20 = smov (%p37_p0, %s35_s20), 0  ;;  %p141_p5 = scmp.eq.s32.totalorder %s2104_s19, 1 }
   0x9   : > { %p2423_p4 = por %p135_p2, %p134_p1  ;;  %s117_s23 = ssub.s32 %s2333_s16, %s4417_s20 }
   0xa   : > { %p2109_p6 = scmp.ge.s32.totalorder %s2337_s17, 1  ;;  %p122_p7 = scmp.eq.s32.totalorder %s117_s23, 0 }
   0xb   : > { %p2430_p8 = por %p141_p5, %p140_p3  ;;  %p181_p9 = scmp.lt.s32.totalorder %s2337_s17, 3 }
   0xc   : > { %s2436_s25 = scalar_select %p122_p7, %s2325_s14, %s124_s21  }
   0xd   : > { %p182_p10 = pnand %p2109_p6, %p181_p9 }
   0xe   : > { %p213_p11 = scmp.lt.s32.totalorder (!%p182_p10), %s2329_s15, 1  ;;  %s2339_s4 = smov (!%p182_p10), 48  }
   0xf   : > { %185 = sbr.rel (%p182_p10) target bundleno = 652 (0x28c), region = 32  ;;  %s2340_s5 = smov (!%p182_p10), 16  }
  0x10   : > { %s4258_s6 = smov (!%p182_p10), 64   ;;  %s2342_s7 = smov (!%p182_p10), 32  }
  0x11   : > { %s4254_s8 = smov (!%p182_p10), 80   ;;  %s4249_s9 = smov (!%p182_p10), 112  }
  0x12   : > { %s4244_s10 = smov (!%p182_p10), 96   ;;  %s4225_s11 = smov (!%p182_p10), 31  }
  0x13   : > { %s2347_s18 = smov (!%p182_p10), 15   ;;  %s4233_s19 = smov (!%p182_p10), 127  }
  0x14   : > { %s214_s26 = scalar_select %p213_p11, %s2329_s15, 1  ;;  %vm242_vm0 = vcmask 1041409   ;;  %vm245_vm1 = vcmask 1042434   ;;  %vm248_vm2 = vcmask 1043459   ;;  %vm434_vm3 = vcmask 1045509  }
  0x15   : > { %vm437_vm4 = vcmask 1046534   ;;  %vm4253_vm5 = vcmask 1047559   ;;  %s4221_s21 = smov 79   ;;  %s4231_s23 = smov 63   ;;  %vm4262_vm6 = vcmask 125952   ;;  %vm262_vm7 = vcmask 257152  }
  0x16   : > { %s2170_s27 = smul.u32 96, %s214_s26  ;;  %s4229_s26 = smov 47   ;;  %vm273_vm8 = vcmask 388352   ;;  %vm4248_vm9 = vcmask 519552   ;;  %vm4247_vm10 = vcmask 650752   ;;  %vm4246_vm11 = vcmask 781952  }
  0x17   : > { %s4223_s28 = smov 95   ;;  %s2354_s29 = smov 14   ;;  %vm4243_vm12 = vcmask 913152   ;;  %vm4240_vm13 = vcmask 1044352   ;;  %vm445_vm14 = vcmask 130052   ;;  %vm457_vm15 = vcmask 261252  }
  0x18   : > { %s2443_s30 = scalar_lea.vmem %s4204_s0, %s2170_s27  ;;  %s4227_s27 = smov 111  }
  0x19   : > { %v2446_v0 = vld [vmem:[%s2443_s30] sm:$0xff]  ;;  %v2449_v1 = vld [vmem:[%s2443_s30 + $0x18] sm:$0xff]  ;;  %v2452_v2 = vld [vmem:[%s2443_s30 + $0x30] sm:$0xff] }
  0x1a   : > { %v2455_v3 = vld [vmem:[%s2443_s30 + $0x48] sm:$0xff]  ;;  %v275_v4 = vrot.slane %v2446_v0, 3  ;;  %v276_v5 = vrot.slane %v2449_v1, 2  ;;  %v278_v6 = vrot.slane %v2452_v2, 1  ;;  %v253_v7 = vrot.slane %v2446_v0, 1  ;;  %v2517_v28 = vld [vmem:[%s2443_s30 + $0x38] sm:$0xff] }
  0x1b   : > { %v255_v8 = vrot.slane %v2452_v2, 7  ;;  %v257_v9 = vrot.slane %v2455_v3, 6  ;;  %v286_v10 = vrot.slane %v2446_v0, 4  ;;  %v287_v11 = vrot.slane %v2449_v1, 3  ;;  %v2502_v22 = vld [vmem:[%s2443_s30 + $0x8] sm:$0xff]  ;;  %v2523_v32 = vld [vmem:[%s2443_s30 + $0x20] sm:$0xff] }
  0x1c   : > { %v277_v12 = vsel %vm242_vm0, %v276_v5, %v275_v4  ;;  %v254_v13 = vsel %vm242_vm0, %v2449_v1, %v253_v7  ;;  %v289_v16 = vrot.slane %v2452_v2, 2  ;;  %v264_v17 = vrot.slane %v2446_v0, 2  ;;  %v2536_v35 = vld [vmem:[%s2443_s30 + $0x50] sm:$0xff] }
  0x1d   : > { %v279_v14 = vsel %vm245_vm1, %v278_v6, %v277_v12  ;;  %v256_v15 = vsel %vm245_vm1, %v255_v8, %v254_v13  ;;  %v288_v20 = vsel %vm242_vm0, %v287_v11, %v286_v10  ;;  %v265_v21 = vrot.slane %v2449_v1, 1 }
  0x1e   : > { %v2484_v18 = vsel %vm248_vm2, %v2455_v3, %v279_v14  ;;  %v2489_v19 = vsel %vm248_vm2, %v257_v9, %v256_v15  ;;  %v291_v23 = vrot.slane %v2455_v3, 1  ;;  %v4216_v25 = vrot.slane %v2455_v3, 7 }
  0x1f   : > { %281 = vrot.lane.b32.xlu1 %v2484_v18, %s2339_s4  ;;  %259 = vrot.lane.b32.xlu0 %v2489_v19, %s2340_s5  ;;  %v266_v24 = vsel %vm242_vm0, %v265_v21, %v264_v17  ;;  %v290_v26 = vsel %vm245_vm1, %v289_v16, %v288_v20  ;;  %v4213_v29 = vrot.slane %v2502_v22, 1  ;;  %v322_v30 = vrot.slane %v2446_v0, 7 }
  0x20   : > { %v267_v27 = vsel %vm245_vm1, %v2452_v2, %v266_v24  ;;  %v323_v31 = vrot.slane %v2449_v1, 6  ;;  %v2528_v33 = vsel %vm248_vm2, %v291_v23, %v290_v26  ;;  %v4212_v36 = vrot.slane %v2517_v28, 7 }
  0x21   : > { %v2533_v34 = vsel %vm248_vm2, %v4216_v25, %v267_v27  ;;  %v325_v37 = vrot.slane %v2452_v2, 5  ;;  %v298_v38 = vrot.slane %v2446_v0, 5  ;;  %v299_v39 = vrot.slane %v2449_v1, 4 }
  0x22   : > { %v347_v40 = vsel %vm242_vm0, %v2523_v32, %v4213_v29  ;;  %v324_v41 = vsel %vm242_vm0, %v323_v31, %v322_v30  ;;  %v301_v42 = vrot.slane %v2452_v2, 3  ;;  %v303_v43 = vrot.slane %v2455_v3, 2 }
  0x23   : > { %v300_v44 = vsel %vm242_vm0, %v299_v39, %v298_v38  ;;  %v4211_v45 = vrot.slane %v2536_v35, 6  ;;  %v327_v46 = vrot.slane %v2455_v3, 4  ;;  %v349_v48 = vsel %vm245_vm1, %v4212_v36, %v347_v40 }
  0x24   : > { %v302_v47 = vsel %vm245_vm1, %v301_v42, %v300_v44  ;;  %v326_v49 = vsel %vm245_vm1, %v325_v37, %v324_v41  ;;  %v376_v50 = vrot.slane %v2502_v22, 4  ;;  %v377_v52 = vrot.slane %v2523_v32, 3 }
  0x25   : > { %v2577_v51 = vsel %vm248_vm2, %v303_v43, %v302_v47  ;;  %v4210_v53 = vrot.slane %v2502_v22, 3  ;;  %v4209_v54 = vrot.slane %v2523_v32, 2  ;;  %v310_v55 = vrot.slane %v2446_v0, 6 }
  0x26   : > { %305 = vrot.lane.b32.xlu2 %v2577_v51, %s4254_s8  ;;  %v311_v56 = vrot.slane %v2449_v1, 5  ;;  %v313_v57 = vrot.slane %v2452_v2, 4  ;;  %v2590_v58 = vsel %vm248_vm2, %v4211_v45, %v349_v48  ;;  %v2595_v59 = vsel %vm248_vm2, %v327_v46, %v326_v49 }
  0x27   : > { %293 = vrot.lane.b32.xlu1 %v2528_v33, %s4258_s6  ;;  %270 = vrot.lane.b32.xlu0 %v2533_v34, %s2342_s7  ;;  %v315_v60 = vrot.slane %v2455_v3, 3  ;;  %v379_v61 = vrot.slane %v2517_v28, 2  ;;  %v4208_v62 = vrot.slane %v2517_v28, 1  ;;  %v378_v12 = vsel %vm242_vm0, %v377_v52, %v376_v50 }
  0x28   : > { %v312_v63 = vsel %vm242_vm0, %v311_v56, %v310_v55  ;;  %v368_v13 = vsel %vm242_vm0, %v4209_v54, %v4210_v53  ;;  %v4215_v15 = vrot.slane %v2502_v22, 2  ;;  %v4214_v24 = vrot.slane %v2523_v32, 1 }
  0x29   : > { %v314_v14 = vsel %vm245_vm1, %v313_v57, %v312_v63  ;;  %v381_v26 = vrot.slane %v2536_v35, 1  ;;  %v380_v27 = vsel %vm245_vm1, %v379_v61, %v378_v12  ;;  %v370_v40 = vsel %vm245_vm1, %v4208_v62, %v368_v13 }
  0x2a   : > { %v2618_v20 = vsel %vm248_vm2, %v315_v60, %v314_v14  ;;  %v358_v41 = vsel %vm242_vm0, %v4214_v24, %v4215_v15  ;;  %v409_v44 = vrot.slane %v2502_v22, 7  ;;  %v410_v47 = vrot.slane %v2523_v32, 6 }
  0x2b   : > { %v398_v48 = vrot.slane %v2502_v22, 6  ;;  %v399_v49 = vrot.slane %v2523_v32, 5  ;;  %v4217_v63 = vrot.slane %v2536_v35, 7  ;;  %v2643_v12 = vsel %vm248_vm2, %v381_v26, %v380_v27 }
  0x2c   : > { %v2647_v13 = vsel %vm248_vm2, %v2536_v35, %v370_v40  ;;  %v359_v14 = vsel %vm245_vm1, %v2517_v28, %v358_v41  ;;  %v412_v62 = vrot.slane %v2517_v28, 5  ;;  %v4220_v54 = vrot.slane %v2517_v28, 4 }
  0x2d   : > { %v4219_v53 = vrot.slane %v2502_v22, 5  ;;  %v4218_v45 = vrot.slane %v2523_v32, 4  ;;  %v411_v27 = vsel %vm242_vm0, %v410_v47, %v409_v44  ;;  %v400_v40 = vsel %vm242_vm0, %v399_v49, %v398_v48 }
  0x2e   : > { %317 = vrot.lane.b32.xlu2 %v2618_v20, %s4244_s10  ;;  %v2672_v41 = vsel %vm248_vm2, %v4217_v63, %v359_v14  ;;  %v414_v36 = vrot.slane %v2536_v35, 4  ;;  %v403_v29 = vrot.slane %v2536_v35, 3  ;;  %v390_v24 = vrot.slane %v2517_v28, 3 }
  0x2f   : > { %352 = vrot.lane.b32.xlu1 %v2590_v58, %s2340_s5  ;;  %329 = vrot.lane.b32.xlu0 %v2595_v59, %s4249_s9  ;;  %v413_v15 = vsel %vm245_vm1, %v412_v62, %v411_v27  ;;  %v402_v25 = vsel %vm245_vm1, %v4220_v54, %v400_v40  ;;  %v389_v14 = vsel %vm242_vm0, %v4218_v45, %v4219_v53  ;;  %v392_v63 = vrot.slane %v2536_v35, 2 }
  0x30   : > { %v2694_v27 = vsel %vm248_vm2, %v414_v36, %v413_v15  ;;  %v2699_v40 = vsel %vm248_vm2, %v403_v29, %v402_v25  ;;  %v391_v45 = vsel %vm245_vm1, %v390_v24, %v389_v14  ;;  %v461_v53 = vsel %vm434_vm3, %v311_v56, %v310_v55 }
  0x31   : > { %v449_v54 = vsel %vm434_vm3, %v299_v39, %v298_v38  ;;  %v2717_v25 = vsel %vm248_vm2, %v392_v63, %v391_v45  ;;  %v463_v55 = vsel %vm437_vm4, %v313_v57, %v461_v53  ;;  %v435_v38 = vsel %vm434_vm3, %v287_v11, %v286_v10 }
  0x32   : > { %v451_v56 = vsel %vm437_vm4, %v301_v42, %v449_v54  ;;  %v483_v39 = vrot.slane %v2449_v1, 7  ;;  %v465_v45 = vsel %vm4253_vm5, %v315_v60, %v463_v55  ;;  %v438_v42 = vsel %vm437_vm4, %v289_v16, %v435_v38 }
  0x33   : > { %v453_v53 = vsel %vm4253_vm5, %v303_v43, %v451_v56  ;;  %v485_v54 = vrot.slane %v2452_v2, 6  ;;  %v495_v10 = vsel %vm434_vm3, %v2449_v1, %v253_v7  ;;  %v441_v16 = vsel %vm4253_vm5, %v291_v23, %v438_v42 }
  0x34   : > { %v484_v11 = vsel %vm434_vm3, %v483_v39, %v2446_v0  ;;  %v487_v43 = vrot.slane %v2455_v3, 5  ;;  %v497_v7 = vsel %vm437_vm4, %v255_v8, %v495_v10  ;;  %v473_v60 = vsel %vm434_vm3, %v323_v31, %v322_v30 }
  0x35   : > { %v486_v57 = vsel %vm437_vm4, %v485_v54, %v484_v11  ;;  %v499_v23 = vsel %vm4253_vm5, %v257_v9, %v497_v7  ;;  %v475_v8 = vsel %vm437_vm4, %v325_v37, %v473_v60  ;;  %v533_v14 = vsel %vm434_vm3, %v377_v52, %v376_v50 }
  0x36   : > { %362 = vrot.lane.b32.xlu2 %v2672_v41, %s2342_s7  ;;  %v488_v15 = vsel %vm4253_vm5, %v487_v43, %v486_v57  ;;  %v518_v30 = vsel %vm434_vm3, %v276_v5, %v275_v4  ;;  %v477_v9 = vsel %vm4253_vm5, %v327_v46, %v475_v8  ;;  %v535_v31 = vsel %vm437_vm4, %v379_v61, %v533_v14 }
  0x37   : > { %383 = vrot.lane.b32.xlu1 %v2643_v12, %s4258_s6  ;;  %372 = vrot.lane.b32.xlu0 %v2647_v13, %s2339_s4  ;;  %v520_v37 = vsel %vm437_vm4, %v278_v6, %v518_v30  ;;  %v507_v4 = vsel %vm434_vm3, %v265_v21, %v264_v17  ;;  %v537_v5 = vsel %vm4253_vm5, %v381_v26, %v535_v31  ;;  %v4279_v21 = vrot.slane %v2455_v3, 7 }
  0x38   : > { %v521_v46 = vsel %vm4253_vm5, %v2455_v3, %v520_v37  ;;  %v508_v50 = vsel %vm437_vm4, %v2452_v2, %v507_v4  ;;  %v566_v6 = vsel %vm434_vm3, %v410_v47, %v409_v44  ;;  %v555_v17 = vsel %vm434_vm3, %v399_v49, %v398_v48 }
  0x39   : > { %v510_v52 = vsel %vm4253_vm5, %v4279_v21, %v508_v50  ;;  %v568_v61 = vsel %vm437_vm4, %v412_v62, %v566_v6  ;;  %v4280_v26 = vrot.slane %v2517_v28, 4  ;;  %v4281_v47 = vrot.slane %v2502_v22, 5 }
  0x3a   : > { %v4282_v48 = vrot.slane %v2523_v32, 4  ;;  %v570_v3 = vsel %vm4253_vm5, %v414_v36, %v568_v61  ;;  %v575_v56 = vrot.slane %v2523_v32, 7  ;;  %v4283_v38 = vrot.slane %v2502_v22, 2 }
  0x3b   : > { %v557_v44 = vsel %vm437_vm4, %v4280_v26, %v555_v17  ;;  %v4285_v42 = vrot.slane %v2502_v22, 1  ;;  %v4286_v11 = vrot.slane %v2517_v28, 7  ;;  %v579_v57 = vrot.slane %v2536_v35, 5 }
  0x3c   : > { %v544_v49 = vsel %vm434_vm3, %v4282_v48, %v4281_v47  ;;  %v559_v62 = vsel %vm4253_vm5, %v403_v29, %v557_v44  ;;  %v576_v7 = vsel %vm434_vm3, %v575_v56, %v2502_v22  ;;  %v4287_v60 = vrot.slane %v2536_v35, 7 }
  0x3d   : > { %v546_v55 = vsel %vm437_vm4, %v390_v24, %v544_v49  ;;  %v586_v36 = vsel %vm434_vm3, %v2523_v32, %v4285_v42  ;;  %v577_v24 = vrot.slane %v2517_v28, 6  ;;  %v628_v14 = vsel %vm242_vm0, %v483_v39, %v2446_v0 }
  0x3e   : > { %394 = vrot.lane.b32.xlu2 %v2717_v25, %s4254_s8  ;;  %v548_v29 = vsel %vm4253_vm5, %v392_v63, %v546_v55  ;;  %v4289_v31 = vrot.slane %v2502_v22, 3  ;;  %v4290_v37 = vrot.slane %v2523_v32, 2  ;;  %v4291_v1 = vrot.slane %v2517_v28, 1 }
  0x3f   : > { %416 = vrot.lane.b32.xlu1 %v2694_v27, %s4249_s9  ;;  %405 = vrot.lane.b32.xlu0 %v2699_v40, %s4244_s10  ;;  %v578_v8 = vsel %vm437_vm4, %v577_v24, %v576_v7 }
  0x40   : > { %v580_v30 = vsel %vm4253_vm5, %v579_v57, %v578_v8  ;;  %v607_v4 = vsel %vm434_vm3, %v4290_v37, %v4289_v31  ;;  %v3049_v37 = vld [vmem:[%s2443_s30 + $0x39] sm:$0xff] }
  0x41   : > { %v609_v39 = vsel %vm437_vm4, %v4291_v1, %v607_v4 }
  0x42   : > { %v610_v2 = vsel %vm4253_vm5, %v2536_v35, %v609_v39 }
  0x46   : > { %442 = vrot.lane.b32.xlu2 %v441_v16, %s4233_s19  ;;  %v588_v16 = vsel %vm437_vm4, %v4286_v11, %v586_v36 }
  0x47   : > { %466 = vrot.lane.b32.xlu1 %v465_v45, %s4225_s11  ;;  %454 = vrot.lane.b32.xlu0 %v453_v53, %s2347_s18  ;;  %v4284_v45 = vrot.slane %v2523_v32, 1 }
  0x49   : > { %v597_v53 = vsel %vm434_vm3, %v4284_v45, %v4283_v38 }
  0x4a   : > { %v598_v10 = vsel %vm437_vm4, %v2517_v28, %v597_v53  ;;  %v716_v28 = vsel %vm242_vm0, %v575_v56, %v2502_v22  ;;  %v2923_v22 = vld [vmem:[%s2443_s30 + $0x1] sm:$0xff] }
  0x4b   : > { %v600_v63 = vsel %vm4253_vm5, %v4287_v60, %v598_v10  ;;  %v718_v32 = vsel %vm245_vm1, %v577_v24, %v716_v28  ;;  %v844_v6 = vrot.slane %v2923_v22, 7  ;;  %v833_v61 = vrot.slane %v2923_v22, 6  ;;  %v3029_v60 = vld [vmem:[%s2443_s30 + $0x9] sm:$0xff] }
  0x4c   : > { %v885_v38 = vrot.slane %v2923_v22, 3  ;;  %v875_v53 = vrot.slane %v2923_v22, 2  ;;  %v930_v4 = vrot.slane %v3029_v60, 7  ;;  %v4239_v39 = vrot.slane %v3029_v60, 6 }
  0x4e   : > { %478 = vrot.lane.b32.xlu2 %v477_v9, %s4229_s26  ;;  %v630_v9 = vsel %vm245_vm1, %v485_v54, %v628_v14 }
  0x4f   : > { %500 = vrot.lane.b32.xlu1 %v499_v23, %s4221_s21  ;;  %489 = vrot.lane.b32.xlu0 %v488_v15, %s4231_s23  ;;  %v4288_v23 = vrot.slane %v2536_v35, 6  ;;  %v632_v0 = vsel %vm248_vm2, %v487_v43, %v630_v9  ;;  %v822_v35 = vrot.slane %v2923_v22, 5 }
  0x50   : > { %252 = vst.msk [vmem:[#allocation2] sm:$0xf] %vm4262_vm6, %v632_v0 }
  0x51   : > { %v590_v15 = vsel %vm4253_vm5, %v4288_v23, %v588_v16  ;;  %v865_v16 = vrot.slane %v2923_v22, 1 }
  0x56   : > { %511 = vrot.lane.b32.xlu2 %v510_v52, %s4223_s28 }
  0x57   : > { %538 = vrot.lane.b32.xlu1 %v537_v5, %s4233_s19  ;;  %522 = vrot.lane.b32.xlu0 %v521_v46, %s4227_s27  ;;  %s4260_s19 = smov 78  }
  0x5e   : > { %549 = vrot.lane.b32.xlu2 %v548_v29, %s2347_s18 }
  0x5f   : > { %571 = vrot.lane.b32.xlu1 %v570_v3, %s4229_s26  ;;  %560 = vrot.lane.b32.xlu0 %v559_v62, %s4225_s11  ;;  %s2357_s11 = smov 46   ;;  %s4251_s26 = smov 110  }
  0x66   : > { %581 = vrot.lane.b32.xlu2 %v580_v30, %s4231_s23  ;;  %s4256_s23 = smov 94  }
  0x67   : > { %601 = vrot.lane.b32.xlu1 %v600_v63, %s4223_s28  ;;  %591 = vrot.lane.b32.xlu0 %v590_v15, %s4221_s21  ;;  %s2355_s21 = smov 126   ;;  %s2356_s28 = smov 62   ;;  %v3034_v63 = vld [vmem:[%s2443_s30 + $0x21] sm:$0xff] }
  0x68   : > { %v4242_v1 = vrot.slane %v3034_v63, 6 }
  0x6e   : > { %611 = vrot.lane.b32.xlu2 %v610_v2, %s4227_s27  ;;  %s2358_s27 = smov 30   ;;  %v4238_v2 = vrot.slane %v3034_v63, 5 }
  0x6f   : > { %643 = vrot.lane.b32.xlu1 %v2489_v19, %s2354_s29  ;;  %633 = vrot.lane.b32.xlu0 %v632_v0, %s2355_s21  ;;  %v720_v19 = vsel %vm248_vm2, %v579_v57, %v718_v32 }
  0x70   : > { %345 = vst.msk [vmem:[#allocation2 + $0x8] sm:$0xf] %vm4262_vm6, %v720_v19 }
  0x76   : > { %653 = vrot.lane.b32.xlu2 %v2533_v34, %s2358_s27  ;;  %v2929_v34 = vld [vmem:[%s2443_s30 + $0x31] sm:$0xff] }
  0x77   : > { %674 = vrot.lane.b32.xlu1 %v2528_v33, %s2356_s28  ;;  %663 = vrot.lane.b32.xlu0 %v2484_v18, %s2357_s11  ;;  %v2926_v33 = vld [vmem:[%s2443_s30 + $0x19] sm:$0xff]  ;;  %v857_v21 = vrot.slane %v2929_v34, 6  ;;  %v847_v52 = vrot.slane %v2929_v34, 5  ;;  %v836_v49 = vrot.slane %v2929_v34, 4  ;;  %v888_v11 = vrot.slane %v2929_v34, 1 }
  0x78   : > { %v855_v50 = vrot.slane %v2926_v33, 7  ;;  %v834_v26 = vrot.slane %v2926_v33, 5  ;;  %v886_v45 = vrot.slane %v2926_v33, 2  ;;  %v876_v42 = vrot.slane %v2926_v33, 1 }
  0x79   : > { %v867_v8 = vrot.slane %v2929_v34, 7  ;;  %v866_v0 = vsel %vm434_vm3, %v2926_v33, %v865_v16 }
  0x7a   : > { %v835_v56 = vsel %vm434_vm3, %v834_v26, %v833_v61  ;;  %v887_v7 = vsel %vm434_vm3, %v886_v45, %v885_v38  ;;  %v877_v57 = vsel %vm434_vm3, %v876_v42, %v875_v53 }
  0x7b   : > { %v889_v9 = vsel %vm437_vm4, %v888_v11, %v887_v7  ;;  %v878_v31 = vsel %vm437_vm4, %v2929_v34, %v877_v57  ;;  %v961_v57 = vrot.slane %v3029_v60, 2 }
  0x7e   : > { %685 = vrot.lane.b32.xlu2 %v2577_v51, %s4260_s19 }
  0x7f   : > { %707 = vrot.lane.b32.xlu1 %v2595_v59, %s4251_s26  ;;  %696 = vrot.lane.b32.xlu0 %v2618_v20, %s4256_s23  ;;  %v823_v59 = vrot.slane %v2926_v33, 4  ;;  %v2935_v20 = vld [vmem:[%s2443_s30 + $0x49] sm:$0xff] }
  0x80   : > { %v306_v18 = vpop.permute.xlu2 %305  ;;  %v827_v54 = vrot.slane %v2935_v20, 2  ;;  %v859_v47 = vrot.slane %v2935_v20, 5  ;;  %v849_v48 = vrot.slane %v2935_v20, 4  ;;  %v838_v36 = vrot.slane %v2935_v20, 3 }
  0x81   : > { %v879_v15 = vrot.slane %v2935_v20, 7  ;;  %v869_v28 = vrot.slane %v2935_v20, 6  ;;  %v890_v32 = vsel %vm4253_vm5, %v2935_v20, %v889_v9 }
  0x86   : > { %721 = vrot.lane.b32.xlu2 %v720_v19, %s2355_s21  ;;  %v880_v19 = vsel %vm4253_vm5, %v879_v15, %v878_v31 }
  0x87   : > { %741 = vrot.lane.b32.xlu1 %v2672_v41, %s2358_s27  ;;  %731 = vrot.lane.b32.xlu0 %v2590_v58, %s2354_s29  ;;  %v825_v41 = vrot.slane %v2929_v34, 3  ;;  %v824_v58 = vsel %vm434_vm3, %v823_v59, %v822_v35 }
  0x88   : > { %v318_v51 = vpop.permute.xlu2 %317 }
  0x89   : > { %v826_v46 = vsel %vm437_vm4, %v825_v41, %v824_v58  ;;  %v868_v58 = vsel %vm437_vm4, %v867_v8, %v866_v0 }
  0x8e   : > { %751 = vrot.lane.b32.xlu2 %v2647_v13, %s2357_s11  ;;  %v856_v13 = vsel %vm434_vm3, %v855_v50, %v2923_v22 }
  0x8f   : > { %773 = vrot.lane.b32.xlu1 %v2717_v25, %s4260_s19  ;;  %762 = vrot.lane.b32.xlu0 %v2643_v12, %s2356_s28  ;;  %v845_v25 = vrot.slane %v2926_v33, 6  ;;  %v2960_v12 = vsel %vm4253_vm5, %v827_v54, %v826_v46  ;;  %v858_v55 = vsel %vm437_vm4, %v857_v21, %v856_v13  ;;  %v908_v46 = vrot.slane %v3029_v60, 5  ;;  %s4298_s19 = smov 79  }
  0x90   : > { %v2962_v17 = vpop.permute.xlu2 %362  ;;  %v860_v29 = vsel %vm4253_vm5, %v859_v47, %v858_v55  ;;  %v932_v13 = vsel %vm434_vm3, %v4242_v1, %v930_v4 }
  0x91   : > { %v282_v43 = vpop.permute.xlu1 %281  ;;  %v260_v5 = vpop.permute.xlu0 %259  ;;  %v846_v44 = vsel %vm434_vm3, %v845_v25, %v844_v6 }
  0x92   : > { %263 = vst.msk [vmem:[#allocation2] sm:$0xf] %vm262_vm7, %v260_v5  ;;  %v4236_v5 = vrot.slane %v3049_v37, 4 }
  0x96   : > { %784 = vrot.lane.b32.xlu2 %v2699_v40, %s4256_s23  ;;  %v837_v40 = vsel %vm437_vm4, %v836_v49, %v835_v56  ;;  %s4296_s23 = smov 111  }
  0x97   : > { %829 = vrot.lane.b32.xlu1 %v2960_v12, %s2340_s5  ;;  %795 = vrot.lane.b32.xlu0 %v2694_v27, %s4251_s26  ;;  %v848_v27 = vsel %vm437_vm4, %v847_v52, %v846_v44  ;;  %v3039_v23 = vsel %vm4253_vm5, %v838_v36, %v837_v40  ;;  %v921_v44 = vsel %vm434_vm3, %v4238_v2, %v4239_v39  ;;  %v971_v2 = vrot.slane %v3029_v60, 3  ;;  %s4294_s26 = smov 47  }
  0x98   : > { %v850_v24 = vsel %vm4253_vm5, %v849_v48, %v848_v27  ;;  %v395_v10 = vpop.permute.xlu2 %394  ;;  %v911_v27 = vrot.slane %v3049_v37, 3  ;;  %v923_v40 = vsel %vm437_vm4, %v4236_v5, %v921_v44  ;;  %v972_v39 = vrot.slane %v3034_v63, 2 }
  0x99   : > { %v294_v3 = vpop.permute.xlu1 %293  ;;  %v271_v62 = vpop.permute.xlu0 %270 }
  0x9a   : > { %274 = vst.msk [vmem:[#allocation2] sm:$0xf] %vm273_vm8, %v271_v62 }
  0x9b   : > { %285 = vst.msk [vmem:[#allocation2] sm:$0xf] %vm4248_vm9, %v282_v43  ;;  %v4241_v43 = vrot.slane %v3049_v37, 5 }
  0x9c   : > { %297 = vst.msk [vmem:[#allocation2] sm:$0xf] %vm4247_vm10, %v294_v3  ;;  %v870_v3 = vsel %vm4253_vm5, %v869_v28, %v868_v58  ;;  %v941_v58 = vrot.slane %v3034_v63, 7 }
  0x9d   : > { %309 = vst.msk [vmem:[#allocation2] sm:$0xf] %vm4246_vm11, %v306_v18  ;;  %v3072_v18 = vld [vmem:[%s2443_s30 + $0x51] sm:$0xff] }
  0x9e   : > { %321 = vst.msk [vmem:[#allocation2] sm:$0xf] %vm4243_vm12, %v318_v51  ;;  %840 = vrot.lane.b32.xlu2 %v3039_v23, %s2342_s7  ;;  %v4237_v62 = vrot.slane %v3072_v18, 4  ;;  %v4235_v55 = vrot.slane %v3072_v18, 3  ;;  %v913_v9 = vrot.slane %v3072_v18, 2  ;;  %v945_v5 = vrot.slane %v3072_v18, 5 }
  0x9f   : > { %861 = vrot.lane.b32.xlu1 %v860_v29, %s4258_s6  ;;  %851 = vrot.lane.b32.xlu0 %v850_v24, %s2339_s4  ;;  %v934_v24 = vsel %vm437_vm4, %v4241_v43, %v932_v13 }
  0xa0   : > { %v443_v51 = vpop.permute.xlu2 %442  ;;  %v3122_v31 = vsel %vm4253_vm5, %v4237_v62, %v934_v24  ;;  %v3127_v0 = vsel %vm4253_vm5, %v4235_v55, %v923_v40 }
  0xa1   : > { %v353_v14 = vpop.permute.xlu1 %352  ;;  %v330_v30 = vpop.permute.xlu0 %329  ;;  %446 = vst.msk [vmem:[#allocation2] sm:$0xf0] %vm445_vm14, %v443_v51  ;;  %v953_v51 = vrot.slane %v3049_v37, 7 }
  0xa2   : > { %355 = vst.msk [vmem:[#allocation2 + $0x8] sm:$0xf] %vm262_vm7, %v353_v14  ;;  %v962_v14 = vrot.slane %v3034_v63, 1 }
  0xa3   : > { %333 = vst.msk [vmem:[#allocation2] sm:$0xf] %vm4240_vm13, %v330_v30  ;;  %v951_v30 = vrot.slane %v3029_v60, 1 }
  0xa4   : > { %365 = vst.msk [vmem:[#allocation2 + $0x8] sm:$0xf] %vm273_vm8, %v2962_v17  ;;  %v909_v17 = vrot.slane %v3034_v63, 4 }
  0xa5   : > { %v952_v13 = vsel %vm434_vm3, %v3034_v63, %v951_v30 }
  0xa6   : > { %v910_v7 = vsel %vm434_vm3, %v909_v17, %v908_v46  ;;  %871 = vrot.lane.b32.xlu2 %v870_v3, %s4254_s8  ;;  %v965_v3 = vrot.slane %v3072_v18, 7  ;;  %v954_v55 = vsel %vm437_vm4, %v953_v51, %v952_v13 }
  0xa7   : > { %891 = vrot.lane.b32.xlu1 %v890_v32, %s4249_s9  ;;  %881 = vrot.lane.b32.xlu0 %v880_v19, %s4244_s10  ;;  %v912_v19 = vsel %vm437_vm4, %v911_v27, %v910_v7 }
  0xa8   : > { %v479_v32 = vpop.permute.xlu2 %478  ;;  %v3150_v44 = vsel %vm4253_vm5, %v913_v9, %v912_v19  ;;  %v942_v19 = vsel %vm434_vm3, %v941_v58, %v3029_v60 }
  0xa9   : > { %v384_v56 = vpop.permute.xlu1 %383  ;;  %v373_v29 = vpop.permute.xlu0 %372 }
  0xaa   : > { %375 = vst.msk [vmem:[#allocation2 + $0x8] sm:$0xf] %vm4248_vm9, %v373_v29  ;;  %v943_v29 = vrot.slane %v3049_v37, 6  ;;  %vm4264_vm9 = vcmask 917252  }
  0xab   : > { %386 = vst.msk [vmem:[#allocation2 + $0x8] sm:$0xf] %vm4247_vm10, %v384_v56  ;;  %v955_v56 = vrot.slane %v3072_v18, 6  ;;  %vm4265_vm10 = vcmask 786052  }
  0xac   : > { %397 = vst.msk [vmem:[#allocation2 + $0x8] sm:$0xf] %vm4246_vm11, %v395_v10  ;;  %v963_v10 = vsel %vm434_vm3, %v962_v14, %v961_v57  ;;  %vm4276_vm11 = vcmask 654852  }
  0xad   : > { %v964_v7 = vsel %vm437_vm4, %v3049_v37, %v963_v10  ;;  %v956_v13 = vsel %vm4253_vm5, %v955_v56, %v954_v55 }
  0xae   : > { %915 = vrot.lane.b32.xlu2 %v3150_v44, %s2340_s5  ;;  %v966_v10 = vsel %vm4253_vm5, %v965_v3, %v964_v7  ;;  %v994_v7 = vsel %vm242_vm0, %v855_v50, %v2923_v22 }
  0xaf   : > { %937 = vrot.lane.b32.xlu1 %v3122_v31, %s2339_s4  ;;  %926 = vrot.lane.b32.xlu0 %v3127_v0, %s2342_s7  ;;  %v996_v50 = vsel %vm245_vm1, %v857_v21, %v994_v7  ;;  %v1036_v7 = vrot.slane %v2929_v34, 2 }
  0xb0   : > { %v512_v62 = vpop.permute.xlu2 %511 }
  0xb1   : > { %v417_v24 = vpop.permute.xlu1 %416  ;;  %v406_v40 = vpop.permute.xlu0 %405 }
  0xb2   : > { %408 = vst.msk [vmem:[#allocation2 + $0x8] sm:$0xf] %vm4243_vm12, %v406_v40  ;;  %v944_v40 = vsel %vm437_vm4, %v943_v29, %v942_v19  ;;  %v974_v19 = vrot.slane %v3049_v37, 1  ;;  %vm481_vm12 = vcmask 523652  }
  0xb3   : > { %419 = vst.msk [vmem:[#allocation2 + $0x8] sm:$0xf] %vm4240_vm13, %v417_v24  ;;  %v1004_v24 = vsel %vm242_vm0, %v2926_v33, %v865_v16  ;;  %v946_v55 = vsel %vm4253_vm5, %v945_v5, %v944_v40  ;;  %vm469_vm13 = vcmask 392452   ;;  %v1034_v40 = vrot.slane %v2926_v33, 3 }
  0xb4   : > { %v1006_v16 = vsel %vm245_vm1, %v867_v8, %v1004_v24  ;;  %v998_v8 = vsel %vm248_vm2, %v859_v47, %v996_v50 }
  0xb5   : > { %v1008_v21 = vsel %vm248_vm2, %v869_v28, %v1006_v16  ;;  %v1025_v28 = vsel %vm242_vm0, %v886_v45, %v885_v38  ;;  %v1015_v45 = vsel %vm242_vm0, %v876_v42, %v875_v53  ;;  %v1068_v53 = vsel %vm242_vm0, %v845_v25, %v844_v6 }
  0xb6   : > { %947 = vrot.lane.b32.xlu2 %v946_v55, %s4258_s6  ;;  %v1027_v38 = vsel %vm245_vm1, %v888_v11, %v1025_v28  ;;  %v1057_v42 = vsel %vm242_vm0, %v834_v26, %v833_v61  ;;  %v1070_v6 = vsel %vm245_vm1, %v847_v52, %v1068_v53  ;;  %v1046_v61 = vsel %vm242_vm0, %v823_v59, %v822_v35  ;;  %s4297_s6 = smov 95   ;;  %v3387_v53 = vld [vmem:[%s2443_s30 + $0x3a] sm:$0xff] }
  0xb7   : > { %967 = vrot.lane.b32.xlu1 %v966_v10, %s4244_s10  ;;  %957 = vrot.lane.b32.xlu0 %v956_v13, %s4254_s8  ;;  %v973_v10 = vsel %vm434_vm3, %v972_v39, %v971_v2  ;;  %v1033_v13 = vrot.slane %v2923_v22, 4  ;;  %s4292_s10 = smov 127   ;;  %v1028_v11 = vsel %vm248_vm2, %v2935_v20, %v1027_v38  ;;  %v1059_v25 = vsel %vm245_vm1, %v836_v49, %v1057_v42  ;;  %s4295_s8 = smov 31  }
  0xb8   : > { %v550_v24 = vpop.permute.xlu2 %549  ;;  %v1072_v52 = vsel %vm248_vm2, %v849_v48, %v1070_v6  ;;  %v1061_v26 = vsel %vm248_vm2, %v838_v36, %v1059_v25  ;;  %v1048_v35 = vsel %vm245_vm1, %v825_v41, %v1046_v61  ;;  %v1103_v59 = vsel %vm242_vm0, %v962_v14, %v961_v57  ;;  %v3398_v6 = vld [vmem:[%s2443_s30 + $0xa] sm:$0xff] }
  0xb9   : > { %v467_v43 = vpop.permute.xlu1 %466  ;;  %v455_v1 = vpop.permute.xlu0 %454  ;;  %v1092_v48 = vsel %vm242_vm0, %v3034_v63, %v951_v30  ;;  %v1050_v36 = vsel %vm248_vm2, %v827_v54, %v1048_v35  ;;  %v1082_v14 = vsel %vm242_vm0, %v941_v58, %v3029_v60  ;;  %v1121_v30 = vrot.slane %v3029_v60, 4 }
  0xba   : > { %458 = vst.msk [vmem:[#allocation2] sm:$0xf0] %vm457_vm15, %v455_v1  ;;  %v975_v1 = vsel %vm437_vm4, %v974_v19, %v973_v10  ;;  %v1094_v57 = vsel %vm245_vm1, %v953_v51, %v1092_v48  ;;  %v1122_v54 = vrot.slane %v3034_v63, 3  ;;  %v1817_v25 = vrot.slane %v3387_v53, 6 }
  0xbb   : > { %470 = vst.msk [vmem:[#allocation2] sm:$0xf0] %vm469_vm13, %v467_v43  ;;  %v1035_v43 = vsel %vm242_vm0, %v1034_v40, %v1033_v13  ;;  %v976_v47 = vsel %vm4253_vm5, %v3072_v18, %v975_v1  ;;  %vm4263_vm5 = vcmask 1048452   ;;  %v1096_v58 = vsel %vm248_vm2, %v955_v56, %v1094_v57  ;;  %v3349_v56 = vld [vmem:[%s2443_s30 + $0x1a] sm:$0xff] }
  0xbc   : > { %482 = vst.msk [vmem:[#allocation2] sm:$0xf0] %vm481_vm12, %v479_v32  ;;  %v1038_v32 = vrot.slane %v2935_v20, 1  ;;  %v1037_v50 = vsel %vm245_vm1, %v1036_v7, %v1035_v43  ;;  %v4271_v33 = vrot.slane %v3349_v56, 1 }
  0xbe   : > { %977 = vrot.lane.b32.xlu2 %v976_v47, %s4249_s9  ;;  %v1039_v10 = vsel %vm248_vm2, %v1038_v32, %v1037_v50  ;;  %s4293_s9 = smov 63   ;;  %v1084_v47 = vsel %vm245_vm1, %v943_v29, %v1082_v14  ;;  %v4301_v14 = vrot.slane %v3029_v60, 6  ;;  %v4267_v60 = vrot.slane %v3349_v56, 2 }
  0xbf   : > { %1009 = vrot.lane.b32.xlu1 %v1008_v21, %s2347_s18  ;;  %999 = vrot.lane.b32.xlu0 %v998_v8, %s4292_s10  ;;  %v1016_v8 = vsel %vm245_vm1, %v2929_v34, %v1015_v45  ;;  %v1086_v29 = vsel %vm248_vm2, %v945_v5, %v1084_v47  ;;  %v1113_v5 = vsel %vm242_vm0, %v972_v39, %v971_v2  ;;  %v1825_v47 = vrot.slane %v3398_v6, 1 }
  0xc0   : > { %v582_v21 = vpop.permute.xlu2 %581  ;;  %v1115_v42 = vsel %vm245_vm1, %v974_v19, %v1113_v5  ;;  %v4299_v19 = vrot.slane %v3034_v63, 6  ;;  %v1827_v5 = vrot.slane %v3387_v53, 7 }
  0xc1   : > { %v501_v55 = vpop.permute.xlu1 %500  ;;  %v490_v16 = vpop.permute.xlu0 %489  ;;  %v1116_v35 = vsel %vm248_vm2, %v3072_v18, %v1115_v42  ;;  %v4305_v42 = vrot.slane %v3072_v18, 3 }
  0xc2   : > { %493 = vst.msk [vmem:[#allocation2] sm:$0xf0] %vm4276_vm11, %v490_v16  ;;  %v1134_v16 = vsel %vm242_vm0, %v909_v17, %v908_v46  ;;  %v1126_v46 = vrot.slane %v3072_v18, 1 }
  0xc3   : > { %504 = vst.msk [vmem:[#allocation2] sm:$0xf0] %vm4265_vm10, %v501_v55  ;;  %v1124_v55 = vrot.slane %v3049_v37, 2  ;;  %v1136_v38 = vsel %vm245_vm1, %v911_v27, %v1134_v16  ;;  %v3374_v27 = vld [vmem:[%s2443_s30 + $0x2] sm:$0xff] }
  0xc4   : > { %515 = vst.msk [vmem:[#allocation2] sm:$0xf0] %vm4264_vm9, %v512_v62  ;;  %v1018_v62 = vsel %vm248_vm2, %v879_v15, %v1016_v8  ;;  %v1138_v39 = vsel %vm248_vm2, %v913_v9, %v1136_v38  ;;  %v3401_v9 = vld [vmem:[%s2443_s30 + $0x52] sm:$0xff]  ;;  %v1737_v16 = vrot.slane %v3374_v27, 1  ;;  %v4304_v38 = vrot.slane %v3049_v37, 4 }
  0xc5   : > { %v1543_v20 = vrot.slane %v3374_v27, 4 }
  0xc6   : > { %1019 = vrot.lane.b32.xlu2 %v1018_v62, %s4295_s8 }
  0xc7   : > { %1040 = vrot.lane.b32.xlu1 %v1039_v10, %s4293_s9  ;;  %1029 = vrot.lane.b32.xlu0 %v1028_v11, %s4294_s26  ;;  %v3368_v10 = vld [vmem:[%s2443_s30 + $0x32] sm:$0xff]  ;;  %v1727_v11 = vrot.slane %v3349_v56, 7 }
  0xc8   : > { %v612_v49 = vpop.permute.xlu2 %611 }
  0xc9   : > { %v539_v1 = vpop.permute.xlu1 %538  ;;  %v523_v43 = vpop.permute.xlu0 %522  ;;  %v1728_v61 = vsel %vm242_vm0, %v1727_v11, %v3374_v27 }
  0xca   : > { %541 = vst.msk [vmem:[#allocation2 + $0x8] sm:$0xf0] %vm445_vm14, %v539_v1  ;;  %v3394_v1 = vld [vmem:[%s2443_s30 + $0x4a] sm:$0xff] }
  0xcb   : > { %526 = vst.msk [vmem:[#allocation2] sm:$0xf0] %vm4263_vm5, %v523_v43  ;;  %v1729_v43 = vrot.slane %v3368_v10, 6 }
  0xcc   : > { %552 = vst.msk [vmem:[#allocation2 + $0x8] sm:$0xf0] %vm457_vm15, %v550_v24  ;;  %v1104_v24 = vsel %vm245_vm1, %v3049_v37, %v1103_v59 }
  0xcd   : > { %v1106_v51 = vsel %vm248_vm2, %v965_v3, %v1104_v24  ;;  %v1123_v3 = vsel %vm242_vm0, %v1122_v54, %v1121_v30  ;;  %v4300_v24 = vrot.slane %v3049_v37, 5  ;;  %v4270_v37 = vrot.slane %v3401_v9, 7 }
  0xce   : > { %1051 = vrot.lane.b32.xlu2 %v1050_v36, %s4298_s19  ;;  %v1125_v45 = vsel %vm245_vm1, %v1124_v55, %v1123_v3 }
  0xcf   : > { %1073 = vrot.lane.b32.xlu1 %v1072_v52, %s4296_s23  ;;  %1062 = vrot.lane.b32.xlu0 %v1061_v26, %s4297_s6  ;;  %v1127_v2 = vsel %vm248_vm2, %v1126_v46, %v1125_v45  ;;  %v1156_v52 = vsel %vm242_vm0, %v4299_v19, %v930_v4  ;;  %v1731_v4 = vrot.slane %v3394_v1, 5  ;;  %v1829_v19 = vrot.slane %v3401_v9, 6 }
  0xd0   : > { %v654_v28 = vpop.permute.xlu2 %653  ;;  %v1158_v57 = vsel %vm245_vm1, %v4300_v24, %v1156_v52  ;;  %v1741_v52 = vrot.slane %v3394_v1, 6 }
  0xd1   : > { %v572_v41 = vpop.permute.xlu1 %571  ;;  %v561_v15 = vpop.permute.xlu0 %560 }
  0xd2   : > { %563 = vst.msk [vmem:[#allocation2 + $0x8] sm:$0xf0] %vm469_vm13, %v561_v15  ;;  %v1730_v15 = vsel %vm245_vm1, %v1729_v43, %v1728_v61 }
  0xd3   : > { %574 = vst.msk [vmem:[#allocation2 + $0x8] sm:$0xf0] %vm481_vm12, %v572_v41  ;;  %v3450_v3 = vsel %vm248_vm2, %v1731_v4, %v1730_v15  ;;  %v4275_v15 = vrot.slane %v3374_v27, 2 }
  0xd4   : > { %584 = vst.msk [vmem:[#allocation2 + $0x8] sm:$0xf0] %vm4276_vm11, %v582_v21  ;;  %v3377_v21 = vld [vmem:[%s2443_s30 + $0x22] sm:$0xff] }
  0xd5   : > { %v1815_v62 = vrot.slane %v3377_v21, 7 }
  0xd6   : > { %1087 = vrot.lane.b32.xlu2 %v1086_v29, %s4292_s10  ;;  %v4303_v29 = vrot.slane %v3072_v18, 4  ;;  %v1555_v18 = vrot.slane %v3349_v56, 4 }
  0xd7   : > { %1107 = vrot.lane.b32.xlu1 %v1106_v51, %s4295_s8  ;;  %1097 = vrot.lane.b32.xlu0 %v1096_v58, %s2347_s18  ;;  %v1816_v26 = vsel %vm242_vm0, %v1815_v62, %v3398_v6  ;;  %v4302_v51 = vrot.slane %v3034_v63, 5  ;;  %v1642_v63 = vrot.slane %v3398_v6, 5 }
  0xd8   : > { %v686_v8 = vpop.permute.xlu2 %685  ;;  %v1818_v59 = vsel %vm245_vm1, %v1817_v25, %v1816_v26  ;;  %v815_v26 = vsel %vm434_vm3, %v1034_v40, %v1033_v13  ;;  %v1631_v13 = vrot.slane %v3398_v6, 4  ;;  %v1632_v40 = vrot.slane %v3377_v21, 3 }
  0xd9   : > { %v602_v17 = vpop.permute.xlu1 %601  ;;  %v592_v50 = vpop.permute.xlu0 %591  ;;  %v1145_v58 = vsel %vm242_vm0, %v4302_v51, %v4301_v14  ;;  %v817_v22 = vsel %vm437_vm4, %v1036_v7, %v815_v26  ;;  %v1634_v14 = vrot.slane %v3387_v53, 2 }
  0xda   : > { %594 = vst.msk [vmem:[#allocation2 + $0x8] sm:$0xf0] %vm4265_vm10, %v592_v50  ;;  %v1147_v45 = vsel %vm245_vm1, %v4304_v38, %v1145_v58  ;;  %vm4309_vm10 = vcmask 781952   ;;  %v1633_v51 = vsel %vm434_vm3, %v1632_v40, %v1631_v13  ;;  %v4269_v58 = vrot.slane %v3394_v1, 7 }
  0xdb   : > { %604 = vst.msk [vmem:[#allocation2 + $0x8] sm:$0xf0] %vm4264_vm9, %v602_v17  ;;  %v1160_v17 = vsel %vm248_vm2, %v4303_v29, %v1158_v57  ;;  %v1149_v61 = vsel %vm248_vm2, %v4305_v42, %v1147_v45  ;;  %vm4308_vm9 = vcmask 650752   ;;  %v1636_v29 = vrot.slane %v3401_v9, 1 }
  0xdc   : > { %614 = vst.msk [vmem:[#allocation2 + $0x8] sm:$0xf0] %vm4263_vm5, %v612_v49  ;;  %v1819_v49 = vrot.slane %v3401_v9, 5  ;;  %vm4307_vm5 = vcmask 1047559   ;;  %v1548_v42 = vrot.slane %v3394_v1, 1 }
  0xdd   : > { %v3500_v24 = vsel %vm4307_vm5, %v1038_v32, %v817_v22  ;;  %v1544_v32 = vrot.slane %v3349_v56, 3  ;;  %vm4310_vm5 = vcmask 913152   ;;  %v901_v22 = vsel %vm434_vm3, %v1122_v54, %v1121_v30 }
  0xde   : > { %v1820_v48 = vsel %vm248_vm2, %v1819_v49, %v1818_v59  ;;  %1117 = vrot.lane.b32.xlu2 %v1116_v35, %s4294_s26  ;;  %821 = vst.msk [vmem:[#allocation2 + $0x10] sm:$0xf0] %vm445_vm14, %v3500_v24  ;;  %v1643_v30 = vrot.slane %v3377_v21, 4 }
  0xdf   : > { %1139 = vrot.lane.b32.xlu1 %v1138_v39, %s4298_s19  ;;  %1128 = vrot.lane.b32.xlu0 %v1127_v2, %s4293_s9  ;;  %1456 = vst.msk [vmem:[#allocation2 + $0x38] sm:$0xf] %vm4262_vm6, %v1820_v48  ;;  %v1739_v39 = vrot.slane %v3368_v10, 7  ;;  %v1738_v2 = vsel %vm242_vm0, %v3349_v56, %v1737_v16 }
  0xe0   : > { %v722_v50 = vpop.permute.xlu2 %721 }
  0xe1   : > { %v644_v36 = vpop.permute.xlu1 %643  ;;  %v634_v41 = vpop.permute.xlu0 %633  ;;  %724 = vst.msk [vmem:[#allocation2 + $0x18] sm:$0xf] %vm4262_vm6, %v722_v50 }
  0xe2   : > { %636 = vst.msk [vmem:[#allocation2 + $0x10] sm:$0xf] %vm4262_vm6, %v634_v41  ;;  %v1740_v41 = vsel %vm245_vm1, %v1739_v39, %v1738_v2  ;;  %vm4306_vm6 = vcmask 519552   ;;  %v1545_v2 = vsel %vm434_vm3, %v1544_v32, %v1543_v20 }
  0xe3   : > { %646 = vst.msk [vmem:[#allocation2 + $0x10] sm:$0xf] %vm262_vm7, %v644_v36  ;;  %v1742_v7 = vsel %vm248_vm2, %v1741_v52, %v1740_v41 }
  0xe4   : > { %656 = vst.msk [vmem:[#allocation2 + $0x10] sm:$0xf] %vm273_vm8, %v654_v28  ;;  %v1826_v28 = vsel %vm242_vm0, %v3377_v21, %v1825_v47 }
  0xe5   : > { %v1828_v36 = vsel %vm245_vm1, %v1827_v5, %v1826_v28  ;;  %v1635_v28 = vsel %vm437_vm4, %v1634_v14, %v1633_v51 }
  0xe6   : > { %1150 = vrot.lane.b32.xlu2 %v1149_v61, %s4297_s6  ;;  %v1830_v34 = vsel %vm248_vm2, %v1829_v19, %v1828_v36  ;;  %v1836_v36 = vrot.slane %v3377_v21, 1 }
  0xe7   : > { %1733 = vrot.lane.b32.xlu1 %v3450_v3, %s2355_s21  ;;  %1161 = vrot.lane.b32.xlu0 %v1160_v17, %s4296_s23  ;;  %v1546_v17 = vrot.slane %v3368_v10, 2 }
  0xe8   : > { %v752_v57 = vpop.permute.xlu2 %751 }
  0xe9   : > { %v675_v35 = vpop.permute.xlu1 %674  ;;  %v664_v59 = vpop.permute.xlu0 %663 }
  0xea   : > { %666 = vst.msk [vmem:[#allocation2 + $0x10] sm:$0xf] %vm4306_vm6, %v664_v59  ;;  %vm4311_vm6 = vcmask 1044352   ;;  %v1547_v59 = vsel %vm437_vm4, %v1546_v17, %v1545_v2  ;;  %v4266_v2 = vrot.slane %v3368_v10, 1 }
  0xeb   : > { %677 = vst.msk [vmem:[#allocation2 + $0x10] sm:$0xf] %vm4308_vm9, %v675_v35  ;;  %vm4312_vm9 = vcmask 1047559  }
  0xec   : > { %688 = vst.msk [vmem:[#allocation2 + $0x10] sm:$0xf] %vm4309_vm10, %v686_v8  ;;  %v1749_v8 = vsel %vm242_vm0, %v4271_v33, %v4275_v15  ;;  %v1637_v26 = vsel %vm4312_vm9, %v1636_v29, %v1635_v28  ;;  %vm4313_vm10 = vmmov %vm4312_vm9  ;;  %v1568_v33 = vrot.slane %v3368_v10, 4 }
  0xed   : > { %v1750_v45 = vsel %vm245_vm1, %v3368_v10, %v1749_v8  ;;  %v1549_v41 = vsel %vm4313_vm10, %v1548_v42, %v1547_v59  ;;  %v1554_v59 = vrot.slane %v3374_v27, 5  ;;  %vm4317_vm10 = vcmask 781952  }
  0xee   : > { %1821 = vrot.lane.b32.xlu2 %v1820_v48, %s2355_s21  ;;  %v3547_v61 = vsel %vm248_vm2, %v4269_v58, %v1750_v45  ;;  %v1835_v48 = vrot.slane %v3398_v6, 2  ;;  %v903_v45 = vsel %vm437_vm4, %v1124_v55, %v901_v22  ;;  %v1647_v22 = vrot.slane %v3401_v9, 2 }
  0xef   : > { %1831 = vrot.lane.b32.xlu1 %v1830_v34, %s2354_s29  ;;  %1743 = vrot.lane.b32.xlu0 %v1742_v7, %s2354_s29  ;;  %v1565_v58 = vrot.slane %v3374_v27, 6 }
  0xf0   : > { %v785_v35 = vpop.permute.xlu2 %784 }
  0xf1   : > { %v708_v50 = vpop.permute.xlu1 %707  ;;  %v697_v38 = vpop.permute.xlu0 %696 }
  0xf2   : > { %699 = vst.msk [vmem:[#allocation2 + $0x10] sm:$0xf] %vm4310_vm5, %v697_v38  ;;  %v1837_v38 = vsel %vm242_vm0, %v1836_v36, %v1835_v48  ;;  %vm4314_vm5 = vmmov %vm4312_vm9  ;;  %vm4316_vm9 = vcmask 650752  }
  0xf3   : > { %710 = vst.msk [vmem:[#allocation2 + $0x10] sm:$0xf] %vm4311_vm6, %v708_v50  ;;  %v4268_v50 = vrot.slane %v3374_v27, 3  ;;  %v905_v54 = vsel %vm4314_vm5, %v1126_v46, %v903_v45  ;;  %vm4315_vm6 = vcmask 519552   ;;  %v1838_v28 = vsel %vm245_vm1, %v3387_v53, %v1837_v38 }
  0xf4   : > { %907 = vst.msk [vmem:[#allocation2 + $0x18] sm:$0xf0] %vm445_vm14, %v905_v54  ;;  %vm4318_vm5 = vcmask 913152  }
  0xf5   : > { %v1759_v46 = vsel %vm242_vm0, %v4267_v60, %v4268_v50  ;;  %v4274_v60 = vrot.slane %v3398_v6, 3 }
  0xf6   : > { %1550 = vrot.lane.b32.xlu2 %v1549_v41, %s4292_s10  ;;  %v1840_v41 = vsel %vm248_vm2, %v4270_v37, %v1838_v28  ;;  %v1761_v45 = vsel %vm245_vm1, %v4266_v2, %v1759_v46  ;;  %v1559_v28 = vrot.slane %v3394_v1, 2 }
  0xf7   : > { %1753 = vrot.lane.b32.xlu1 %v3547_v61, %s2358_s27  ;;  %1638 = vrot.lane.b32.xlu0 %v1637_v26, %s4292_s10  ;;  %v1645_v26 = vrot.slane %v3387_v53, 3  ;;  %v3630_v46 = vsel %vm248_vm2, %v3394_v1, %v1761_v45  ;;  %v4272_v45 = vrot.slane %v3387_v53, 1  ;;  %s2279_s10 = scalar_lea.hbm %s4207_s3, 32 }
  0xf8   : > { %v841_v55 = vpop.permute.xlu2 %840 }
  0xf9   : > { %v742_v8 = vpop.permute.xlu1 %741  ;;  %v732_v51 = vpop.permute.xlu0 %731 }
  0xfa   : > { %734 = vst.msk [vmem:[#allocation2 + $0x18] sm:$0xf] %vm262_vm7, %v732_v51 }
  0xfb   : > { %744 = vst.msk [vmem:[#allocation2 + $0x18] sm:$0xf] %vm273_vm8, %v742_v8  ;;  %v1557_v8 = vrot.slane %v3368_v10, 3 }
  0xfc   : > { %754 = vst.msk [vmem:[#allocation2 + $0x18] sm:$0xf] %vm4315_vm6, %v752_v57  ;;  %v1644_v57 = vsel %vm434_vm3, %v1643_v30, %v1642_v63  ;;  %vm4319_vm6 = vcmask 1047559  }
  0xfe   : > { %1841 = vrot.lane.b32.xlu2 %v1840_v41, %s2358_s27 }
  0xff   : > { %1463 = vrot.lane.b32.xlu1 %v1830_v34, %s2340_s5  ;;  %1377 = vrot.lane.b32.xlu0 %v1742_v7, %s2340_s5  ;;  %v1646_v34 = vsel %vm437_vm4, %v1645_v26, %v1644_v57  ;;  %v1556_v7 = vsel %vm434_vm3, %v1555_v18, %v1554_v59  ;;  %s4334_s5 = smov 64  }
 0x100   : > { %v1648_v57 = vsel %vm4319_vm6, %v1647_v22, %v1646_v34  ;;  %v872_v2 = vpop.permute.xlu2 %871 }
 0x101   : > { %v774_v51 = vpop.permute.xlu1 %773  ;;  %v763_v38 = vpop.permute.xlu0 %762 }
 0x102   : > { %765 = vst.msk [vmem:[#allocation2 + $0x18] sm:$0xf] %vm4316_vm9, %v763_v38  ;;  %v1558_v38 = vsel %vm437_vm4, %v1557_v8, %v1556_v7  ;;  %vm4320_vm9 = vmmov %vm4319_vm6 }
 0x103   : > { %776 = vst.msk [vmem:[#allocation2 + $0x18] sm:$0xf] %vm4317_vm10, %v774_v51  ;;  %v4273_v51 = vrot.slane %v3377_v21, 2  ;;  %vm4321_vm10 = vcmask 1044352  }
 0x104   : > { %787 = vst.msk [vmem:[#allocation2 + $0x18] sm:$0xf] %vm4318_vm5, %v785_v35  ;;  %v1560_v35 = vsel %vm4320_vm9, %v1559_v28, %v1558_v38  ;;  %vm4322_vm5 = vcmask 786052   ;;  %vm4323_vm9 = vcmask 917252  }
 0x105   : > { %v1847_v7 = vsel %vm242_vm0, %v4273_v51, %v4274_v60 }
 0x106   : > { %1561 = vrot.lane.b32.xlu2 %v1560_v35, %s2347_s18  ;;  %v1849_v37 = vsel %vm245_vm1, %v4272_v45, %v1847_v7  ;;  %v1654_v45 = vrot.slane %v3377_v21, 5 }
 0x107   : > { %1763 = vrot.lane.b32.xlu1 %v3630_v46, %s2357_s11  ;;  %1649 = vrot.lane.b32.xlu0 %v1648_v57, %s2347_s18  ;;  %v1566_v57 = vrot.slane %v3349_v56, 5 }
 0x108   : > { %v916_v38 = vpop.permute.xlu2 %915 }
 0x109   : > { %v830_v34 = vpop.permute.xlu1 %829  ;;  %v796_v50 = vpop.permute.xlu0 %795  ;;  %918 = vst.msk [vmem:[#allocation2 + $0x18] sm:$0xf0] %vm457_vm15, %v916_v38 }
 0x10a   : > { %832 = vst.msk [vmem:[#allocation2 + $0x10] sm:$0xf0] %vm457_vm15, %v830_v34  ;;  %v1567_v34 = vsel %vm434_vm3, %v1566_v57, %v1565_v58 }
 0x10b   : > { %798 = vst.msk [vmem:[#allocation2 + $0x18] sm:$0xf] %vm4321_vm10, %v796_v50  ;;  %v3673_v50 = vsel %vm248_vm2, %v3401_v9, %v1849_v37  ;;  %v1569_v38 = vsel %vm437_vm4, %v1568_v33, %v1567_v34  ;;  %v1653_v37 = vrot.slane %v3398_v6, 6  ;;  %v1857_v34 = vsel %vm242_vm0, %v1632_v40, %v1631_v13 }
 0x10c   : > { %843 = vst.msk [vmem:[#allocation2 + $0x10] sm:$0xf0] %vm469_vm13, %v841_v55  ;;  %v1570_v55 = vrot.slane %v3394_v1, 3  ;;  %v1859_v51 = vsel %vm245_vm1, %v1634_v14, %v1857_v34  ;;  %vm4324_vm10 = vcmask 1048452   ;;  %v1576_v34 = vrot.slane %v3374_v27, 7 }
 0x10d   : > { %v1655_v40 = vsel %vm434_vm3, %v1654_v45, %v1653_v37  ;;  %v3721_v14 = vsel %vm248_vm2, %v1636_v29, %v1859_v51 }
 0x10e   : > { %1851 = vrot.lane.b32.xlu2 %v3673_v50, %s2357_s11 }
 0x10f   : > { %1272 = vrot.lane.b32.xlu1 %v905_v54, %s2355_s21  ;;  %1184 = vrot.lane.b32.xlu0 %v3500_v24, %s2355_s21  ;;  %v1571_v24 = vsel %vm4319_vm6, %v1570_v55, %v1569_v38  ;;  %s210_s21 = sand.u32 1, %s2321_s13  }
 0x110   : > { %v948_v54 = vpop.permute.xlu2 %947 }
 0x111   : > { %v862_v35 = vpop.permute.xlu1 %861  ;;  %v852_v7 = vpop.permute.xlu0 %851 }
 0x112   : > { %854 = vst.msk [vmem:[#allocation2 + $0x10] sm:$0xf0] %vm481_vm12, %v852_v7 }
 0x113   : > { %864 = vst.msk [vmem:[#allocation2 + $0x10] sm:$0xf0] %vm4276_vm11, %v862_v35  ;;  %v1656_v35 = vrot.slane %v3387_v53, 4 }
 0x114   : > { %874 = vst.msk [vmem:[#allocation2 + $0x10] sm:$0xf0] %vm4322_vm5, %v872_v2  ;;  %v1769_v2 = vsel %vm242_vm0, %v1544_v32, %v1543_v20  ;;  %v1658_v20 = vrot.slane %v3401_v9, 3  ;;  %vm4325_vm5 = vmmov %vm4319_vm6  ;;  %vm4326_vm6 = vcmask 786052  }
 0x115   : > { %v1771_v13 = vsel %vm245_vm1, %v1546_v17, %v1769_v2  ;;  %v1577_v2 = vrot.slane %v3349_v56, 6 }
 0x116   : > { %1387 = vrot.lane.b32.xlu2 %v3547_v61, %s2342_s7  ;;  %v3726_v32 = vsel %vm248_vm2, %v1548_v42, %v1771_v13  ;;  %v1664_v42 = vrot.slane %v3398_v6, 7  ;;  %v1579_v13 = vrot.slane %v3368_v10, 5 }
 0x117   : > { %1572 = vrot.lane.b32.xlu1 %v1571_v24, %s4295_s8  ;;  %1473 = vrot.lane.b32.xlu0 %v1840_v41, %s2342_s7  ;;  %v1657_v41 = vsel %vm437_vm4, %v1656_v35, %v1655_v40  ;;  %v1665_v24 = vrot.slane %v3377_v21, 6  ;;  %s4338_s7 = smov 94  }
 0x118   : > { %v978_v17 = vpop.permute.xlu2 %977  ;;  %v1659_v29 = vsel %vm4325_vm5, %v1658_v20, %v1657_v41  ;;  %v1578_v41 = vsel %vm434_vm3, %v1577_v2, %v1576_v34 }
 0x119   : > { %v892_v7 = vpop.permute.xlu1 %891  ;;  %v882_v38 = vpop.permute.xlu0 %881  ;;  %v1666_v40 = vsel %vm434_vm3, %v1665_v24, %v1664_v42  ;;  %v1580_v15 = vsel %vm437_vm4, %v1579_v13, %v1578_v41  ;;  %v1868_v41 = vsel %vm242_vm0, %v1643_v30, %v1642_v63 }
 0x11a   : > { %884 = vst.msk [vmem:[#allocation2 + $0x10] sm:$0xf0] %vm4323_vm9, %v882_v38  ;;  %v1667_v38 = vrot.slane %v3387_v53, 5 }
 0x11b   : > { %894 = vst.msk [vmem:[#allocation2 + $0x10] sm:$0xf0] %vm4324_vm10, %v892_v7 }
 0x11c   : > { %v1668_v60 = vsel %vm437_vm4, %v1667_v38, %v1666_v40 }
 0x11e   : > { %1660 = vrot.lane.b32.xlu2 %v1659_v29, %s4295_s8  ;;  %v1581_v29 = vrot.slane %v3394_v1, 4  ;;  %s4346_s8 = smov 80  }
 0x11f   : > { %1862 = vrot.lane.b32.xlu1 %v3721_v14, %s2356_s28  ;;  %1774 = vrot.lane.b32.xlu0 %v3726_v32, %s2356_s28 }
 0x120   : > { %v1020_v7 = vpop.permute.xlu2 %1019 }
 0x121   : > { %v938_v61 = vpop.permute.xlu1 %937  ;;  %v927_v51 = vpop.permute.xlu0 %926 }
 0x122   : > { %929 = vst.msk [vmem:[#allocation2 + $0x18] sm:$0xf0] %vm469_vm13, %v927_v51 }
 0x123   : > { %940 = vst.msk [vmem:[#allocation2 + $0x18] sm:$0xf0] %vm481_vm12, %v938_v61 }
 0x124   : > { %950 = vst.msk [vmem:[#allocation2 + $0x18] sm:$0xf0] %vm4276_vm11, %v948_v54  ;;  %v1669_v54 = vrot.slane %v3401_v9, 4  ;;  %vm4327_vm11 = vmmov %vm4325_vm5 }
 0x126   : > { %1195 = vrot.lane.b32.xlu2 %v2960_v12, %s2354_s29 }
 0x127   : > { %1397 = vrot.lane.b32.xlu1 %v3630_v46, %s2339_s4  ;;  %1283 = vrot.lane.b32.xlu0 %v3150_v44, %s2354_s29  ;;  %v1670_v44 = vsel %vm4325_vm5, %v1669_v54, %v1668_v60  ;;  %v1582_v46 = vsel %vm4327_vm11, %v1581_v29, %v1580_v15  ;;  %v1870_v60 = vsel %vm245_vm1, %v1645_v26, %v1868_v41  ;;  %vm4328_vm11 = vcmask 125952  }
 0x128   : > { %v1052_v40 = vpop.permute.xlu2 %1051  ;;  %v1780_v15 = vsel %vm242_vm0, %v1555_v18, %v1554_v59  ;;  %v3804_v63 = vsel %vm248_vm2, %v1647_v22, %v1870_v60  ;;  %vm4333_vm5 = vcmask 781952   ;;  %v1879_v60 = vsel %vm242_vm0, %v1654_v45, %v1653_v37 }
 0x129   : > { %v968_v61 = vpop.permute.xlu1 %967  ;;  %v958_v51 = vpop.permute.xlu0 %957  ;;  %v1782_v26 = vsel %vm245_vm1, %v1557_v8, %v1780_v15  ;;  %v1791_v8 = vsel %vm242_vm0, %v1566_v57, %v1565_v58  ;;  %v3849_v57 = vld [vmem:[%s2443_s30 + $0x1] sm:$0xff]  ;;  %v1598_v45 = vsel %vm434_vm3, %v3349_v56, %v1737_v16 }
 0x12a   : > { %960 = vst.msk [vmem:[#allocation2 + $0x18] sm:$0xf0] %vm4326_vm6, %v958_v51  ;;  %vm4329_vm6 = vmmov %vm4328_vm11  ;;  %v3817_v59 = vsel %vm248_vm2, %v1559_v28, %v1782_v26  ;;  %v1676_v28 = vsel %vm434_vm3, %v1815_v62, %v3398_v6  ;;  %v1588_v62 = vsel %vm434_vm3, %v1727_v11, %v3374_v27 }
 0x12b   : > { %970 = vst.msk [vmem:[#allocation2 + $0x18] sm:$0xf0] %vm4323_vm9, %v968_v61  ;;  %vm4331_vm9 = vcmask 519552   ;;  %v1793_v61 = vsel %vm245_vm1, %v1568_v33, %v1791_v8  ;;  %v1678_v58 = vsel %vm437_vm4, %v1817_v25, %v1676_v28  ;;  %v3976_v28 = vld [vmem:[%s2443_s30 + $0x9] sm:$0xff] }
 0x12c   : > { %980 = vst.msk [vmem:[#allocation2 + $0x18] sm:$0xf0] %vm4324_vm10, %v978_v17  ;;  %vm4332_vm10 = vcmask 650752   ;;  %v3862_v11 = vsel %vm248_vm2, %v1570_v55, %v1793_v61  ;;  %v3882_v55 = vld [vmem:[%s2443_s30 + $0x49] sm:$0xff] }
 0x12d   : > { %v1215_v41 = vrot.slane %v3882_v55, 4 }
 0x12e   : > { %1483 = vrot.lane.b32.xlu2 %v3673_v50, %s2339_s4  ;;  %s4330_s4 = smov 78  }
 0x12f   : > { %1671 = vrot.lane.b32.xlu1 %v1670_v44, %s4294_s26  ;;  %1583 = vrot.lane.b32.xlu0 %v1582_v46, %s4294_s26  ;;  %v1590_v44 = vsel %vm437_vm4, %v1729_v43, %v1588_v62  ;;  %v3871_v46 = vld [vmem:[%s2443_s30 + $0x31] sm:$0xff]  ;;  %s2169_s26 = sshll.u32 %s2329_s15, 4 }
 0x130   : > { %v1088_v30 = vpop.permute.xlu2 %1087  ;;  %s1985_s29 = scalar_lea.hbm %s4207_s3, %s2169_s26 }
 0x131   : > { %v1010_v12 = vpop.permute.xlu1 %1009  ;;  %v1000_v17 = vpop.permute.xlu0 %999  ;;  %1090 = vst.msk [vmem:[#allocation2 + $0x28] sm:$0xf] %vm4329_vm6, %v1088_v30  ;;  %vm4336_vm6 = vcmask 1044352   ;;  %v1881_v30 = vsel %vm245_vm1, %v1656_v35, %v1879_v60  ;;  %v1600_v35 = vsel %vm437_vm4, %v1739_v39, %v1598_v45  ;;  %v1890_v39 = vsel %vm242_vm0, %v1665_v24, %v1664_v42 }
 0x132   : > { %1002 = vst.msk [vmem:[#allocation2 + $0x20] sm:$0xf] %vm4328_vm11, %v1000_v17  ;;  %vm4335_vm11 = vcmask 913152   ;;  %v3910_v37 = vsel %vm248_vm2, %v1658_v20, %v1881_v30  ;;  %v1802_v20 = vsel %vm242_vm0, %v1577_v2, %v1576_v34  ;;  %v1892_v42 = vsel %vm245_vm1, %v1667_v38, %v1890_v39  ;;  %v3951_v34 = vld [vmem:[%s2443_s30 + $0x21] sm:$0xff] }
 0x133   : > { %1012 = vst.msk [vmem:[#allocation2 + $0x20] sm:$0xf] %vm262_vm7, %v1010_v12  ;;  %v1804_v24 = vsel %vm245_vm1, %v1579_v13, %v1802_v20  ;;  %v1309_v2 = vrot.slane %v3951_v34, 7  ;;  %v3960_v38 = vsel %vm248_vm2, %v1669_v54, %v1892_v42 }
 0x134   : > { %1022 = vst.msk [vmem:[#allocation2 + $0x20] sm:$0xf] %vm273_vm8, %v1020_v7 }
 0x135   : > { %v1310_v54 = vsel %vm434_vm3, %v1309_v2, %v3976_v28  ;;  %v4362_v2 = vrot.slane %v3398_v6, 3  ;;  %v4368_v6 = vrot.slane %v3387_v53, 1 }
 0x136   : > { %1785 = vrot.lane.b32.xlu2 %v3817_v59, %s4330_s4 }
 0x137   : > { %1206 = vrot.lane.b32.xlu1 %v3039_v23, %s2358_s27  ;;  %1873 = vrot.lane.b32.xlu0 %v3804_v63, %s4330_s4 }
 0x138   : > { %v1118_v23 = vpop.permute.xlu2 %1117 }
 0x139   : > { %v1041_v18 = vpop.permute.xlu1 %1040  ;;  %v1030_v22 = vpop.permute.xlu0 %1029 }
 0x13a   : > { %1032 = vst.msk [vmem:[#allocation2 + $0x20] sm:$0xf] %vm4331_vm9, %v1030_v22  ;;  %vm4337_vm9 = vcmask 1047559  }
 0x13b   : > { %1043 = vst.msk [vmem:[#allocation2 + $0x20] sm:$0xf] %vm4332_vm10, %v1041_v18  ;;  %v1680_v25 = vsel %vm4337_vm9, %v1819_v49, %v1678_v58  ;;  %vm4339_vm10 = vmmov %vm4337_vm9 }
 0x13c   : > { %1054 = vst.msk [vmem:[#allocation2 + $0x20] sm:$0xf] %vm4333_vm5, %v1052_v40  ;;  %v1592_v49 = vsel %vm4339_vm10, %v1731_v4, %v1590_v44  ;;  %vm4340_vm5 = vcmask 519552   ;;  %vm4344_vm10 = vcmask 781952   ;;  %v1697_v44 = vsel %vm434_vm3, %v1836_v36, %v1835_v48 }
 0x13d   : > { %v1319_v36 = vrot.slane %v3976_v28, 1 }
 0x13e   : > { %1294 = vrot.lane.b32.xlu2 %v3127_v0, %s2358_s27  ;;  %v1213_v0 = vrot.slane %v3871_v46, 5 }
 0x13f   : > { %1494 = vrot.lane.b32.xlu1 %v3721_v14, %s4334_s5  ;;  %1408 = vrot.lane.b32.xlu0 %v3726_v32, %s4334_s5  ;;  %v1210_v14 = vrot.slane %v3849_v57, 7  ;;  %v3853_v32 = vld [vmem:[%s2443_s30 + $0x19] sm:$0xff] }
 0x140   : > { %v1211_v33 = vrot.slane %v3853_v32, 6  ;;  %v1151_v51 = vpop.permute.xlu2 %1150  ;;  %v1221_v8 = vrot.slane %v3853_v32, 7 }
 0x141   : > { %v1074_v50 = vpop.permute.xlu1 %1073  ;;  %v1063_v7 = vpop.permute.xlu0 %1062 }
 0x142   : > { %1065 = vst.msk [vmem:[#allocation2 + $0x20] sm:$0xf] %vm4335_vm11, %v1063_v7  ;;  %v1212_v40 = vsel %vm434_vm3, %v1211_v33, %v1210_v14  ;;  %vm4341_vm11 = vmmov %vm4337_vm9  ;;  %vm4343_vm9 = vcmask 650752   ;;  %v1223_v7 = vrot.slane %v3871_v46, 6  ;;  %v1222_v14 = vsel %vm434_vm3, %v1221_v8, %v3849_v57 }
 0x143   : > { %1076 = vst.msk [vmem:[#allocation2 + $0x20] sm:$0xf] %vm4336_vm6, %v1074_v50  ;;  %v1214_v17 = vsel %vm437_vm4, %v1213_v0, %v1212_v40  ;;  %vm4342_vm6 = vcmask 125952   ;;  %vm4350_vm1 = vmmov %vm4341_vm11  ;;  %v4352_v0 = vrot.slane %v3374_v27, 2  ;;  %v4353_v40 = vrot.slane %v3349_v56, 1 }
 0x144   : > { %v1216_v4 = vsel %vm4341_vm11, %v1215_v41, %v1214_v17  ;;  %1370 = vst.msk [vmem:[#allocation2 + $0x30] sm:$0xf] %vm4342_vm6, %v3450_v3  ;;  %v1686_v3 = vsel %vm434_vm3, %v3377_v21, %v1825_v47  ;;  %vm4347_vm0 = vmmov %vm4342_vm6  ;;  %v3965_v47 = vsel %vm248_vm2, %v1581_v29, %v1804_v24  ;;  %v3988_v29 = vld [vmem:[%s2443_s30 + $0x51] sm:$0xff]  ;;  %v1698_v17 = vsel %vm437_vm4, %v3387_v53, %v1697_v44 }
 0x145   : > { %v1313_v50 = vrot.slane %v3988_v29, 5  ;;  %vm4351_vm2 = vmmov %vm4350_vm1 }
 0x146   : > { %1593 = vrot.lane.b32.xlu2 %v1592_v49, %s4293_s9  ;;  %v1609_v49 = vsel %vm434_vm3, %v4353_v40, %v4352_v0 }
 0x147   : > { %1796 = vrot.lane.b32.xlu1 %v3862_v11, %s4338_s7  ;;  %1681 = vrot.lane.b32.xlu0 %v1680_v25, %s4293_s9  ;;  %s4349_s9 = smov 110   ;;  %v1610_v48 = vsel %vm437_vm4, %v3368_v10, %v1609_v49 }
 0x148   : > { %v1822_v15 = vpop.permute.xlu2 %1821 }
 0x149   : > { %v1108_v43 = vpop.permute.xlu1 %1107  ;;  %v1098_v12 = vpop.permute.xlu0 %1097  ;;  %1824 = vst.msk [vmem:[#allocation2 + $0x48] sm:$0xf] %vm4342_vm6, %v1822_v15  ;;  %vm4360_vm6 = vcmask 519552  }
 0x14a   : > { %1100 = vst.msk [vmem:[#allocation2 + $0x28] sm:$0xf] %vm262_vm7, %v1098_v12 }
 0x14b   : > { %1110 = vst.msk [vmem:[#allocation2 + $0x28] sm:$0xf] %vm273_vm8, %v1108_v43 }
 0x14c   : > { %1120 = vst.msk [vmem:[#allocation2 + $0x28] sm:$0xf] %vm4340_vm5, %v1118_v23  ;;  %vm4345_vm5 = vcmask 913152   ;;  %v3971_v23 = vld [vmem:[%s2443_s30 + $0x39] sm:$0xff]  ;;  %s4354_s30 = smov 96  }
 0x14d   : > { %v1321_v45 = vrot.slane %v3971_v23, 7 }
 0x14e   : > { %1884 = vrot.lane.b32.xlu2 %v3910_v37, %s4338_s7 }
 0x14f   : > { %1305 = vrot.lane.b32.xlu1 %v3122_v31, %s2357_s11  ;;  %1217 = vrot.lane.b32.xlu0 %v1216_v4, %s2357_s11  ;;  %v1602_v31 = vsel %vm4341_vm11, %v1741_v52, %v1600_v35  ;;  %v4358_v4 = vrot.slane %v3394_v1, 7  ;;  %vm4359_vm11 = vmmov %vm4350_vm1  ;;  %v1323_v35 = vrot.slane %v3988_v29, 6 }
 0x150   : > { %v1551_v16 = vpop.permute.xlu2 %1550 }
 0x151   : > { %v1140_v26 = vpop.permute.xlu1 %1139  ;;  %v1129_v18 = vpop.permute.xlu0 %1128  ;;  %1553 = vst.msk [vmem:[#allocation2 + $0x30] sm:$0xf0] %vm445_vm14, %v1551_v16  ;;  %v1612_v15 = vsel %vm4359_vm11, %v4358_v4, %v1610_v48  ;;  %v1340_v48 = vrot.slane %v3951_v34, 2  ;;  %vm4376_vm11 = vmmov %vm4360_vm6 }
 0x152   : > { %1131 = vst.msk [vmem:[#allocation2 + $0x28] sm:$0xf] %vm4343_vm9, %v1129_v18  ;;  %vm4348_vm9 = vcmask 1044352   ;;  %v1320_v18 = vsel %vm434_vm3, %v3951_v34, %v1319_v36 }
 0x153   : > { %1142 = vst.msk [vmem:[#allocation2 + $0x28] sm:$0xf] %vm4344_vm10, %v1140_v26  ;;  %vm4355_vm10 = vmmov %vm4350_vm1  ;;  %v1231_v26 = vrot.slane %v3849_v57, 1  ;;  %v1322_v20 = vsel %vm437_vm4, %v1321_v45, %v1320_v18 }
 0x154   : > { %1153 = vst.msk [vmem:[#allocation2 + $0x28] sm:$0xf] %vm4345_vm5, %v1151_v51  ;;  %v1224_v51 = vsel %vm437_vm4, %v1223_v7, %v1222_v14  ;;  %vm4357_vm5 = vmmov %vm4350_vm1  ;;  %v4369_v7 = vrot.slane %v3368_v10, 1  ;;  %v1254_v14 = vrot.slane %v3871_v46, 1 }
 0x156   : > { %1419 = vrot.lane.b32.xlu2 %v3817_v59, %s4346_s8  ;;  %v1311_v59 = vrot.slane %v3971_v23, 6 }
 0x157   : > { %1603 = vrot.lane.b32.xlu1 %v1602_v31, %s4298_s19  ;;  %1505 = vrot.lane.b32.xlu0 %v3804_v63, %s4346_s8  ;;  %v1688_v63 = vsel %vm437_vm4, %v1827_v5, %v1686_v3  ;;  %v1233_v31 = vrot.slane %v3871_v46, 7  ;;  %s1970_s8 = scalar_lea.sflag [#allocation4], %s210_s21 }
 0x158   : > { %v1842_v13 = vpop.permute.xlu2 %1841  ;;  %v1690_v5 = vsel %vm4350_vm1, %v1829_v19, %v1688_v63  ;;  %v1312_v62 = vsel %vm437_vm4, %v1311_v59, %v1310_v54  ;;  %v1225_v19 = vrot.slane %v3882_v55, 5  ;;  %v4364_v59 = vrot.slane %v3374_v27, 3 }
 0x159   : > { %v1734_v52 = vpop.permute.xlu1 %1733  ;;  %v1162_v22 = vpop.permute.xlu0 %1161  ;;  %v1314_v33 = vsel %vm4351_vm2, %v1313_v50, %v1312_v62 }
 0x15a   : > { %1736 = vst.msk [vmem:[#allocation2 + $0x40] sm:$0xf] %vm4347_vm0, %v1734_v52  ;;  %v1226_v41 = vsel %vm4355_vm10, %v1225_v19, %v1224_v51  ;;  %v1232_v52 = vsel %vm434_vm3, %v3853_v32, %v1231_v26  ;;  %vm4361_vm0 = vmmov %vm4350_vm1  ;;  %v1241_v19 = vrot.slane %v3849_v57, 2 }
 0x15b   : > { %1164 = vst.msk [vmem:[#allocation2 + $0x28] sm:$0xf] %vm4348_vm9, %v1162_v22  ;;  %v1235_v22 = vrot.slane %v3882_v55, 6  ;;  %v1324_v42 = vsel %vm4361_vm0, %v1323_v35, %v1322_v20  ;;  %v1234_v3 = vsel %vm437_vm4, %v1233_v31, %v1232_v52  ;;  %vm4370_vm9 = vmmov %vm4360_vm6 }
 0x15c   : > { %vm4371_vm1 = vmmov %vm4361_vm0 }
 0x15d   : > { %vm4372_vm2 = vmmov %vm4361_vm0 }
 0x15e   : > { %1691 = vrot.lane.b32.xlu2 %v1690_v5, %s4298_s19  ;;  %vm4373_vm10 = vmmov %vm4361_vm0 }
 0x15f   : > { %1895 = vrot.lane.b32.xlu1 %v3960_v38, %s4349_s9  ;;  %1807 = vrot.lane.b32.xlu0 %v3965_v47, %s4349_s9 }
 0x160   : > { %v1562_v25 = vpop.permute.xlu2 %1561 }
 0x161   : > { %v1832_v61 = vpop.permute.xlu1 %1831  ;;  %v1744_v58 = vpop.permute.xlu0 %1743  ;;  %1564 = vst.msk [vmem:[#allocation2 + $0x30] sm:$0xf0] %vm457_vm15, %v1562_v25 }
 0x162   : > { %1834 = vst.msk [vmem:[#allocation2 + $0x48] sm:$0xf] %vm262_vm7, %v1832_v61  ;;  %v1329_v61 = vrot.slane %v3976_v28, 2 }
 0x163   : > { %1746 = vst.msk [vmem:[#allocation2 + $0x40] sm:$0xf] %vm262_vm7, %v1744_v58  ;;  %v1330_v58 = vrot.slane %v3951_v34, 1 }
 0x164   : > { %1844 = vst.msk [vmem:[#allocation2 + $0x48] sm:$0xf] %vm273_vm8, %v1842_v13  ;;  %v4363_v13 = vrot.slane %v3377_v21, 2 }
 0x165   : > { %v1331_v51 = vsel %vm434_vm3, %v1330_v58, %v1329_v61 }
 0x166   : > { %1227 = vrot.lane.b32.xlu2 %v1226_v41, %s2356_s28  ;;  %v1707_v63 = vsel %vm434_vm3, %v4363_v13, %v4362_v2  ;;  %v1332_v40 = vsel %vm437_vm4, %v3971_v23, %v1331_v51 }
 0x167   : > { %1430 = vrot.lane.b32.xlu1 %v3862_v11, %s4354_s30  ;;  %1315 = vrot.lane.b32.xlu0 %v1314_v33, %s2356_s28  ;;  %v4356_v11 = vrot.slane %v3401_v9, 7  ;;  %v1709_v21 = vsel %vm437_vm4, %v4368_v6, %v1707_v63  ;;  %v1242_v33 = vrot.slane %v3853_v32, 1 }
 0x168   : > { %v1852_v30 = vpop.permute.xlu2 %1851  ;;  %v1710_v53 = vsel %vm4371_vm1, %v3401_v9, %v1709_v21  ;;  %v1333_v9 = vrot.slane %v3988_v29, 7 }
 0x169   : > { %v1754_v43 = vpop.permute.xlu1 %1753  ;;  %v1639_v12 = vpop.permute.xlu0 %1638  ;;  %v1700_v60 = vsel %vm4357_vm5, %v4356_v11, %v1698_v17  ;;  %1854 = vst.msk [vmem:[#allocation2 + $0x48] sm:$0xf] %vm4360_vm6, %v1852_v30  ;;  %vm4374_vm5 = vmmov %vm4361_vm0  ;;  %v1339_v17 = vrot.slane %v3976_v28, 3 }
 0x16a   : > { %1756 = vst.msk [vmem:[#allocation2 + $0x40] sm:$0xf] %vm273_vm8, %v1754_v43  ;;  %v1334_v41 = vsel %vm4374_vm5, %v1333_v9, %v1332_v40  ;;  %vm4377_vm6 = vmmov %vm4361_vm0 }
 0x16b   : > { %1641 = vst.msk [vmem:[#allocation2 + $0x38] sm:$0xf0] %vm445_vm14, %v1639_v12 }
 0x16e   : > { %1516 = vrot.lane.b32.xlu2 %v3910_v37, %s4354_s30  ;;  %v4365_v37 = vrot.slane %v3349_v56, 2  ;;  %v1251_v56 = vrot.slane %v3849_v57, 3  ;;  %v1243_v57 = vsel %vm434_vm3, %v1242_v33, %v1241_v19 }
 0x16f   : > { %1701 = vrot.lane.b32.xlu1 %v1700_v60, %s4297_s6  ;;  %1613 = vrot.lane.b32.xlu0 %v1612_v15, %s4297_s6  ;;  %s4366_s6 = smov 112   ;;  %v1244_v12 = vsel %vm437_vm4, %v3871_v46, %v1243_v57  ;;  %v1341_v60 = vsel %vm434_vm3, %v1340_v48, %v1339_v17  ;;  %v1902_v57 = vld [vmem:[#allocation2 + $0x10] sm:$0xff] }
 0x170   : > { %v1388_v24 = vpop.permute.xlu2 %1387  ;;  %v1619_v8 = vsel %vm434_vm3, %v4365_v37, %v4364_v59 }
 0x171   : > { %v1464_v16 = vpop.permute.xlu1 %1463  ;;  %v1378_v39 = vpop.permute.xlu0 %1377  ;;  %v1621_v27 = vsel %vm437_vm4, %v4369_v7, %v1619_v8 }
 0x172   : > { %1466 = vst.msk [vmem:[#allocation2 + $0x38] sm:$0xf] %vm262_vm7, %v1464_v16  ;;  %v1622_v10 = vsel %vm4372_vm2, %v3394_v1, %v1621_v27 }
 0x173   : > { %1380 = vst.msk [vmem:[#allocation2 + $0x30] sm:$0xf] %vm262_vm7, %v1378_v39  ;;  %vm4367_vm7 = vmmov %vm4361_vm0 }
 0x174   : > { %1390 = vst.msk [vmem:[#allocation2 + $0x30] sm:$0xf] %vm273_vm8, %v1388_v24  ;;  %v1236_v54 = vsel %vm4367_vm7, %v1235_v22, %v1234_v3  ;;  %vm4380_vm7 = vcmask 781952  }
 0x176   : > { %1237 = vrot.lane.b32.xlu2 %v1236_v54, %s4330_s4 }
 0x177   : > { %1441 = vrot.lane.b32.xlu1 %v3965_v47, %s4366_s6  ;;  %1325 = vrot.lane.b32.xlu0 %v1324_v42, %s4330_s4  ;;  %v1252_v47 = vrot.slane %v3853_v32, 2  ;;  %v1245_v32 = vrot.slane %v3882_v55, 7 }
 0x178   : > { %v1661_v62 = vpop.permute.xlu2 %1660 }
 0x179   : > { %v1764_v5 = vpop.permute.xlu1 %1763  ;;  %v1650_v50 = vpop.permute.xlu0 %1649  ;;  %v1253_v25 = vsel %vm434_vm3, %v1252_v47, %v1251_v56 }
 0x17a   : > { %1766 = vst.msk [vmem:[#allocation2 + $0x40] sm:$0xf] %vm4370_vm9, %v1764_v5  ;;  %v1255_v0 = vsel %vm437_vm4, %v1254_v14, %v1253_v25  ;;  %v2362_v14 = vmov 0  }
 0x17b   : > { %1652 = vst.msk [vmem:[#allocation2 + $0x38] sm:$0xf0] %vm457_vm15, %v1650_v50  ;;  %v1256_v49 = vsel %vm4373_vm10, %v3882_v55, %v1255_v0  ;;  %v1342_v55 = vrot.slane %v3971_v23, 1  ;;  %vm4387_vm10 = vmmov %vm4380_vm7  ;;  %2250 = vset.pattern.permute.xlu0 %v2362_v14 }
 0x17c   : > { %1663 = vst.msk [vmem:[#allocation2 + $0x38] sm:$0xf0] %vm469_vm13, %v1661_v62  ;;  %v1910_v62 = vld [vmem:[%s4206_s2] sm:$0xff] }
 0x17d   : > { %v1343_v34 = vsel %vm437_vm4, %v1342_v55, %v1341_v60  ;;  %vm4382_vm4 = vcmask 654852  }
 0x17e   : > { %1527 = vrot.lane.b32.xlu2 %v3960_v38, %s4366_s6  ;;  %v1344_v28 = vsel %vm4377_vm6, %v3988_v29, %v1343_v34 }
 0x17f   : > { %1711 = vrot.lane.b32.xlu1 %v1710_v53, %s4296_s23  ;;  %1623 = vrot.lane.b32.xlu0 %v1622_v10, %s4296_s23  ;;  %s2110_s23 = sshll.u32 %s210_s21, 4 }
 0x180   : > { %v1196_v43 = vpop.permute.xlu2 %1195  ;;  %s212_s4 = scalar_lea.vmem [#allocation3], %s2110_s23 }
 0x181   : > { %v1273_v1 = vpop.permute.xlu1 %1272  ;;  %v1185_v44 = vpop.permute.xlu0 %1184  ;;  %s1987_s5 = sshll.u32 %s212_s4, 4  ;;  %s1988_s5 = int_to_ptr.vmem [resolvable:$true] %s1987_s5 }
 0x182   : > { %1275 = vst.msk [vmem:[#allocation2 + $0x28] sm:$0xf0] %vm445_vm14, %v1273_v1 }
 0x183   : > { %1187 = vst.msk [vmem:[#allocation2 + $0x20] sm:$0xf0] %vm445_vm14, %v1185_v44  ;;  %vm4375_vm14 = vmmov %vm4361_vm0  ;;  %vm4378_vm0 = vcmask 650752  }
 0x184   : > { %1198 = vst.msk [vmem:[#allocation2 + $0x20] sm:$0xf0] %vm457_vm15, %v1196_v43  ;;  %v1246_v38 = vsel %vm4375_vm14, %v1245_v32, %v1244_v12  ;;  %vm4379_vm3 = vmmov %vm4378_vm0  ;;  %v1899_v32 = vld [vmem:[%s4205_s1] sm:$0xff]  ;;  %v1901_v43 = vld [vmem:[#allocation2 + $0x8] sm:$0xff] }
 0x185   : > { %vm4385_vm1 = vmmov %vm4378_vm0 }
 0x186   : > { %1247 = vrot.lane.b32.xlu2 %v1246_v38, %s4338_s7  ;;  %vm4386_vm2 = vmmov %vm4378_vm0 }
 0x187   : > { %1257 = vrot.lane.b32.xlu1 %v1256_v49, %s4349_s9  ;;  %1335 = vrot.lane.b32.xlu0 %v1334_v41, %s4338_s7  ;;  %vm4389_vm14 = vmmov %vm4382_vm4  ;;  %v1903_v49 = vld [vmem:[#allocation2 + $0x18] sm:$0xff]  ;;  %v1900_v41 = vld [vmem:[#allocation2] sm:$0xff]  ;;  %s1989_s7 = sshll.u32 %s1985_s29, 4  ;;  %s1990_s7 = int_to_ptr.hbm [resolvable:$true] %s1989_s7 }
 0x188   : > { %v1484_v46 = vpop.permute.xlu2 %1483 }
 0x189   : > { %v1573_v36 = vpop.permute.xlu1 %1572  ;;  %v1474_v11 = vpop.permute.xlu0 %1473 }
 0x18a   : > { %1575 = vst.msk [vmem:[#allocation2 + $0x30] sm:$0xf0] %vm469_vm13, %v1573_v36 }
 0x18b   : > { %1476 = vst.msk [vmem:[#allocation2 + $0x38] sm:$0xf] %vm273_vm8, %v1474_v11  ;;  %vm4381_vm8 = vmmov %vm4370_vm9 }
 0x18c   : > { %1486 = vst.msk [vmem:[#allocation2 + $0x38] sm:$0xf] %vm4376_vm11, %v1484_v46  ;;  %vm4383_vm9 = vmmov %vm4380_vm7 }
 0x18d   : > { %vm4391_vm11 = vmmov %vm4382_vm4 }
 0x18e   : > { %1345 = vrot.lane.b32.xlu2 %v1344_v28, %s4349_s9  ;;  %s2273_s9 = sshra.s32 %s1990_s7, 4  ;;  %s2274_s9 = int_to_ptr.hbm [resolvable:$true] %s2273_s9 }
 0x18f   : > { %1913 = vperm.xlu0 %2250, %v1910_v62   ;;  %s2275_s15 = scalar_lea.hbm %s2274_s9, 16  ;;  %p2280_p1 = scmp.lt.s32.totalorder %s2274_s9, %s4207_s3 }
 0x190   : > { %v1786_v15 = vpop.permute.xlu2 %1785  ;;  %p2276_p12 = scmp.ne.s32.totalorder %s2274_s9, %s2275_s15  ;;  %p2281_p2 = scmp.lt.s32.totalorder %s2279_s10, %s2275_s15 }
 0x191   : > { %v1863_v4 = vpop.permute.xlu1 %1862  ;;  %v1775_v23 = vpop.permute.xlu0 %1774 }
 0x192   : > { %1865 = vst.msk [vmem:[#allocation2 + $0x48] sm:$0xf] %vm4378_vm0, %v1863_v4  ;;  %vm4393_vm0 = vmmov %vm4380_vm7  ;;  %p2277_p13 = pnand %p2276_p12, %p2423_p4  ;;  %p2282_p3 = por %p2281_p2, %p2280_p1 }
 0x193   : > { %1777 = vst.msk [vmem:[#allocation2 + $0x40] sm:$0xf] %vm4379_vm3, %v1775_v23 }
 0x194   : > { %1788 = vst.msk [vmem:[#allocation2 + $0x40] sm:$0xf] %vm4380_vm7, %v1786_v15  ;;  %vm4395_vm7 = vcmask 1044352   ;;  %p2278_p0 = pneg %p2277_p13 }
 0x196   : > { %p2283_p5 = pnand %p2282_p3, %p2278_p0 }
 0x198   : > { %v1295_v26 = vpop.permute.xlu2 %1294 }
 0x199   : > { %v1398_v30 = vpop.permute.xlu1 %1397  ;;  %v1284_v45 = vpop.permute.xlu0 %1283 }
 0x19a   : > { %1400 = vst.msk [vmem:[#allocation2 + $0x30] sm:$0xf] %vm4381_vm8, %v1398_v30  ;;  %vm4396_vm8 = vmmov %vm4395_vm7 }
 0x19b   : > { %1286 = vst.msk [vmem:[#allocation2 + $0x28] sm:$0xf0] %vm457_vm15, %v1284_v45  ;;  %vm4384_vm15 = vcmask 913152  }
 0x19c   : > { %1297 = vst.msk [vmem:[#allocation2 + $0x28] sm:$0xf0] %vm469_vm13, %v1295_v26  ;;  %vm4388_vm5 = vmmov %vm4384_vm15 }
 0x19d   : > { %vm4394_vm3 = vmmov %vm4388_vm5 }
 0x1a0   : > { %v1594_v35 = vpop.permute.xlu2 %1593 }
 0x1a1   : > { %v1672_v29 = vpop.permute.xlu1 %1671  ;;  %v1584_v18 = vpop.permute.xlu0 %1583 }
 0x1a2   : > { %1674 = vst.msk [vmem:[#allocation2 + $0x38] sm:$0xf0] %vm481_vm12, %v1672_v29 }
 0x1a3   : > { %1586 = vst.msk [vmem:[#allocation2 + $0x30] sm:$0xf0] %vm481_vm12, %v1584_v18 }
 0x1a4   : > { %1596 = vst.msk [vmem:[#allocation2 + $0x30] sm:$0xf0] %vm4382_vm4, %v1594_v35  ;;  %vm1920_vm4 = vcmask 1043456  }
 0x1a8   : > { %v1885_v39 = vpop.permute.xlu2 %1884 }
 0x1a9   : > { %v1207_v31 = vpop.permute.xlu1 %1206  ;;  %v1874_v16 = vpop.permute.xlu0 %1873 }
 0x1aa   : > { %1209 = vst.msk [vmem:[#allocation2 + $0x20] sm:$0xf0] %vm469_vm13, %v1207_v31  ;;  %vm4390_vm13 = vcmask 786052  }
 0x1ab   : > { %1876 = vst.msk [vmem:[#allocation2 + $0x48] sm:$0xf] %vm4383_vm9, %v1874_v16  ;;  %vm4392_vm6 = vmmov %vm4390_vm13 }
 0x1ac   : > { %1887 = vst.msk [vmem:[#allocation2 + $0x48] sm:$0xf] %vm4384_vm15, %v1885_v39  ;;  %vm4398_vm9 = vmmov %vm4394_vm3 }
 0x1ad   : > { %vm4399_vm15 = vmmov %vm4391_vm11 }
 0x1b0   : > { %v1420_v22 = vpop.permute.xlu2 %1419 }
 0x1b1   : > { %v1495_v20 = vpop.permute.xlu1 %1494  ;;  %v1409_v52 = vpop.permute.xlu0 %1408 }
 0x1b2   : > { %1497 = vst.msk [vmem:[#allocation2 + $0x38] sm:$0xf] %vm4385_vm1, %v1495_v20  ;;  %vm4400_vm1 = vmmov %vm4395_vm7 }
 0x1b3   : > { %1411 = vst.msk [vmem:[#allocation2 + $0x30] sm:$0xf] %vm4386_vm2, %v1409_v52  ;;  %vm4401_vm2 = vcmask 917252  }
 0x1b4   : > { %1422 = vst.msk [vmem:[#allocation2 + $0x30] sm:$0xf] %vm4387_vm10, %v1420_v22  ;;  %vm4402_vm10 = vmmov %vm4401_vm2 }
 0x1b8   : > { %v1692_v3 = vpop.permute.xlu2 %1691 }
 0x1b9   : > { %v1797_v42 = vpop.permute.xlu1 %1796  ;;  %v1682_v24 = vpop.permute.xlu0 %1681 }
 0x1ba   : > { %1799 = vst.msk [vmem:[#allocation2 + $0x40] sm:$0xf] %vm4388_vm5, %v1797_v42  ;;  %vm4403_vm5 = vmmov %vm4401_vm2 }
 0x1bb   : > { %1684 = vst.msk [vmem:[#allocation2 + $0x38] sm:$0xf0] %vm4389_vm14, %v1682_v24  ;;  %vm4404_vm14 = vmmov %vm4400_vm1 }
 0x1bc   : > { %1694 = vst.msk [vmem:[#allocation2 + $0x38] sm:$0xf0] %vm4390_vm13, %v1692_v3  ;;  %vm4405_vm13 = vmmov %vm4392_vm6 }
 0x1c0   : > { %v1228_v63 = vpop.permute.xlu2 %1227 }
 0x1c1   : > { %v1306_v2 = vpop.permute.xlu1 %1305  ;;  %v1218_v13 = vpop.permute.xlu0 %1217 }
 0x1c2   : > { %1308 = vst.msk [vmem:[#allocation2 + $0x28] sm:$0xf0] %vm481_vm12, %v1306_v2 }
 0x1c3   : > { %1220 = vst.msk [vmem:[#allocation2 + $0x20] sm:$0xf0] %vm481_vm12, %v1218_v13  ;;  %vm4397_vm12 = vmmov %vm4392_vm6 }
 0x1c4   : > { %1230 = vst.msk [vmem:[#allocation2 + $0x20] sm:$0xf0] %vm4391_vm11, %v1228_v63  ;;  %vm4406_vm11 = vcmask 1048452  }
 0x1c8   : > { %v1517_v8 = vpop.permute.xlu2 %1516 }
 0x1c9   : > { %v1604_v59 = vpop.permute.xlu1 %1603  ;;  %v1506_v37 = vpop.permute.xlu0 %1505 }
 0x1ca   : > { %1606 = vst.msk [vmem:[#allocation2 + $0x30] sm:$0xf0] %vm4392_vm6, %v1604_v59  ;;  %vm4407_vm6 = vmmov %vm4406_vm11 }
 0x1cb   : > { %1508 = vst.msk [vmem:[#allocation2 + $0x38] sm:$0xf] %vm4393_vm0, %v1506_v37  ;;  %vm4408_vm0 = vmmov %vm4407_vm6 }
 0x1cc   : > { %1519 = vst.msk [vmem:[#allocation2 + $0x38] sm:$0xf] %vm4394_vm3, %v1517_v8  ;;  %vm4409_vm3 = vmmov %vm4401_vm2 }
 0x1d0   : > { %v1238_v50 = vpop.permute.xlu2 %1237 }
 0x1d1   : > { %v1896_v54 = vpop.permute.xlu1 %1895  ;;  %v1808_v5 = vpop.permute.xlu0 %1807  ;;  %1240 = vst.msk [vmem:[#allocation2 + $0x20] sm:$0xf0] %vm4397_vm12, %v1238_v50 }
 0x1d2   : > { %1898 = vst.msk [vmem:[#allocation2 + $0x48] sm:$0xf] %vm4395_vm7, %v1896_v54  ;;  %vm4410_vm7 = vmmov %vm4408_vm0 }
 0x1d3   : > { %1810 = vst.msk [vmem:[#allocation2 + $0x40] sm:$0xf] %vm4396_vm8, %v1808_v5  ;;  %vm1916_vm8 = vcmask 293888  }
 0x1d8   : > { %v1528_v56 = vpop.permute.xlu2 %1527 }
 0x1d9   : > { %v1431_v6 = vpop.permute.xlu1 %1430  ;;  %v1316_v21 = vpop.permute.xlu0 %1315  ;;  %v1909_v7 = vld [vmem:[#allocation2 + $0x48] sm:$0xf]  ;;  %1530 = vst.msk [vmem:[#allocation2 + $0x38] sm:$0xf] %vm4400_vm1, %v1528_v56 }
 0x1da   : > { %1433 = vst.msk [vmem:[#allocation2 + $0x30] sm:$0xf] %vm4398_vm9, %v1431_v6  ;;  %v1908_v27 = vld [vmem:[#allocation2 + $0x40] sm:$0xf]  ;;  %2162 = vmatpush.msk.msra.mxu1 %vm1920_vm4, %v1909_v7 }
 0x1db   : > { %1318 = vst.msk [vmem:[#allocation2 + $0x28] sm:$0xf0] %vm4399_vm15, %v1316_v21  ;;  %2160 = vmatpush.msk.msra.mxu0 %vm1920_vm4, %v1908_v27 }
 0x1e0   : > { %v1248_v58 = vpop.permute.xlu2 %1247 }
 0x1e1   : > { %v1702_v47 = vpop.permute.xlu1 %1701  ;;  %v1614_v61 = vpop.permute.xlu0 %1613  ;;  %1250 = vst.msk [vmem:[#allocation2 + $0x20] sm:$0xf0] %vm4403_vm5, %v1248_v58 }
 0x1e2   : > { %1704 = vst.msk [vmem:[#allocation2 + $0x38] sm:$0xf0] %vm4401_vm2, %v1702_v47 }
 0x1e3   : > { %1616 = vst.msk [vmem:[#allocation2 + $0x30] sm:$0xf0] %vm4402_vm10, %v1614_v61 }
 0x1e8   : > { %v1346_v25 = vpop.permute.xlu2 %1345 }
 0x1e9   : > { %v1442_v53 = vpop.permute.xlu1 %1441  ;;  %v1326_v10 = vpop.permute.xlu0 %1325 }
 0x1ea   : > { %1444 = vst.msk [vmem:[#allocation2 + $0x30] sm:$0xf] %vm4404_vm14, %v1442_v53 }
 0x1eb   : > { %1328 = vst.msk [vmem:[#allocation2 + $0x28] sm:$0xf0] %vm4405_vm13, %v1326_v10 }
 0x1f1   : > { %v1712_v19 = vpop.permute.xlu1 %1711  ;;  %v1624_v33 = vpop.permute.xlu0 %1623 }
 0x1f2   : > { %1714 = vst.msk [vmem:[#allocation2 + $0x38] sm:$0xf0] %vm4406_vm11, %v1712_v19 }
 0x1f3   : > { %1626 = vst.msk [vmem:[#allocation2 + $0x30] sm:$0xf0] %vm4407_vm6, %v1624_v33 }
 0x1f9   : > { %v1258_v51 = vpop.permute.xlu1 %1257  ;;  %v1336_v9 = vpop.permute.xlu0 %1335  ;;  %v1907_v1 = vld [vmem:[#allocation2 + $0x38] sm:$0xff] }
 0x1fa   : > { %1260 = vst.msk [vmem:[#allocation2 + $0x20] sm:$0xf0] %vm4408_vm0, %v1258_v51  ;;  %v1906_v44 = vld [vmem:[#allocation2 + $0x30] sm:$0xff]  ;;  %1959 = vmatpush.msra.mxu1 %v1907_v1 }
 0x1fb   : > { %1338 = vst.msk [vmem:[#allocation2 + $0x28] sm:$0xf0] %vm4409_vm3, %v1336_v9  ;;  %1939 = vmatpush.msra.mxu0 %v1906_v44 }
 0x1fc   : > { %1348 = vst.msk [vmem:[#allocation2 + $0x28] sm:$0xf0] %vm4410_vm7, %v1346_v25 }
 0x201   : > { %v1904_v0 = vld [vmem:[#allocation2 + $0x20] sm:$0xff]  ;;  %v1914_v12 = vpop.permute.xlu0 %1913 }
 0x202   : > { %1940 = vmatpush.msra.mxu0 %v1904_v0 }
 0x203   : > { %v1905_v40 = vld [vmem:[#allocation2 + $0x28] sm:$0xff] }
 0x204   : > { %1960 = vmatpush.msra.mxu1 %v1905_v40  ;;  %1941 = vmatpush.msra.mxu0 %v1902_v57 }
 0x206   : > { %1961 = vmatpush.msra.mxu1 %v1903_v49  ;;  %1942 = vmatpush.msra.mxu0 %v1900_v41 }
 0x207   : > { %2161 = vmatmul.msk.f32.vlgmr.msra.gmra.mxu0 %vm1916_vm8, %v1899_v32 }
 0x208   : > { %1962 = vmatpush.msra.mxu1 %v1901_v43 }
 0x209   : > { %2163 = vmatmul.msk.f32.vlgmr.msra.gmra.mxu1 %vm1916_vm8, %v1899_v32 }
 0x284   : > { %v1944_v17 = vpop.f32.mrf.mxu0 }
 0x285   : > { %v1945_v48 = vadd.f32 %v1944_v17, %v1914_v12 }
 0x286   : > { %v1964_v38 = vpop.f32.mrf.mxu1 }
 0x287   : > { %v1965_v55 = vadd.f32 %v1964_v38, %v1914_v12  ;;  %1967 = vst [vmem:[%s212_s4] sm:$0xff] %v1945_v48 }
 0x289   : > { %1968 = vst [vmem:[%s212_s4 + $0x8] sm:$0xff] %v1965_v55 }
 0x28a   : > { %2286 = shalt.err (!%p2283_p5)
}
 0x28b   : > { %2171 = dma.vmem_to_hbm [thread:$0]  (%p2423_p4), %s1988_s5, 256, %s1990_s7, %s1970_s8  }
 0x28c PF: > { %p2177_p6 = scmp.ge.s32.totalorder %s2337_s17, 2  ;;  %s2001_s19 = sand.u32 1, %s2317_s12  }
 0x28d   : > { %s2002_s21 = scalar_lea.sflag [#allocation4], %s2001_s19 }
 0x28e   : > { %p2174_p7 = pnand %p2177_p6, %p2430_p8 }
 0x290   : > { %p2175_p9 = pneg %p2174_p7 }
 0x292   : > { %2312 = dma.done.wait (%p2175_p9), %s2002_s21, 256  }
 0x293   : > { %2314 = vsyncadd (%p2175_p9), %s2002_s21, 4294967040  ;;  %s16_s17 = sadd.s32 1, %s2337_s17   ;;  %s4411_s12 = smov %s2321_s13 }
 0x294   : > { %p13_p10 = scmp.ge.s32.totalorder %s16_s17, 4   ;;  %s4412_s13 = smov %s2325_s14 }
 0x295   : > { %s4413_s14 = smov %s2436_s25  ;;  %s4414_s15 = smov %s2333_s16 }
 0x296   : > { %s4415_s16 = smov %s4417_s20  ;;  %15 = sbr.rel (!%p13_p10) target bundleno = 4 (0x4), region = 76 }
 0x29b   :  { %2008 = vsyncpa [#allocation4], 1 }
 0x29c   :  { %2010 = vsyncpa [#allocation4 + $0x1], 1 }

</bundles_post_ra>
